<compile_context>
chip_gen: v6e
topology: v6e:2x2x1
jax: 0.10.0
libtpu: 0.0.40
codegen_flags: <defaults>
</compile_context>

<pallas_src>
import functools

import jax
import jax.numpy as jnp
import numpy as np
from jax.experimental import pallas as pl
from jax.experimental.pallas import tpu as pltpu

EPS = 1e-5
LPAD = 8            # zero-pad columns on each side of the mid slab (aligned store)


# ------------------------------ fused kernel --------------------------------

def _fused_residual_kernel(xm_ref, xt_ref, xb_ref,
                           w1_ref, b1_ref,
                           w2_ref, b2_ref,
                           w3_ref, b3_ref,
                           o_ref, mid_ref, *, identity):
    _, th, Ws, Cin_p = xm_ref.shape
    Cmid = w1_ref.shape[1]
    Cout_p = w3_ref.shape[1]
    i = pl.program_id(1)
    last = pl.num_programs(1) - 1

    # ---- conv1 + bn1 + relu over tile rows + both 1-row halos: ONE matmul --
    x_full = jnp.concatenate([xt_ref[0], xm_ref[0], xb_ref[0]], axis=0)
    z = jnp.dot(x_full.reshape((th + 2) * Ws, Cin_p).astype(jnp.bfloat16),
                w1_ref[...], preferred_element_type=jnp.float32)
    z = jnp.maximum(z + b1_ref[...], 0.0).reshape(th + 2, Ws, Cmid)
    # Zero the halo rows where the tile touches the image border (this is
    # exactly conv2's zero padding in the mid-activation space).
    row = jax.lax.broadcasted_iota(jnp.int32, (th + 2, 1, 1), 0)
    keep = jnp.logical_and(jnp.logical_or(row > 0, i > 0),
                           jnp.logical_or(row < th + 1, i < last))
    z = jnp.where(keep, z, 0.0)

    # ---- stage the zero-padded mid slab in bf16 VMEM scratch ---------------
    # (pad columns rewritten every step on purpose: scratch is NOT guaranteed
    #  zero-initialized and gating on grid step 0 is unsafe under megacore
    #  grid partitioning; the two pad stores are small.)
    zcol = jnp.zeros((th + 2, LPAD, Cmid), mid_ref.dtype)
    mid_ref[:, :LPAD, :] = zcol
    mid_ref[:, LPAD + Ws:, :] = zcol
    mid_ref[:, LPAD:LPAD + Ws, :] = z.astype(mid_ref.dtype)

    # ---- conv2: 3x3 as 3 MXU matmuls with K = 3*Cmid (dy folded into K) ----
    y2 = None
    for kx in range(3):                       # static unroll: 3 width taps
        off = LPAD - 1 + kx
        s = mid_ref[:, off:off + Ws, :]       # (th+2, Ws, Cmid) bf16
        patch = jnp.concatenate([s[0:th], s[1:th + 1], s[2:th + 2]], axis=-1)
        patch = patch.reshape(th * Ws, 3 * Cmid)
        c = jnp.dot(patch, w2_ref[kx], preferred_element_type=jnp.float32)
        y2 = c if y2 is None else y2 + c
    h = jnp.maximum(y2 + b2_ref[...], 0.0)    # (th*Ws, Cmid) f32

    # ---- conv3 + bn3 (+ shortcut) + add + relu, lane-dense store -----------
    if identity:
        # identity shortcut: no matmul, f32 residual add
        y = jnp.dot(h.astype(jnp.bfloat16), w3_ref[...],
                    preferred_element_type=jnp.float32) + b3_ref[...]
        y = y + xm_ref[0].reshape(th * Ws, Cin_p)
    else:
        # projection shortcut fused into conv3: K = Cmid + Cin_p
        hx = jnp.concatenate(
            [h.astype(jnp.bfloat16),
             xm_ref[0].reshape(th * Ws, Cin_p).astype(jnp.bfloat16)], axis=-1)
        y = jnp.dot(hx, w3_ref[...],
                    preferred_element_type=jnp.float32) + b3_ref[...]
    out = jnp.maximum(y, 0.0)
    o_ref[...] = out.reshape(1, th, Ws, Cout_p).astype(o_ref.dtype)


# ------------------------------ module forward ------------------------------

def _round_up(a, b):
    return ((a + b - 1) // b) * b


def _pad_axis(a, axis, new):
    pad = new - a.shape[axis]
    if pad <= 0:
        return a
    widths = [(0, 0)] * a.ndim
    widths[axis] = (0, pad)
    return jnp.pad(a, widths)


def _fold_bn(bn):
    scale = bn["gamma"] / jnp.sqrt(bn["var"] + EPS)
    shift = bn["beta"] - bn["mean"] * scale
    return scale.astype(jnp.float32), shift.astype(jnp.float32)


def _pick_row_tile(hs, ws, cin_p, cout_p, cmid, n_imgs,
                   budget_bytes=12 * 1024 * 1024):
    """Largest row tile (<=64, <=VMEM budget) that divides Hs."""
    per_row = (2 * ws * cin_p * 4          # x block, double buffered, f32
               + 2 * ws * cout_p * 4       # out block, double buffered, f32
               + (ws + 2 * LPAD) * cmid * 2)   # bf16 mid slab row
    t = int(min(hs, 64, max(1, budget_bytes // per_row)))
    while hs % t:
        t -= 1
    if n_imgs == 1 and t == hs and hs > 1:     # keep >=2 grid points (2 TCs)
        t = hs // 2
        while hs % t:
            t -= 1
    return t


def residual_module_forward(x_nchw, params, stride=1):
    """Forward of ResidualModule (eval-mode BN).  Input/output are NCHW."""
    x = jnp.transpose(x_nchw, (0, 2, 3, 1)).astype(jnp.float32)   # -> NHWC
    if stride != 1:
        # 1x1 conv with stride == subsample first (both conv1 & shortcut are 1x1)
        # TODO(synk): fold the stride subsample into the BlockSpec index_map.
        x = x[:, ::stride, ::stride, :]
    N, Hs, Ws, Cin = x.shape
    Cmid = params["w1"].shape[1]
    Cout = params["w3"].shape[1]
    Cin_p = _round_up(Cin, 128)
    Cout_p = _round_up(Cout, 128)
    identity = (stride == 1 and Cin == Cout)

    if Cin_p > Cin:                            # lane-dense input channels
        x = _pad_axis(x, 3, Cin_p)

    # ---- fold BN scales into weight columns; keep the shifts ---------------
    sc1, sh1 = _fold_bn(params["bn1"])
    sc2, sh2 = _fold_bn(params["bn2"])
    sc3, sh3 = _fold_bn(params["bn3"])

    w1 = (_pad_axis(params["w1"], 0, Cin_p) * sc1[None, :]).astype(jnp.bfloat16)
    b1 = sh1.reshape(1, Cmid)

    w2 = params["w2"] * sc2[None, None, None, :]           # (3,3,Cmid,Cmid) HWIO
    w2k = jnp.stack(
        [jnp.concatenate([w2[ky, kx] for ky in range(3)], axis=0)
         for kx in range(3)], axis=0).astype(jnp.bfloat16)  # (3, 3*Cmid, Cmid)
    b2 = sh2.reshape(1, Cmid)

    w3 = _pad_axis(params["w3"] * sc3[None, :], 1, Cout_p)  # (Cmid, Cout_p)
    b3 = _pad_axis(sh3, 0, Cout_p)

    if identity:
        w_last = w3.astype(jnp.bfloat16)                    # (Cmid, Cout_p)
        b_last = b3.reshape(1, Cout_p)
    else:
        scsc, shsc = _fold_bn(params["bnsc"])
        wsc = _pad_axis(_pad_axis(params["wsc"] * scsc[None, :], 1, Cout_p),
                        0, Cin_p)                           # (Cin_p, Cout_p)
        w_last = jnp.concatenate([w3, wsc], axis=0).astype(jnp.bfloat16)
        b_last = (b3 + _pad_axis(shsc, 0, Cout_p)).reshape(1, Cout_p)
    k_last = w_last.shape[0]

    th = _pick_row_tile(Hs, Ws, Cin_p, Cout_p, Cmid, N)
    n_th = Hs // th

    const2 = lambda n, i: (0, 0)
    kernel = functools.partial(_fused_residual_kernel, identity=identity)

    out = pl.pallas_call(
        kernel,
        out_shape=jax.ShapeDtypeStruct((N, Hs, Ws, Cout_p), jnp.float32),
        grid=(N, n_th),
        in_specs=[
            # x row-tile + clamped 1-row top/bottom halos
            pl.BlockSpec((1, th, Ws, Cin_p), lambda n, i: (n, i, 0, 0)),
            pl.BlockSpec((1, 1, Ws, Cin_p),
                         lambda n, i: (n, jnp.maximum(i * th - 1, 0), 0, 0)),
            pl.BlockSpec((1, 1, Ws, Cin_p),
                         lambda n, i: (n, jnp.minimum((i + 1) * th, Hs - 1),
                                       0, 0)),
            pl.BlockSpec((Cin_p, Cmid), const2),                 # w1 (scaled)
            pl.BlockSpec((1, Cmid), const2),                     # bn1 shift
            pl.BlockSpec((3, 3 * Cmid, Cmid), lambda n, i: (0, 0, 0)),  # w2 K-folded
            pl.BlockSpec((1, Cmid), const2),                     # bn2 shift
            pl.BlockSpec((k_last, Cout_p), const2),              # conv3 (+shortcut)
            pl.BlockSpec((1, Cout_p), const2),                   # combined shift
        ],
        out_specs=pl.BlockSpec((1, th, Ws, Cout_p),
                               lambda n, i: (n, i, 0, 0)),
        scratch_shapes=[
            pltpu.VMEM((th + 2, Ws + 2 * LPAD, Cmid), jnp.bfloat16),  # mid slab
        ],
        compiler_params=pltpu.CompilerParams(
            dimension_semantics=("parallel", "parallel"),
            vmem_limit_bytes=48 * 1024 * 1024),
    )(x, x, x, w1, b1, w2k, b2, w_last, b_last)

    y = out[..., :Cout]                                  # drop channel padding
    return jnp.transpose(y, (0, 3, 1, 2))                # -> NCHW


# --------------------------- parameters & reference -------------------------

def init_params(key, in_channels, out_channels, mid=128):
    ks = jax.random.split(key, 8)

    def conv_w(k, cin, cout, kh=1, kw=1):
        fan_in = cin * kh * kw
        return (jax.random.normal(k, (kh, kw, cin, cout), jnp.float32)
                / np.sqrt(fan_in))

    def bn(k, c):
        k1, k2, k3, k4 = jax.random.split(k, 4)
        return dict(
            gamma=1.0 + 0.1 * jax.random.normal(k1, (c,), jnp.float32),
            beta=0.1 * jax.random.normal(k2, (c,), jnp.float32),
            mean=0.1 * jax.random.normal(k3, (c,), jnp.float32),
            var=jnp.abs(jax.random.normal(k4, (c,), jnp.float32)) + 0.5,
        )

    return dict(
        w1=conv_w(ks[0], in_channels, mid)[0, 0],            # (Cin, 128)
        bn1=bn(ks[1], mid),
        w2=conv_w(ks[2], mid, mid, 3, 3),                    # (3,3,128,128)
        bn2=bn(ks[3], mid),
        w3=conv_w(ks[4], mid, out_channels)[0, 0],           # (128, Cout)
        bn3=bn(ks[5], out_channels),
        wsc=conv_w(ks[6], in_channels, out_channels)[0, 0],  # (Cin, Cout)
        bnsc=bn(ks[7], out_channels),
    )


def residual_ref(x_nchw, params, stride=1):
    """Pure-JAX reference (lax.conv, f32) for verification."""
    x = jnp.transpose(x_nchw, (0, 2, 3, 1)).astype(jnp.float32)

    def conv1x1(a, w, s=1):
        return jax.lax.conv_general_dilated(
            a, w.reshape(1, 1, *w.shape), (s, s), "VALID",
            dimension_numbers=("NHWC", "HWIO", "NHWC"))

    def bn(y, p):
        sc = p["gamma"] / jnp.sqrt(p["var"] + EPS)
        return y * sc + (p["beta"] - p["mean"] * sc)

    out = jnp.maximum(bn(conv1x1(x, params["w1"], stride), params["bn1"]), 0.0)
    out = jax.lax.conv_general_dilated(
        out, params["w2"], (1, 1), ((1, 1), (1, 1)),
        dimension_numbers=("NHWC", "HWIO", "NHWC"))
    out = jnp.maximum(bn(out, params["bn2"]), 0.0)
    out = bn(conv1x1(out, params["w3"]), params["bn3"])
    Cin, Cout = x.shape[-1], params["w3"].shape[1]
    if stride != 1 or Cin != Cout:
        short = bn(conv1x1(x, params["wsc"], stride), params["bnsc"])
    else:
        short = x
    out = jnp.maximum(out + short, 0.0)
    return jnp.transpose(out, (0, 3, 1, 2))


# ----------------------------------- main -----------------------------------

if __name__ == "__main__":
    key = jax.random.PRNGKey(0)
    kx, kp, kx2, kp2 = jax.random.split(key, 4)

    # projection-shortcut case (Cin != Cout), NCHW input like the torch module
    N, Cin, H, W = 2, 4, 16, 16
    Cout = 8
    x = jax.random.normal(kx, (N, Cin, H, W), jnp.float32)
    params = init_params(kp, Cin, Cout)

    y = jax.block_until_ready(residual_module_forward(x, params, stride=1))
    y_ref = residual_ref(x, params, stride=1)
    np.testing.assert_allclose(np.asarray(y), np.asarray(y_ref),
                               rtol=3e-2, atol=3e-2)
    assert y.shape == (N, Cout, H, W)

    # identity-shortcut case (Cin == Cout, stride 1): f32 residual add, no eye matmul
    x2 = jax.random.normal(kx2, (N, 8, H, W), jnp.float32)
    params2 = init_params(kp2, 8, 8)
    y2 = jax.block_until_ready(residual_module_forward(x2, params2, stride=1))
    y2_ref = residual_ref(x2, params2, stride=1)
    np.testing.assert_allclose(np.asarray(y2), np.asarray(y2_ref),
                               rtol=3e-2, atol=3e-2)

    # strided projection case (stride applied to conv1 and shortcut, like PyTorch)
    y3 = jax.block_until_ready(residual_module_forward(x, params, stride=2))
    y3_ref = residual_ref(x, params, stride=2)
    np.testing.assert_allclose(np.asarray(y3), np.asarray(y3_ref),
                               rtol=3e-2, atol=3e-2)
    assert y3.shape == (N, Cout, H // 2, W // 2)

    print("KERNEL_OK")
</pallas_src>

<mosaic_0001>
module attributes {stable_mosaic.version = 11 : i64} {
  func.func @_fused_residual_kernel(%arg0: i32, %arg1: i32, %arg2: memref<1x16x16x128xf32, #tpu.memory_space<vmem>>, %arg3: memref<1x1x16x128xf32, #tpu.memory_space<vmem>>, %arg4: memref<1x1x16x128xf32, #tpu.memory_space<vmem>>, %arg5: memref<128x128xbf16, #tpu.memory_space<vmem>>, %arg6: memref<1x128xf32, #tpu.memory_space<vmem>>, %arg7: memref<3x384x128xbf16, #tpu.memory_space<vmem>>, %arg8: memref<1x128xf32, #tpu.memory_space<vmem>>, %arg9: memref<256x128xbf16, #tpu.memory_space<vmem>>, %arg10: memref<1x128xf32, #tpu.memory_space<vmem>>, %arg11: memref<1x16x16x128xf32, #tpu.memory_space<vmem>>, %arg12: memref<18x32x128xbf16, #tpu.memory_space<vmem>>) attributes {dimension_semantics = [#tpu.dimension_semantics<parallel>, #tpu.dimension_semantics<parallel>], iteration_bounds = array<i64: 2, 1>, scalar_prefetch = 0 : i64, scratch_operands = 1 : i64, tpu.core_type = #tpu.core_type<tc>, window_params = [{transform_indices = @transform_0, window_bounds = array<i64: 1, 16, 16, 128>}, {transform_indices = @transform_1, window_bounds = array<i64: 1, 1, 16, 128>}, {transform_indices = @transform_2, window_bounds = array<i64: 1, 1, 16, 128>}, {pipeline_mode = #tpu.pipeline_mode<synchronous>, transform_indices = @transform_3, window_bounds = array<i64: 128, 128>}, {pipeline_mode = #tpu.pipeline_mode<synchronous>, transform_indices = @transform_4, window_bounds = array<i64: 1, 128>}, {pipeline_mode = #tpu.pipeline_mode<synchronous>, transform_indices = @transform_5, window_bounds = array<i64: 3, 384, 128>}, {pipeline_mode = #tpu.pipeline_mode<synchronous>, transform_indices = @transform_6, window_bounds = array<i64: 1, 128>}, {pipeline_mode = #tpu.pipeline_mode<synchronous>, transform_indices = @transform_7, window_bounds = array<i64: 256, 128>}, {pipeline_mode = #tpu.pipeline_mode<synchronous>, transform_indices = @transform_8, window_bounds = array<i64: 1, 128>}, {transform_indices = @transform_9, window_bounds = array<i64: 1, 16, 16, 128>}]} {
    %c0 = arith.constant 0 : index
    %c0_0 = arith.constant 0 : index
    %c0_1 = arith.constant 0 : index
    %c0_2 = arith.constant 0 : index
    %0 = vector.load %arg3[%c0, %c0_0, %c0_1, %c0_2] : memref<1x1x16x128xf32, #tpu.memory_space<vmem>>, vector<1x1x16x128xf32>
    %1 = vector.shape_cast %0 : vector<1x1x16x128xf32> to vector<1x16x128xf32>
    %c0_3 = arith.constant 0 : index
    %c0_4 = arith.constant 0 : index
    %c0_5 = arith.constant 0 : index
    %c0_6 = arith.constant 0 : index
    %2 = vector.load %arg2[%c0_3, %c0_4, %c0_5, %c0_6] : memref<1x16x16x128xf32, #tpu.memory_space<vmem>>, vector<1x16x16x128xf32>
    %3 = vector.shape_cast %2 : vector<1x16x16x128xf32> to vector<16x16x128xf32>
    %c0_7 = arith.constant 0 : index
    %c0_8 = arith.constant 0 : index
    %c0_9 = arith.constant 0 : index
    %c0_10 = arith.constant 0 : index
    %4 = vector.load %arg4[%c0_7, %c0_8, %c0_9, %c0_10] : memref<1x1x16x128xf32, #tpu.memory_space<vmem>>, vector<1x1x16x128xf32>
    %5 = vector.shape_cast %4 : vector<1x1x16x128xf32> to vector<1x16x128xf32>
    %6 = tpu.concatenate %1, %3, %5 in 0 : vector<1x16x128xf32>, vector<16x16x128xf32>, vector<1x16x128xf32> -> vector<18x16x128xf32>
    %7 = vector.shape_cast %6 : vector<18x16x128xf32> to vector<288x128xf32>
    %8 = arith.truncf %7 : vector<288x128xf32> to vector<288x128xbf16>
    %c0_11 = arith.constant 0 : index
    %c0_12 = arith.constant 0 : index
    %9 = vector.load %arg5[%c0_11, %c0_12] : memref<128x128xbf16, #tpu.memory_space<vmem>>, vector<128x128xbf16>
    %cst = arith.constant dense<0.000000e+00> : vector<288x128xf32>
    %10 = tpu.matmul %8, %9, %cst {dimension_numbers = #tpu.dot_dimension_numbers<[1], [0], [0], [1], [0, 0, 1, 1], [], []>} : vector<288x128xbf16>, vector<128x128xbf16>, vector<288x128xf32> -> vector<288x128xf32>
    %c0_13 = arith.constant 0 : index
    %c0_14 = arith.constant 0 : index
    %11 = vector.load %arg6[%c0_13, %c0_14] : memref<1x128xf32, #tpu.memory_space<vmem>>, vector<1x128xf32>
    %12 = vector.broadcast %11 : vector<1x128xf32> to vector<288x128xf32>
    %13 = arith.addf %10, %12 : vector<288x128xf32>
    %cst_15 = arith.constant 0.000000e+00 : f32
    %14 = vector.broadcast %cst_15 : f32 to vector<288x128xf32>
    %15 = arith.maximumf %13, %14 : vector<288x128xf32>
    %16 = vector.shape_cast %15 : vector<288x128xf32> to vector<18x16x128xf32>
    %17 = tpu.iota {dimensions = array<i32: 0>} : vector<18x1x1xi32>
    %c0_i32 = arith.constant 0 : i32
    %18 = vector.broadcast %c0_i32 : i32 to vector<18x1x1xi32>
    %19 = arith.cmpi sgt, %17, %18 : vector<18x1x1xi32>
    %c0_i32_16 = arith.constant 0 : i32
    %20 = arith.cmpi sgt, %arg1, %c0_i32_16 : i32
    %21 = vector.broadcast %20 : i1 to vector<18x1x1xi1>
    %22 = arith.ori %19, %21 : vector<18x1x1xi1>
    %c17_i32 = arith.constant 17 : i32
    %23 = vector.broadcast %c17_i32 : i32 to vector<18x1x1xi32>
    %24 = arith.cmpi slt, %17, %23 : vector<18x1x1xi32>
    %c0_i32_17 = arith.constant 0 : i32
    %25 = arith.cmpi slt, %arg1, %c0_i32_17 : i32
    %26 = vector.broadcast %25 : i1 to vector<18x1x1xi1>
    %27 = arith.ori %24, %26 : vector<18x1x1xi1>
    %28 = arith.andi %22, %27 : vector<18x1x1xi1>
    %cst_18 = arith.constant 0.000000e+00 : f32
    %29 = vector.shape_cast %28 : vector<18x1x1xi1> to vector<18x1x1xi1>
    %30 = vector.broadcast %29 : vector<18x1x1xi1> to vector<18x16x128xi1>
    %31 = vector.broadcast %cst_18 : f32 to vector<18x16x128xf32>
    %32 = arith.select %30, %16, %31 : vector<18x16x128xi1>, vector<18x16x128xf32>
    %cst_19 = arith.constant 0.000000e+00 : bf16
    %33 = vector.broadcast %cst_19 : bf16 to vector<18x8x128xbf16>
    %c0_20 = arith.constant 0 : index
    %c0_21 = arith.constant 0 : index
    %c0_22 = arith.constant 0 : index
    %34 = vector.load %arg12[%c0_20, %c0_21, %c0_22] : memref<18x32x128xbf16, #tpu.memory_space<vmem>>, vector<18x8x128xbf16>
    tpu.vector_store %arg12[%c0_20, %c0_21, %c0_22], %33 {strides = array<i32>} : memref<18x32x128xbf16, #tpu.memory_space<vmem>>, vector<18x8x128xbf16>,
    %c0_23 = arith.constant 0 : index
    %c24 = arith.constant 24 : index
    %c0_24 = arith.constant 0 : index
    %35 = vector.load %arg12[%c0_23, %c24, %c0_24] : memref<18x32x128xbf16, #tpu.memory_space<vmem>>, vector<18x8x128xbf16>
    tpu.vector_store %arg12[%c0_23, %c24, %c0_24], %33 {strides = array<i32>} : memref<18x32x128xbf16, #tpu.memory_space<vmem>>, vector<18x8x128xbf16>,
    %36 = arith.truncf %32 : vector<18x16x128xf32> to vector<18x16x128xbf16>
    %c0_25 = arith.constant 0 : index
    %c8 = arith.constant 8 : index
    %c0_26 = arith.constant 0 : index
    %37 = vector.load %arg12[%c0_25, %c8, %c0_26] : memref<18x32x128xbf16, #tpu.memory_space<vmem>>, vector<18x16x128xbf16>
    tpu.vector_store %arg12[%c0_25, %c8, %c0_26], %36 {strides = array<i32>} : memref<18x32x128xbf16, #tpu.memory_space<vmem>>, vector<18x16x128xbf16>,
    %c0_27 = arith.constant 0 : index
    %c7 = arith.constant 7 : index
    %c0_28 = arith.constant 0 : index
    %38 = vector.load %arg12[%c0_27, %c7, %c0_28] : memref<18x32x128xbf16, #tpu.memory_space<vmem>>, vector<18x16x128xbf16>
    %39 = vector.extract_strided_slice %38 {offsets = [0, 0, 0], sizes = [16, 16, 128], strides = [1, 1, 1]} : vector<18x16x128xbf16> to vector<16x16x128xbf16>
    %40 = vector.extract_strided_slice %38 {offsets = [1, 0, 0], sizes = [16, 16, 128], strides = [1, 1, 1]} : vector<18x16x128xbf16> to vector<16x16x128xbf16>
    %41 = vector.extract_strided_slice %38 {offsets = [2, 0, 0], sizes = [16, 16, 128], strides = [1, 1, 1]} : vector<18x16x128xbf16> to vector<16x16x128xbf16>
    %42 = tpu.concatenate %39, %40, %41 in 2 : vector<16x16x128xbf16>, vector<16x16x128xbf16>, vector<16x16x128xbf16> -> vector<16x16x384xbf16>
    %43 = vector.shape_cast %42 : vector<16x16x384xbf16> to vector<256x384xbf16>
    %c0_29 = arith.constant 0 : index
    %c0_30 = arith.constant 0 : index
    %c0_31 = arith.constant 0 : index
    %44 = vector.load %arg7[%c0_29, %c0_30, %c0_31] : memref<3x384x128xbf16, #tpu.memory_space<vmem>>, vector<1x384x128xbf16>
    %45 = vector.shape_cast %44 : vector<1x384x128xbf16> to vector<384x128xbf16>
    %cst_32 = arith.constant dense<0.000000e+00> : vector<256x128xf32>
    %46 = tpu.matmul %43, %45, %cst_32 {dimension_numbers = #tpu.dot_dimension_numbers<[1], [0], [0], [1], [0, 0, 1, 1], [], []>} : vector<256x384xbf16>, vector<384x128xbf16>, vector<256x128xf32> -> vector<256x128xf32>
    %c0_33 = arith.constant 0 : index
    %c8_34 = arith.constant 8 : index
    %c0_35 = arith.constant 0 : index
    %47 = vector.load %arg12[%c0_33, %c8_34, %c0_35] : memref<18x32x128xbf16, #tpu.memory_space<vmem>>, vector<18x16x128xbf16>
    %48 = vector.extract_strided_slice %47 {offsets = [0, 0, 0], sizes = [16, 16, 128], strides = [1, 1, 1]} : vector<18x16x128xbf16> to vector<16x16x128xbf16>
    %49 = vector.extract_strided_slice %47 {offsets = [1, 0, 0], sizes = [16, 16, 128], strides = [1, 1, 1]} : vector<18x16x128xbf16> to vector<16x16x128xbf16>
    %50 = vector.extract_strided_slice %47 {offsets = [2, 0, 0], sizes = [16, 16, 128], strides = [1, 1, 1]} : vector<18x16x128xbf16> to vector<16x16x128xbf16>
    %51 = tpu.concatenate %48, %49, %50 in 2 : vector<16x16x128xbf16>, vector<16x16x128xbf16>, vector<16x16x128xbf16> -> vector<16x16x384xbf16>
    %52 = vector.shape_cast %51 : vector<16x16x384xbf16> to vector<256x384xbf16>
    %c1 = arith.constant 1 : index
    %c0_36 = arith.constant 0 : index
    %c0_37 = arith.constant 0 : index
    %53 = vector.load %arg7[%c1, %c0_36, %c0_37] : memref<3x384x128xbf16, #tpu.memory_space<vmem>>, vector<1x384x128xbf16>
    %54 = vector.shape_cast %53 : vector<1x384x128xbf16> to vector<384x128xbf16>
    %cst_38 = arith.constant dense<0.000000e+00> : vector<256x128xf32>
    %55 = tpu.matmul %52, %54, %cst_38 {dimension_numbers = #tpu.dot_dimension_numbers<[1], [0], [0], [1], [0, 0, 1, 1], [], []>} : vector<256x384xbf16>, vector<384x128xbf16>, vector<256x128xf32> -> vector<256x128xf32>
    %56 = arith.addf %46, %55 : vector<256x128xf32>
    %c0_39 = arith.constant 0 : index
    %c9 = arith.constant 9 : index
    %c0_40 = arith.constant 0 : index
    %57 = vector.load %arg12[%c0_39, %c9, %c0_40] : memref<18x32x128xbf16, #tpu.memory_space<vmem>>, vector<18x16x128xbf16>
    %58 = vector.extract_strided_slice %57 {offsets = [0, 0, 0], sizes = [16, 16, 128], strides = [1, 1, 1]} : vector<18x16x128xbf16> to vector<16x16x128xbf16>
    %59 = vector.extract_strided_slice %57 {offsets = [1, 0, 0], sizes = [16, 16, 128], strides = [1, 1, 1]} : vector<18x16x128xbf16> to vector<16x16x128xbf16>
    %60 = vector.extract_strided_slice %57 {offsets = [2, 0, 0], sizes = [16, 16, 128], strides = [1, 1, 1]} : vector<18x16x128xbf16> to vector<16x16x128xbf16>
    %61 = tpu.concatenate %58, %59, %60 in 2 : vector<16x16x128xbf16>, vector<16x16x128xbf16>, vector<16x16x128xbf16> -> vector<16x16x384xbf16>
    %62 = vector.shape_cast %61 : vector<16x16x384xbf16> to vector<256x384xbf16>
    %c2 = arith.constant 2 : index
    %c0_41 = arith.constant 0 : index
    %c0_42 = arith.constant 0 : index
    %63 = vector.load %arg7[%c2, %c0_41, %c0_42] : memref<3x384x128xbf16, #tpu.memory_space<vmem>>, vector<1x384x128xbf16>
    %64 = vector.shape_cast %63 : vector<1x384x128xbf16> to vector<384x128xbf16>
    %cst_43 = arith.constant dense<0.000000e+00> : vector<256x128xf32>
    %65 = tpu.matmul %62, %64, %cst_43 {dimension_numbers = #tpu.dot_dimension_numbers<[1], [0], [0], [1], [0, 0, 1, 1], [], []>} : vector<256x384xbf16>, vector<384x128xbf16>, vector<256x128xf32> -> vector<256x128xf32>
    %66 = arith.addf %56, %65 : vector<256x128xf32>
    %c0_44 = arith.constant 0 : index
    %c0_45 = arith.constant 0 : index
    %67 = vector.load %arg8[%c0_44, %c0_45] : memref<1x128xf32, #tpu.memory_space<vmem>>, vector<1x128xf32>
    %68 = vector.broadcast %67 : vector<1x128xf32> to vector<256x128xf32>
    %69 = arith.addf %66, %68 : vector<256x128xf32>
    %cst_46 = arith.constant 0.000000e+00 : f32
    %70 = vector.broadcast %cst_46 : f32 to vector<256x128xf32>
    %71 = arith.maximumf %69, %70 : vector<256x128xf32>
    %72 = arith.truncf %71 : vector<256x128xf32> to vector<256x128xbf16>
    %c0_47 = arith.constant 0 : index
    %c0_48 = arith.constant 0 : index
    %c0_49 = arith.constant 0 : index
    %c0_50 = arith.constant 0 : index
    %73 = vector.load %arg2[%c0_47, %c0_48, %c0_49, %c0_50] : memref<1x16x16x128xf32, #tpu.memory_space<vmem>>, vector<1x16x16x128xf32>
    %74 = vector.shape_cast %73 : vector<1x16x16x128xf32> to vector<16x16x128xf32>
    %75 = vector.shape_cast %74 : vector<16x16x128xf32> to vector<256x128xf32>
    %76 = arith.truncf %75 : vector<256x128xf32> to vector<256x128xbf16>
    %77 = tpu.concatenate %72, %76 in 1 : vector<256x128xbf16>, vector<256x128xbf16> -> vector<256x256xbf16>
    %c0_51 = arith.constant 0 : index
    %c0_52 = arith.constant 0 : index
    %78 = vector.load %arg9[%c0_51, %c0_52] : memref<256x128xbf16, #tpu.memory_space<vmem>>, vector<256x128xbf16>
    %cst_53 = arith.constant dense<0.000000e+00> : vector<256x128xf32>
    %79 = tpu.matmul %77, %78, %cst_53 {dimension_numbers = #tpu.dot_dimension_numbers<[1], [0], [0], [1], [0, 0, 1, 1], [], []>} : vector<256x256xbf16>, vector<256x128xbf16>, vector<256x128xf32> -> vector<256x128xf32>
    %c0_54 = arith.constant 0 : index
    %c0_55 = arith.constant 0 : index
    %80 = vector.load %arg10[%c0_54, %c0_55] : memref<1x128xf32, #tpu.memory_space<vmem>>, vector<1x128xf32>
    %81 = vector.broadcast %80 : vector<1x128xf32> to vector<256x128xf32>
    %82 = arith.addf %79, %81 : vector<256x128xf32>
    %cst_56 = arith.constant 0.000000e+00 : f32
    %83 = vector.broadcast %cst_56 : f32 to vector<256x128xf32>
    %84 = arith.maximumf %82, %83 : vector<256x128xf32>
    %85 = vector.shape_cast %84 : vector<256x128xf32> to vector<1x16x16x128xf32>
    %c0_57 = arith.constant 0 : index
    %c0_58 = arith.constant 0 : index
    %c0_59 = arith.constant 0 : index
    %c0_60 = arith.constant 0 : index
    %86 = vector.load %arg11[%c0_57, %c0_58, %c0_59, %c0_60] : memref<1x16x16x128xf32, #tpu.memory_space<vmem>>, vector<1x16x16x128xf32>
    tpu.vector_store %arg11[%c0_57, %c0_58, %c0_59, %c0_60], %85 {strides = array<i32>} : memref<1x16x16x128xf32, #tpu.memory_space<vmem>>, vector<1x16x16x128xf32>,
    return
  }
  func.func @transform_0(%arg0: i32, %arg1: i32) -> (i32, i32, i32, i32) {
    %c0_i32 = arith.constant 0 : i32
    %c0_i32_0 = arith.constant 0 : i32
    %c0_i32_1 = arith.constant 0 : i32
    return %arg0, %arg1, %c0_i32, %c0_i32_0 : i32, i32, i32, i32
  }
  func.func @transform_1(%arg0: i32, %arg1: i32) -> (i32, i32, i32, i32) {
    %c16_i32 = arith.constant 16 : i32
    %0 = arith.muli %arg1, %c16_i32 : i32
    %c1_i32 = arith.constant 1 : i32
    %1 = arith.subi %0, %c1_i32 : i32
    %c0_i32 = arith.constant 0 : i32
    %2 = arith.maxsi %1, %c0_i32 : i32
    %c0_i32_0 = arith.constant 0 : i32
    %c0_i32_1 = arith.constant 0 : i32
    %c0_i32_2 = arith.constant 0 : i32
    return %arg0, %2, %c0_i32_0, %c0_i32_1 : i32, i32, i32, i32
  }
  func.func @transform_2(%arg0: i32, %arg1: i32) -> (i32, i32, i32, i32) {
    %c1_i32 = arith.constant 1 : i32
    %0 = arith.addi %arg1, %c1_i32 : i32
    %c16_i32 = arith.constant 16 : i32
    %1 = arith.muli %0, %c16_i32 : i32
    %c15_i32 = arith.constant 15 : i32
    %2 = arith.minsi %1, %c15_i32 : i32
    %c0_i32 = arith.constant 0 : i32
    %c0_i32_0 = arith.constant 0 : i32
    %c0_i32_1 = arith.constant 0 : i32
    return %arg0, %2, %c0_i32, %c0_i32_0 : i32, i32, i32, i32
  }
  func.func @transform_3(%arg0: i32, %arg1: i32) -> (i32, i32) {
    %c0_i32 = arith.constant 0 : i32
    %c0_i32_0 = arith.constant 0 : i32
    %c0_i32_1 = arith.constant 0 : i32
    return %c0_i32, %c0_i32_0 : i32, i32
  }
  func.func @transform_4(%arg0: i32, %arg1: i32) -> (i32, i32) {
    %c0_i32 = arith.constant 0 : i32
    %c0_i32_0 = arith.constant 0 : i32
    %c0_i32_1 = arith.constant 0 : i32
    return %c0_i32, %c0_i32_0 : i32, i32
  }
  func.func @transform_5(%arg0: i32, %arg1: i32) -> (i32, i32, i32) {
    %c0_i32 = arith.constant 0 : i32
    %c0_i32_0 = arith.constant 0 : i32
    %c0_i32_1 = arith.constant 0 : i32
    %c0_i32_2 = arith.constant 0 : i32
    return %c0_i32, %c0_i32_0, %c0_i32_1 : i32, i32, i32
  }
  func.func @transform_6(%arg0: i32, %arg1: i32) -> (i32, i32) {
    %c0_i32 = arith.constant 0 : i32
    %c0_i32_0 = arith.constant 0 : i32
    %c0_i32_1 = arith.constant 0 : i32
    return %c0_i32, %c0_i32_0 : i32, i32
  }
  func.func @transform_7(%arg0: i32, %arg1: i32) -> (i32, i32) {
    %c0_i32 = arith.constant 0 : i32
    %c0_i32_0 = arith.constant 0 : i32
    %c0_i32_1 = arith.constant 0 : i32
    return %c0_i32, %c0_i32_0 : i32, i32
  }
  func.func @transform_8(%arg0: i32, %arg1: i32) -> (i32, i32) {
    %c0_i32 = arith.constant 0 : i32
    %c0_i32_0 = arith.constant 0 : i32
    %c0_i32_1 = arith.constant 0 : i32
    return %c0_i32, %c0_i32_0 : i32, i32
  }
  func.func @transform_9(%arg0: i32, %arg1: i32) -> (i32, i32, i32, i32) {
    %c0_i32 = arith.constant 0 : i32
    %c0_i32_0 = arith.constant 0 : i32
    %c0_i32_1 = arith.constant 0 : i32
    return %arg0, %arg1, %c0_i32, %c0_i32_0 : i32, i32, i32, i32
  }
}

</mosaic_0001>

<bundles_post_ra>
// kernel: tpu_custom_call.1
= control target key start
LH: loop header
LB: loop body
LE: loop exit
PB: predicated region body
PF: predicated region fallthrough
CT: control target
= control target key end

     0   :  { %s7464_s0 = inlined_call_operand.hbm [shape: f32[2,16,16,128], index: 0, kind: input, shape index: {}]   ;;  %s7465_s1 = inlined_call_operand.hbm [shape: f32[2,16,16,128], index: 1, kind: input, shape index: {}]   ;;  %s7466_s2 = inlined_call_operand.hbm [shape: f32[2,16,16,128], index: 2, kind: input, shape index: {}]   ;;  %s7467_s3 = inlined_call_operand.hbm [shape: bf16[128,128], index: 3, kind: input, shape index: {}]   ;;  %s7468_s4 = inlined_call_operand.vmem [shape: f32[1,128], index: 4, kind: input, shape index: {}]   ;;  %s7469_s5 = inlined_call_operand.hbm [shape: bf16[3,384,128], index: 5, kind: input, shape index: {}]   ;;  %s7470_s6 = inlined_call_operand.vmem [shape: f32[1,128], index: 6, kind: input, shape index: {}]   ;;  %s7471_s7 = inlined_call_operand.hbm [shape: bf16[256,128], index: 7, kind: input, shape index: {}]   ;;  %s7472_s8 = inlined_call_operand.vmem [shape: f32[1,128], index: 8, kind: input, shape index: {}]   ;;  %s7473_s9 = inlined_call_operand.hbm [shape: f32[2,16,16,128], index: 9, kind: output, shape index: {}]  }
   0x1   :  { %7492 = sst [smem:[#allocation34_spill]] %s7465_s1 }
   0x2   :  { %7493 = sst [smem:[#allocation35_spill]] %s7467_s3 }
   0x3   :  { %7494 = sst [smem:[#allocation36_spill]] %s7469_s5 }
   0x4   :  { %7495 = sst [smem:[#allocation37_spill]] %s7473_s9 }
   0x5   :  { %14 = vsyncpa [#allocation4], 0 }
   0x6   :  { %16 = vsyncpa [#allocation4 + $0x1], 0 }
   0x7   :  { %17 = vsyncpa [#allocation7], 0 }
   0x8   :  { %19 = vsyncpa [#allocation7 + $0x1], 0 }
   0x9   :  { %20 = vsyncpa [#allocation10], 0 }
   0xa   :  { %21 = vsyncpa [#allocation13], 0 }
   0xb   :  { %22 = vsyncpa [#allocation5], 0 }
   0xc   :  { %24 = vsyncpa [#allocation5 + $0x1], 0  ;;  %s6049_s30 = smov 0   ;;  %s6051_s10 = smov 0  }
   0xd   :  { %s6053_s11 = smov 0   ;;  %s6055_s12 = smov 0  }
   0xe   :  { %s6057_s13 = smov 0   ;;  %s6059_s14 = smov 0  }
   0xf LB: > { %7496 = sst [smem:[#allocation20_spill]] %s5962_s30  ;;  %s6080_s15 = sadd.s32 4294967295, %s5982_s14   ;;  %s5982_s14 = sphi %s6059_s14, %s30_s14   ;;  %s5978_s13 = sphi %s6057_s13, %s7577_s13   ;;  %s5974_s12 = sphi %s6055_s12, %s7573_s12   ;;  %s5970_s11 = sphi %s6053_s11, %s7572_s11   ;;  %s5966_s10 = sphi %s6051_s10, %s7576_s10   ;;  %s5962_s30 = sphi %s6049_s30, %s7575_s30  }
  0x10   : > { %7497 = sst [smem:[#allocation21_spill]] %s5970_s11  ;;  %s4382_s16 = sadd.s32 4294967294, %s5982_s14  }
  0x11   : > { %7498 = sst [smem:[#allocation22_spill]] %s5974_s12  ;;  %p58_p0 = scmp.ne.s32.totalorder %s5970_s11, %s5966_s10 }
  0x12   : > { %7499 = sst [smem:[#allocation23_spill]] %s5978_s13  ;;  %p59_p1 = scmp.eq.s32.totalorder %s5982_s14, 0 }
  0x13   : > { %p64_p2 = scmp.ne.s32.totalorder %s5966_s10, %s5962_s30  ;;  %p7474_p3 = scmp.eq.s32.totalorder %s6080_s15, 0 }
  0x14   : > { %p6089_p4 = por %p59_p1, %p58_p0  ;;  %p288_p5 = scmp.eq.s32.totalorder %s6080_s15, 1 }
  0x15   : > { %p6096_p6 = por %p7474_p3, %p64_p2  ;;  %p294_p7 = scmp.eq.s32.totalorder %s4382_s16, 1 }
  0x16   : > { %p6100_p8 = por %p288_p5, %p58_p0  ;;  %p4383_p9 = scmp.ge.s32.totalorder %s5982_s14, 1 }
  0x17   : > { %p6105_p10 = por %p294_p7, %p64_p2  ;;  %p301_p11 = scmp.lt.s32.totalorder %s5982_s14, 3 }
  0x18   : > { %s7502_s19 = scalar_select %p6100_p8, 1, 0 }
  0x19   : > { %s7504_s20 = scalar_select %p6105_p10, 1, 0 }
  0x1a   : > { %7503 = sst [smem:[#allocation24_spill]] %s7502_s19  ;;  %p6110_p12 = pnand %p4383_p9, %p301_p11 }
  0x1b   : > { %7505 = sst [smem:[#allocation25_spill]] %s7504_s20  ;;  %s5984_s22 = smov [#allocation9]  }
  0x1c   : > { %s313_s23 = sshll.u32 %s5984_s22, 4  ;;  %p5451_p13 = pneg %p6110_p12  ;;  %s314_s23 = int_to_ptr.vmem [resolvable:$true] %s313_s23 }
  0x1d   : > { %s42_s25 = sadd.s32 1, %s5978_s13  ;;  %s51_s26 = sadd.s32 1, %s5970_s11 }
  0x1e   : > { %p6119_p1 = pnand %p5451_p13, %p7474_p3  ;;  %p6125_p2 = scmp.ge.s32.totalorder %s42_s25, 2 }
  0x1f   : > { %s5739_s28 = scalar_lea.vmem %s314_s23, 1024  ;;  %p5747_p13 = scmp.lt.s32.totalorder %s314_s23, %s314_s23 }
  0x20   : > { %p5730_p5 = pneg %p6119_p1  ;;  %p5740_p7 = scmp.ne.s32.totalorder %s314_s23, %s5739_s28 }
  0x21   : > { %p5748_p0 = scmp.lt.s32.totalorder %s5739_s28, %s5739_s28 }
  0x22   : > { %p5742_p9 = pnand %p5740_p7, %p5730_p5 }
  0x23   : > { %p5749_p3 = por %p5748_p0, %p5747_p13 }
  0x24   : > { %p5743_p11 = pneg %p5742_p9 }
  0x26   : > { %p5750_p10 = pnand %p5749_p3, %p5743_p11 }
  0x28   : > { %5753 = shalt.err (!%p5750_p10)
}
  0x29   : > { %s7480_s29 = smov 64   ;;  %s7482_s16 = smov 4  }
  0x2a   : > { %s7509_s3 = sld [smem:[#allocation35_spill]]  ;;  %s7579_s25 = smov (%p6125_p2, %s42_s25), 0 }
  0x2b   : > { %7510 = sst [smem:[#allocation26_spill]] %s7579_s25  ;;  %p5478_p3 = scmp.lt.s32.totalorder %s5982_s14, 2 }
  0x2c   : > { %s6148_s20 = sand.u32 1, %s5970_s11   ;;  %s46_s30 = ssub.s32 %s5978_s13, %s7579_s25 }
  0x2d   : > { %s6153_s9 = sshll.u32 %s5978_s13, 12  ;;  %p49_p10 = scmp.eq.s32.totalorder %s46_s30, 0 }
  0x2e   : > { %p6157_p0 = pnand %p5478_p3, %p6089_p4  ;;  %s386_s27 = sand.u32 1, %s5982_s14  }
  0x2f   : > { %s4391_s22 = sshll.u32 %s6148_s20, 4  ;;  %s7513_s1 = sld [smem:[#allocation34_spill]] }
  0x30   : > { %5454 = dma.hbm_to_vmem [thread:$0]  (!%p6119_p1), %s7509_s3, 1024, %s314_s23, [#allocation10], %s7480_s29, %s7480_s29, %s7482_s16  }
  0x31   : > { %s6162_s23 = scalar_select %p49_p10, %s5970_s11, %s51_s26  }
  0x32   : > { %s390_s3 = scalar_lea.vmem [#allocation6], %s4391_s22  ;;  %s417_s13 = scalar_lea.vmem [#allocation8], %s4391_s22 }
  0x33   : > { %7512 = sst [smem:[#allocation27_spill]] %s6162_s23  ;;  %s403_s25 = sshll.u32 %s390_s3, 4  ;;  %s404_s25 = int_to_ptr.vmem [resolvable:$true] %s403_s25 }
  0x34   : > { %s430_s30 = sshll.u32 %s417_s13, 4  ;;  %s6170_s17 = scalar_lea.sflag [#allocation7], %s386_s27  ;;  %s6183_s30 = int_to_ptr.vmem [resolvable:$true] %s430_s30 }
  0x35   : > { %s402_s16 = scalar_lea.hbm %s7513_s1, %s6153_s9  ;;  %p7486_p4 = pneg %p6157_p0 }
  0x36   : > { %s5767_s12 = scalar_lea.vmem %s404_s25, 256  ;;  %s5987_s26 = smov [#allocation6]  }
  0x37   : > { %p5768_p2 = scmp.ne.s32.totalorder %s404_s25, %s5767_s12  ;;  %s5772_s23 = sshll.u32 %s5987_s26, 4  ;;  %s5773_s23 = int_to_ptr.vmem [resolvable:$false] %s5772_s23 }
  0x38   : > { %s5774_s29 = scalar_lea.vmem %s5773_s23, 512  ;;  %p5775_p11 = scmp.lt.s32.totalorder %s404_s25, %s5773_s23 }
  0x39   : > { %p5770_p7 = pnand %p5768_p2, %p7486_p4  ;;  %p5776_p13 = scmp.lt.s32.totalorder %s5774_s29, %s5767_s12 }
  0x3b   : > { %p5771_p9 = pneg %p5770_p7  ;;  %p5777_p3 = por %p5776_p13, %p5775_p11 }
  0x3d   : > { %p5778_p10 = pnand %p5777_p3, %p5771_p9 }
  0x3f   : > { %5781 = shalt.err (!%p5778_p10)
}
  0x40   : > { %s7487_s3 = smov 128   ;;  %s7489_s13 = smov 8  }
  0x41   : > { %5467 = dma.hbm_to_vmem [thread:$0]  (!%p6157_p0), %s402_s16, 256, %s404_s25, %s6170_s17, %s7487_s3, %s7487_s3, %s7489_s13  }
  0x42   : > { %s5990_s27 = smov [#allocation11]   ;;  %s5991_s23 = smov [#allocation12]  }
  0x43   : > { %s329_s22 = sshll.u32 %s5990_s27, 4  ;;  %s345_s12 = sshll.u32 %s5991_s23, 4  ;;  %s330_s22 = int_to_ptr.vmem [resolvable:$true] %s329_s22  ;;  %s346_s12 = int_to_ptr.vmem [resolvable:$true] %s345_s12 }
  0x44   : > { %s5793_s28 = scalar_lea.vmem %s330_s22, 9216  ;;  %p5801_p11 = scmp.lt.s32.totalorder %s330_s22, %s330_s22 }
  0x45   : > { %p5794_p2 = scmp.ne.s32.totalorder %s330_s22, %s5793_s28  ;;  %p5802_p13 = scmp.lt.s32.totalorder %s5793_s28, %s5793_s28 }
  0x47   : > { %p5796_p7 = pnand %p5794_p2, %p5730_p5  ;;  %p5803_p3 = por %p5802_p13, %p5801_p11 }
  0x49   : > { %p5797_p9 = pneg %p5796_p7 }
  0x4b   : > { %p5804_p10 = pnand %p5803_p3, %p5797_p9 }
  0x4d   : > { %5807 = shalt.err (!%p5804_p10)
}
  0x4e   : > { %s7514_s25 = smov 4   ;;  %s7515_s16 = smov 64  }
  0x4f   : > { %s7516_s5 = sld [smem:[#allocation36_spill]]  ;;  %s5819_s27 = scalar_lea.vmem %s346_s12, 2048 }
  0x50   : > { %p5820_p4 = scmp.ne.s32.totalorder %s346_s12, %s5819_s27  ;;  %p5827_p11 = scmp.lt.s32.totalorder %s346_s12, %s346_s12 }
  0x51   : > { %p5828_p9 = scmp.lt.s32.totalorder %s5819_s27, %s5819_s27 }
  0x52   : > { %p5822_p2 = pnand %p5820_p4, %p5730_p5 }
  0x53   : > { %p5829_p13 = por %p5828_p9, %p5827_p11 }
  0x54   : > { %p5823_p7 = pneg %p5822_p2 }
  0x55   : > { %5457 = dma.hbm_to_vmem [thread:$0]  (!%p6119_p1), %s7516_s5, 9216, %s330_s22, [#allocation10], %s7515_s16, %s7515_s16, %s7514_s25  }
  0x56   : > { %p5830_p3 = pnand %p5829_p13, %p5823_p7 }
  0x58   : > { %5833 = shalt.err (!%p5830_p3)
}
  0x59   : > { %5460 = dma.hbm_to_vmem [thread:$0]  (!%p6119_p1), %s7471_s7, 2048, %s346_s12, [#allocation13], %s7515_s16, %s7515_s16, %s7514_s25  }
  0x5a   : > { %s4388_s22 = sshll.u32 %s6148_s20, 8  ;;  %s375_s27 = scalar_lea.hbm %s7464_s0, %s6153_s9 }
  0x5b   : > { %s4638_s3 = sadd.s32 3840, %s6153_s9  ;;  %s366_s13 = scalar_lea.vmem [#allocation3], %s4388_s22 }
  0x5c   : > { %s376_s24 = sshll.u32 %s366_s13, 4  ;;  %s6216_s11 = scalar_lea.hbm %s7466_s2, %s4638_s3  ;;  %s377_s24 = int_to_ptr.vmem [resolvable:$true] %s376_s24 }
  0x5d   : > { %s363_s23 = scalar_lea.sflag [#allocation4], %s6148_s20  ;;  %s5847_s28 = scalar_lea.vmem %s377_s24, 4096 }
  0x5e   : > { %p5848_p5 = scmp.ne.s32.totalorder %s377_s24, %s5847_s28  ;;  %p7517_p4 = pneg %p6157_p0 }
  0x5f   : > { %s5992_s12 = smov [#allocation3]  }
  0x60   : > { %p5850_p1 = pnand %p5848_p5, %p7517_p4  ;;  %s5852_s25 = sshll.u32 %s5992_s12, 4  ;;  %s5853_s25 = int_to_ptr.vmem [resolvable:$false] %s5852_s25 }
  0x61   : > { %s5854_s16 = scalar_lea.vmem %s5853_s25, 8192  ;;  %p5855_p2 = scmp.lt.s32.totalorder %s377_s24, %s5853_s25 }
  0x62   : > { %p5851_p10 = pneg %p5850_p1  ;;  %p5856_p7 = scmp.lt.s32.totalorder %s5854_s16, %s5847_s28 }
  0x64   : > { %p5857_p11 = por %p5856_p7, %p5855_p2 }
  0x66   : > { %p5858_p9 = pnand %p5857_p11, %p5851_p10 }
  0x68   : > { %5861 = shalt.err (!%p5858_p9)
}
  0x69   : > { %s7518_s1 = smov 8   ;;  %s7519_s5 = smov 128  }
  0x6a   : > { %5464 = dma.hbm_to_vmem [thread:$0]  (!%p6157_p0), %s375_s27, 4096, %s377_s24, %s363_s23, %s7519_s5, %s7519_s5, %s7518_s1  }
  0x6b   : > { %s5875_s9 = scalar_lea.vmem %s6183_s30, 256  ;;  %p7520_p3 = pmov %p7517_p4 }
  0x6c   : > { %p5876_p13 = scmp.ne.s32.totalorder %s6183_s30, %s5875_s9  ;;  %s5993_s20 = smov [#allocation8]  }
  0x6d   : > { %s5880_s3 = sshll.u32 %s5993_s20, 4  ;;  %s5881_s3 = int_to_ptr.vmem [resolvable:$false] %s5880_s3 }
  0x6e   : > { %p5878_p5 = pnand %p5876_p13, %p7520_p3  ;;  %s5882_s13 = scalar_lea.vmem %s5881_s3, 512 }
  0x6f   : > { %p5883_p1 = scmp.lt.s32.totalorder %s6183_s30, %s5881_s3  ;;  %p5884_p10 = scmp.lt.s32.totalorder %s5882_s13, %s5875_s9 }
  0x70   : > { %p5879_p4 = pneg %p5878_p5 }
  0x71   : > { %p5885_p2 = por %p5884_p10, %p5883_p1 }
  0x73   : > { %p5886_p7 = pnand %p5885_p2, %p5879_p4 }
  0x75   : > { %5889 = shalt.err (!%p5886_p7)
}
  0x76   : > { %5470 = dma.hbm_to_vmem [thread:$0]  (!%p6157_p0), %s6216_s11, 256, %s6183_s30, %s6170_s17, %s7519_s5, %s7519_s5, %s7518_s1  }
  0x77   : > { %442 = sbr.rel (%p6110_p12) target bundleno = 1167 (0x48f), region = 56 }
  0x7c   : > { %s6244_s22 = sand.u32 1, %s5966_s10  }
  0x7d   : > { %s4398_s26 = sshll.u32 %s6244_s22, 8  ;;  %s445_s29 = scalar_lea.sflag [#allocation4], %s6244_s22 }
  0x7e   : > { %s6250_s19 = scalar_lea.vmem [#allocation3], %s4398_s26 }
  0x7f   : > { %5941 = dma.done.wait (%p6096_p6), %s445_s29, 4096  }
  0x80   : > { %5943 = vsyncadd (%p6096_p6), %s445_s29, 4294963200  ;;  %s453_s11 = sand.u32 1, %s6080_s15   ;;  %s4399_s21 = sshll.u32 %s6244_s22, 4 }
  0x81   : > { %s454_s30 = scalar_lea.sflag [#allocation7], %s453_s11  ;;  %s457_s17 = scalar_lea.vmem [#allocation6], %s4399_s21 }
  0x82   : > { %5945 = dma.done.wait (%p6096_p6), %s454_s30, 512  }
  0x83   : > { %5947 = vsyncadd (%p6096_p6), %s454_s30, 4294966784  ;;  %s6262_s27 = scalar_lea.vmem [#allocation8], %s4399_s21  ;;  %p7521_p12 = scmp.eq.s32.totalorder %s6080_s15, 0 }
  0x85   : > { %5949 = dma.done.wait (%p7521_p12), [#allocation10], 10240   ;;  %p7522_p0 = pmov %p7521_p12 }
  0x87   : > { %5951 = vsyncadd (%p7522_p0), [#allocation10], 4294957056  ;;  %p7523_p11 = pmov %p7522_p0 }
  0x88   : > { %p7524_p9 = pmov %p7522_p0 }
  0x89   : > { %5953 = dma.done.wait (%p7523_p11), [#allocation13], 2048  }
  0x8a   : > { %5955 = vsyncadd (%p7524_p9), [#allocation13], 4294965248  ;;  %v5542_v0 = vld [vmem:[#allocation9 + $0x38] sm:$0xff]   ;;  %v5543_v1 = vld [vmem:[#allocation9 + $0x30] sm:$0xff]   ;;  %vm1334_vm0 = vsmask.f32 4352 }
  0x8b   : > { %5219 = vmatprep.subr.bf16.mxu0 %v5542_v0  ;;  %v5544_v2 = vld [vmem:[#allocation9 + $0x28] sm:$0xff]   ;;  %v5545_v3 = vld [vmem:[#allocation9 + $0x20] sm:$0xff]   ;;  %v5546_v7 = vld [vmem:[#allocation9 + $0x18] sm:$0xff]   ;;  %vm2922_vm1 = vsmask.f32 7424  ;;  %s7344_s25 = scalar_lea.vmem [#allocation14], %s4398_s26 }
  0x8c   : > { %5220 = vmatpush3.bf16.msra.mxu0 %v5542_v0  ;;  %v534_v4 = vld [vmem:[%s457_s17] sm:$0xff]  ;;  %v535_v5 = vld [vmem:[%s457_s17 + $0x8] sm:$0xff]  ;;  %s7563_s16 = sld [smem:[#allocation22_spill]]  ;;  %s4216_s9 = sshll.u32 %s7344_s25, 4  ;;  %s7415_s9 = int_to_ptr.vmem [resolvable:$true] %s4216_s9 }
  0x8d   : > { %5221 = vmatprep.subr.bf16.mxu0 %v5543_v1  ;;  %v570_v6 = vpack.c.bf16 %v535_v5, %v534_v4  ;;  %v5547_v8 = vld [vmem:[#allocation9 + $0x10] sm:$0xff]   ;;  %v5548_v9 = vld [vmem:[#allocation9 + $0x8] sm:$0xff]   ;;  %v5550_v10 = vld [vmem:[#allocation11 + $0x138] sm:$0xff]   ;;  %s7565_s13 = sld [smem:[#allocation37_spill]]  ;;  %s5890_s11 = scalar_lea.vmem %s7415_s9, 4096 }
  0x8e   : > { %v5551_v11 = vld [vmem:[#allocation11 + $0xf8] sm:$0xff]   ;;  %v5549_v12 = vld [vmem:[#allocation9] sm:$0xff]   ;;  %v5552_v13 = vld [vmem:[#allocation11 + $0x130] sm:$0xff]   ;;  %5415 = vmatprep.subr.bf16.mxu1 %v5550_v10  ;;  %p5891_p6 = scmp.ne.s32.totalorder %s7415_s9, %s5890_s11  ;;  %s5996_s21 = smov [#allocation14]  }
  0x8f   : > { %5235 = vmatprep.mubr.bf16.mxu0 %v570_v6  ;;  %v5553_v14 = vld [vmem:[#allocation11 + $0xf0] sm:$0xff]   ;;  %5423 = vmatpush3.bf16.msra.mxu1 %v5551_v11  ;;  %v536_v15 = vld [vmem:[%s6250_s19] sm:$0xff]  ;;  %v537_v16 = vld [vmem:[%s6250_s19 + $0x8] sm:$0xff]  ;;  %s5894_s30 = sshll.u32 %s5996_s21, 4  ;;  %s5895_s30 = int_to_ptr.vmem [resolvable:$false] %s5894_s30 }
  0x90   : > { %5222 = vmatpush3.bf16.msra.mxu0 %v5543_v1  ;;  %5416 = vmatprep.subr.bf16.mxu1 %v5552_v13  ;;  %v538_v17 = vld [vmem:[%s6250_s19 + $0x10] sm:$0xff]  ;;  %v539_v18 = vld [vmem:[%s6250_s19 + $0x18] sm:$0xff]  ;;  %v571_v19 = vpack.c.bf16 %v537_v16, %v536_v15  ;;  %v540_v21 = vld [vmem:[%s6250_s19 + $0x20] sm:$0xff]  ;;  %p5892_p13 = pnand %p5891_p6, %p6100_p8  ;;  %s5896_s17 = scalar_lea.vmem %s5895_s30, 8192 }
  0x91   : > { %5223 = vmatprep.subr.bf16.mxu0 %v5544_v2  ;;  %v572_v20 = vpack.c.bf16 %v539_v18, %v538_v17  ;;  %v541_v22 = vld [vmem:[%s6250_s19 + $0x28] sm:$0xff]  ;;  %v542_v23 = vld [vmem:[%s6250_s19 + $0x30] sm:$0xff]  ;;  %v543_v24 = vld [vmem:[%s6250_s19 + $0x38] sm:$0xff]  ;;  %p5897_p5 = scmp.lt.s32.totalorder %s7415_s9, %s5895_s30  ;;  %p5898_p4 = scmp.lt.s32.totalorder %s5896_s17, %s5890_s11 }
  0x92   : > { %v573_v25 = vpack.c.bf16 %v541_v22, %v540_v21  ;;  %v574_v26 = vpack.c.bf16 %v543_v24, %v542_v23  ;;  %v544_v27 = vld [vmem:[%s6250_s19 + $0x40] sm:$0xff]  ;;  %v545_v28 = vld [vmem:[%s6250_s19 + $0x48] sm:$0xff]  ;;  %v546_v29 = vld [vmem:[%s6250_s19 + $0x50] sm:$0xff]  ;;  %s4671_s5 = sshll.u32 %s7563_s16, 12  ;;  %p5893_p3 = pneg %p5892_p13 }
  0x93   : > { %5424 = vmatpush3.bf16.msra.mxu1 %v5553_v14  ;;  %v547_v30 = vld [vmem:[%s6250_s19 + $0x58] sm:$0xff]  ;;  %v575_v31 = vpack.c.bf16 %v545_v28, %v544_v27  ;;  %v548_v33 = vld [vmem:[%s6250_s19 + $0x60] sm:$0xff]  ;;  %v549_v34 = vld [vmem:[%s6250_s19 + $0x68] sm:$0xff]  ;;  %s7566_s26 = smov %s7565_s13  ;;  %s7413_s29 = scalar_lea.hbm %s7565_s13, %s4671_s5 }
  0x94   : > { %5224 = vmatpush3.bf16.msra.mxu0 %v5544_v2  ;;  %v576_v32 = vpack.c.bf16 %v547_v30, %v546_v29  ;;  %v550_v35 = vld [vmem:[%s6250_s19 + $0x70] sm:$0xff]  ;;  %v551_v36 = vld [vmem:[%s6250_s19 + $0x78] sm:$0xff]  ;;  %v577_v37 = vpack.c.bf16 %v549_v34, %v548_v33  ;;  %v552_v39 = vld [vmem:[%s6250_s19 + $0x80] sm:$0xff]  ;;  %p5899_p1 = por %p5898_p4, %p5897_p5 }
  0x95   : > { %5225 = vmatprep.subr.bf16.mxu0 %v5545_v3  ;;  %v578_v38 = vpack.c.bf16 %v551_v36, %v550_v35  ;;  %v553_v40 = vld [vmem:[%s6250_s19 + $0x88] sm:$0xff]  ;;  %v554_v41 = vld [vmem:[%s6250_s19 + $0x90] sm:$0xff]  ;;  %v555_v42 = vld [vmem:[%s6250_s19 + $0x98] sm:$0xff] }
  0x96   : > { %v579_v43 = vpack.c.bf16 %v553_v40, %v552_v39  ;;  %v580_v44 = vpack.c.bf16 %v555_v42, %v554_v41  ;;  %v556_v45 = vld [vmem:[%s6250_s19 + $0xa0] sm:$0xff]  ;;  %v557_v46 = vld [vmem:[%s6250_s19 + $0xa8] sm:$0xff]  ;;  %v558_v47 = vld [vmem:[%s6250_s19 + $0xb0] sm:$0xff]  ;;  %p5900_p10 = pnand %p5899_p1, %p5893_p3 }
  0x97   : > { %v559_v48 = vld [vmem:[%s6250_s19 + $0xb8] sm:$0xff]  ;;  %v581_v49 = vpack.c.bf16 %v557_v46, %v556_v45  ;;  %v560_v51 = vld [vmem:[%s6250_s19 + $0xc0] sm:$0xff]  ;;  %v561_v52 = vld [vmem:[%s6250_s19 + $0xc8] sm:$0xff] }
  0x98   : > { %5226 = vmatpush3.bf16.msra.mxu0 %v5545_v3  ;;  %v582_v50 = vpack.c.bf16 %v559_v48, %v558_v47  ;;  %v562_v53 = vld [vmem:[%s6250_s19 + $0xd0] sm:$0xff]  ;;  %v563_v54 = vld [vmem:[%s6250_s19 + $0xd8] sm:$0xff]  ;;  %v583_v55 = vpack.c.bf16 %v561_v52, %v560_v51  ;;  %v564_v57 = vld [vmem:[%s6250_s19 + $0xe0] sm:$0xff] }
  0x99   : > { %5227 = vmatprep.subr.bf16.mxu0 %v5546_v7  ;;  %v584_v56 = vpack.c.bf16 %v563_v54, %v562_v53  ;;  %v565_v58 = vld [vmem:[%s6250_s19 + $0xe8] sm:$0xff]  ;;  %v566_v59 = vld [vmem:[%s6250_s19 + $0xf0] sm:$0xff]  ;;  %v567_v60 = vld [vmem:[%s6250_s19 + $0xf8] sm:$0xff] }
  0x9a   : > { %v585_v61 = vpack.c.bf16 %v565_v58, %v564_v57  ;;  %v586_v62 = vpack.c.bf16 %v567_v60, %v566_v59  ;;  %v568_v63 = vld [vmem:[%s6262_s27] sm:$0xff]  ;;  %v569_v0 = vld [vmem:[%s6262_s27 + $0x8] sm:$0xff] }
  0x9b   : > { %v587_v1 = vpack.c.bf16 %v569_v0, %v568_v63  ;;  %v5554_v2 = vld [vmem:[#allocation11 + $0x128] sm:$0xff]   ;;  %v5556_v4 = vld [vmem:[#allocation11 + $0x120] sm:$0xff]   ;;  %v5558_v6 = vld [vmem:[#allocation11 + $0x118] sm:$0xff]  }
  0x9c   : > { %5228 = vmatpush3.bf16.msra.mxu0 %v5546_v7  ;;  %v5555_v3 = vld [vmem:[#allocation11 + $0xe8] sm:$0xff]   ;;  %5417 = vmatprep.subr.bf16.mxu1 %v5554_v2  ;;  %v5557_v5 = vld [vmem:[#allocation11 + $0xe0] sm:$0xff]   ;;  %v5559_v7 = vld [vmem:[#allocation11 + $0xd8] sm:$0xff]  }
  0x9d   : > { %5229 = vmatprep.subr.bf16.mxu0 %v5547_v8  ;;  %5425 = vmatpush3.bf16.msra.mxu1 %v5555_v3  ;;  %v5563_v15 = vld [vmem:[#allocation11 + $0xc8] sm:$0xff]   ;;  %v5564_v16 = vld [vmem:[#allocation11 + $0x100] sm:$0xff]   ;;  %v6306_v18 = vld [vmem:[#allocation11 + $0x178] sm:$0xff]  }
  0x9e   : > { %5418 = vmatprep.subr.bf16.mxu1 %v5556_v4  ;;  %v5565_v17 = vld [vmem:[#allocation11 + $0xc0] sm:$0xff]  }
  0x9f   : > { %v6319_v33 = vld [vmem:[%s7468_s4] ss:$0 sm:$0xff] }
  0xa0   : > { %5230 = vmatpush3.bf16.msra.mxu0 %v5547_v8  ;;  %v5994_v8 = vmov 0  }
  0xa1   : > { %5231 = vmatprep.subr.bf16.mxu0 %v5548_v9  ;;  %5426 = vmatpush3.bf16.msra.mxu1 %v5557_v5  ;;  %921 = vst [vmem:[#allocation2 + $0x10] sm:$0xf] %v5994_v8  ;;  %920 = vst [vmem:[#allocation2] sm:$0xf] %v5994_v8 }
  0xa2   : > { %922 = vst [vmem:[#allocation2 + $0x20] sm:$0xf] %v5994_v8  ;;  %923 = vst [vmem:[#allocation2 + $0x30] sm:$0xf] %v5994_v8  ;;  %5419 = vmatprep.subr.bf16.mxu1 %v5558_v6 }
  0xa3   : > { %924 = vst [vmem:[#allocation2 + $0x40] sm:$0xf] %v5994_v8  ;;  %925 = vst [vmem:[#allocation2 + $0x50] sm:$0xf] %v5994_v8 }
  0xa4   : > { %5232 = vmatpush3.bf16.msra.mxu0 %v5548_v9  ;;  %926 = vst [vmem:[#allocation2 + $0x60] sm:$0xf] %v5994_v8  ;;  %927 = vst [vmem:[#allocation2 + $0x70] sm:$0xf] %v5994_v8  ;;  %v5560_v9 = vld [vmem:[#allocation11 + $0x110] sm:$0xff]  }
  0xa5   : > { %5233 = vmatprep.subr.bf16.mxu0 %v5549_v12  ;;  %928 = vst [vmem:[#allocation2 + $0x80] sm:$0xf] %v5994_v8  ;;  %929 = vst [vmem:[#allocation2 + $0x90] sm:$0xf] %v5994_v8  ;;  %5427 = vmatpush3.bf16.msra.mxu1 %v5559_v7 }
  0xa6   : > { %930 = vst [vmem:[#allocation2 + $0xa0] sm:$0xf] %v5994_v8  ;;  %931 = vst [vmem:[#allocation2 + $0xb0] sm:$0xf] %v5994_v8  ;;  %5420 = vmatprep.subr.bf16.mxu1 %v5560_v9 }
  0xa7   : > { %932 = vst [vmem:[#allocation2 + $0xc0] sm:$0xf] %v5994_v8  ;;  %933 = vst [vmem:[#allocation2 + $0xd0] sm:$0xf] %v5994_v8 }
  0xa8   : > { %5234 = vmatpush3.bf16.msra.mxu0 %v5549_v12  ;;  %934 = vst [vmem:[#allocation2 + $0xe0] sm:$0xf] %v5994_v8  ;;  %935 = vst [vmem:[#allocation2 + $0xf0] sm:$0xf] %v5994_v8  ;;  %v1139_v53 = vld [vmem:[#allocation2 + $0x10] sm:$0x8] }
  0xa9   : > { %4699 = vmatprep.subr.bf16.mxu0 %v5550_v10  ;;  %936 = vst [vmem:[#allocation2 + $0x100] sm:$0xf] %v5994_v8  ;;  %937 = vst [vmem:[#allocation2 + $0x110] sm:$0xf] %v5994_v8  ;;  %v5561_v10 = vld [vmem:[#allocation11 + $0xd0] sm:$0xff]  }
  0xaa   : > { %938 = vst [vmem:[#allocation2 + $0xc] sm:$0xf] %v5994_v8  ;;  %939 = vst [vmem:[#allocation2 + $0x1c] sm:$0xf] %v5994_v8  ;;  %5428 = vmatpush3.bf16.msra.mxu1 %v5561_v10 }
  0xab   : > { %5236 = vmatmul.mubr.bf16.vlgmr.msra.gmra.mxu0 %v571_v19  ;;  %940 = vst [vmem:[#allocation2 + $0x2c] sm:$0xf] %v5994_v8  ;;  %941 = vst [vmem:[#allocation2 + $0x3c] sm:$0xf] %v5994_v8  ;;  %v5589_v19 = vld [vmem:[#allocation11 + $0x78] sm:$0xff]  }
  0xac   : > { %5239 = vmatprep.mubr.bf16.mxu0 %v572_v20  ;;  %4700 = vmatpush3.bf16.msra.mxu0 %v5551_v11  ;;  %942 = vst [vmem:[#allocation2 + $0x4c] sm:$0xf] %v5994_v8  ;;  %943 = vst [vmem:[#allocation2 + $0x5c] sm:$0xf] %v5994_v8  ;;  %v5995_v11 = vmov 0.0|0.0  }
  0xad   : > { %4701 = vmatprep.subr.bf16.mxu0 %v5552_v13  ;;  %944 = vst [vmem:[#allocation2 + $0x6c] sm:$0xf] %v5994_v8  ;;  %945 = vst [vmem:[#allocation2 + $0x7c] sm:$0xf] %v5994_v8  ;;  %v4414_v12 = vcombine.low %v5995_v11, %v5995_v11  ;;  %v4415_v13 = vcombine.high %v5995_v11, %v5995_v11  ;;  %v1136_v20 = vld [vmem:[#allocation2] sm:$0x8] }
  0xae   : > { %946 = vst [vmem:[#allocation2 + $0x8c] sm:$0xf] %v5994_v8  ;;  %947 = vst [vmem:[#allocation2 + $0x9c] sm:$0xf] %v5994_v8 }
  0xaf   : > { %948 = vst [vmem:[#allocation2 + $0xac] sm:$0xf] %v5994_v8  ;;  %949 = vst [vmem:[#allocation2 + $0xbc] sm:$0xf] %v5994_v8 }
  0xb0   : > { %4702 = vmatpush3.bf16.msra.mxu0 %v5553_v14  ;;  %950 = vst [vmem:[#allocation2 + $0xcc] sm:$0xf] %v5994_v8  ;;  %951 = vst [vmem:[#allocation2 + $0xdc] sm:$0xf] %v5994_v8  ;;  %v5562_v14 = vld [vmem:[#allocation11 + $0x108] sm:$0xff]  }
  0xb1   : > { %4703 = vmatprep.subr.bf16.mxu0 %v5554_v2  ;;  %952 = vst [vmem:[#allocation2 + $0xec] sm:$0xf] %v5994_v8  ;;  %953 = vst [vmem:[#allocation2 + $0xfc] sm:$0xf] %v5994_v8  ;;  %5421 = vmatprep.subr.bf16.mxu1 %v5562_v14 }
  0xb2   : > { %954 = vst [vmem:[#allocation2 + $0x10c] sm:$0xf] %v5994_v8  ;;  %955 = vst [vmem:[#allocation2 + $0x11c] sm:$0xf] %v5994_v8  ;;  %5429 = vmatpush3.bf16.msra.mxu1 %v5563_v15 }
  0xb3   : > { %5240 = vmatmul.mubr.bf16.gmra.mxu0 %v573_v25  ;;  %1100 = vst [vmem:[#allocation2 + $0x4] sm:$0xf] %v4414_v12  ;;  %1101 = vst [vmem:[#allocation2 + $0x8] sm:$0xf] %v4415_v13  ;;  %5422 = vmatprep.subr.bf16.mxu1 %v5564_v16 }
  0xb4   : > { %5243 = vmatprep.mubr.bf16.mxu0 %v574_v26  ;;  %4704 = vmatpush3.bf16.msra.mxu0 %v5555_v3  ;;  %1134 = vst [vmem:[#allocation2 + $0x114] sm:$0xf] %v4414_v12  ;;  %1135 = vst [vmem:[#allocation2 + $0x118] sm:$0xf] %v4415_v13 }
  0xb5   : > { %4705 = vmatprep.subr.bf16.mxu0 %v5556_v4 }
  0xb6   : > { %5430 = vmatpush3.bf16.msra.mxu1 %v5565_v17 }
  0xb7   : > { %4835 = vmatprep.subr.bf16.mxu1 %v5589_v19 }
  0xb8   : > { %4706 = vmatpush3.bf16.msra.mxu0 %v5557_v5 }
  0xb9   : > { %4707 = vmatprep.subr.bf16.mxu0 %v5558_v6 }
  0xba   : > { %v6309_v21 = vld [vmem:[#allocation2 + $0x4] sm:$0xf]  ;;  %v6311_v22 = vld [vmem:[#allocation2 + $0x8] sm:$0xf] }
  0xbb   : > { %5244 = vmatmul.mubr.bf16.gmra.mxu0 %v575_v31  ;;  %v4450_v23 = vcombine.low %v1136_v20, %v6309_v21  ;;  %v4451_v24 = vcombine.low %v6311_v22, %v6311_v22 }
  0xbc   : > { %5247 = vmatprep.mubr.bf16.mxu0 %v576_v32  ;;  %4708 = vmatpush3.bf16.msra.mxu0 %v5559_v7  ;;  %v4486_v7 = vcombine.low %v6309_v21, %v6311_v22 }
  0xbd   : > { %4709 = vmatprep.subr.bf16.mxu0 %v5560_v9  ;;  %v1336_v25 = vshrl.u32 %v4450_v23, 16  ;;  %v1339_v26 = vshll.u32 %v4450_v23, 16  ;;  %v1344_v27 = vshrl.u32 %v4451_v24, 16  ;;  %v1347_v28 = vshll.u32 %v4451_v24, 16  ;;  %v1142_v23 = vld [vmem:[#allocation2 + $0x20] sm:$0x8] }
  0xbe   : > { %v5585_v24 = vld [vmem:[#allocation11 + $0x170] sm:$0xff]  }
  0xbf   : > { %v1338_v29 = vrot.slane %v1336_v25, 3  ;;  %v1341_v30 = vrot.slane %v1339_v26, 4  ;;  %v1346_v31 = vrot.slane %v1344_v27, 3  ;;  %v1349_v32 = vrot.slane %v1347_v28, 4 }
  0xc0   : > { %4710 = vmatpush3.bf16.msra.mxu0 %v5561_v10 }
  0xc1   : > { %4711 = vmatprep.subr.bf16.mxu0 %v5562_v14  ;;  %v1342_v34 = vor.u32 %v1341_v30, %v1338_v29  ;;  %v1350_v35 = vor.u32 %v1349_v32, %v1346_v31  ;;  %v1145_v14 = vld [vmem:[#allocation2 + $0x30] sm:$0x8] }
  0xc3   : > { %5248 = vmatmul.mubr.bf16.gmra.mxu0 %v577_v37  ;;  %v6322_v37 = vsel %vm1334_vm0, %v1342_v34, %v1350_v35 }
  0xc4   : > { %5251 = vmatprep.mubr.bf16.mxu0 %v578_v38  ;;  %4712 = vmatpush3.bf16.msra.mxu0 %v5563_v15 }
  0xc5   : > { %4713 = vmatprep.subr.bf16.mxu0 %v5564_v16 }
  0xc8   : > { %4714 = vmatpush3.bf16.msra.mxu0 %v5565_v17 }
  0xc9   : > { %5271 = vmatprep.subr.bf16.mxu0 %v6306_v18 }
  0xcb   : > { %5252 = vmatmul.mubr.bf16.gmra.mxu0 %v579_v43 }
  0xcc   : > { %5255 = vmatprep.mubr.bf16.mxu0 %v580_v44 }
  0xd3   : > { %5256 = vmatmul.mubr.bf16.gmra.mxu0 %v581_v49 }
  0xd4   : > { %5259 = vmatprep.mubr.bf16.mxu0 %v582_v50 }
  0xdb   : > { %5260 = vmatmul.mubr.bf16.gmra.mxu0 %v583_v55 }
  0xdc   : > { %5263 = vmatprep.mubr.bf16.mxu0 %v584_v56 }
  0xe3   : > { %5264 = vmatmul.mubr.bf16.gmra.mxu0 %v585_v61 }
  0xe4   : > { %5267 = vmatprep.mubr.bf16.mxu0 %v586_v62 }
  0xeb   : > { %5268 = vmatmul.mubr.bf16.gmra.mxu0 %v587_v1 }
 0x16b   : > { %v5237_v36 = vpop.f32.mrf.mxu0 }
 0x16c   : > { %v702_v38 = vadd.f32 %v5237_v36, %v6319_v33 }
 0x16d   : > { %v693_v39 = vpop.f32.mrf.mxu0 }
 0x16e   : > { %v838_v40 = vmax.f32 %v702_v38, 0.0 }
 0x16f   : > { %v5238_v41 = vpop.f32.mrf.mxu0 }
 0x170   : > { %v4639_v42 = vpack.c.bf16 %v838_v40, %v838_v40  ;;  %v705_v43 = vadd.f32 %v5238_v41, %v6319_v33  ;;  %v5593_v41 = vld [vmem:[#allocation11 + $0x168] sm:$0xff]  }
 0x171   : > { %v696_v44 = vpop.f32.mrf.mxu0 }
 0x172   : > { %1102 = vst [vmem:[#allocation2 + $0x14] sm:$0xf] %v4639_v42  ;;  %v839_v45 = vmax.f32 %v705_v43, 0.0 }
 0x173   : > { %v5241_v46 = vpop.f32.mrf.mxu0 }
 0x174   : > { %v4640_v47 = vpack.c.bf16 %v839_v45, %v839_v45  ;;  %v718_v48 = vadd.f32 %v5241_v46, %v6319_v33 }
 0x175   : > { %v709_v49 = vpop.f32.mrf.mxu0 }
 0x176   : > { %1103 = vst [vmem:[#allocation2 + $0x18] sm:$0xf] %v4640_v47  ;;  %v842_v50 = vmax.f32 %v718_v48, 0.0  ;;  %v710_v51 = vadd.f32 %v6319_v33, %v709_v49 }
 0x177   : > { %v5242_v52 = vpop.f32.mrf.mxu0 }
 0x178   : > { %v4643_v54 = vpack.c.bf16 %v842_v50, %v842_v50  ;;  %v840_v55 = vmax.f32 %v710_v51, 0.0  ;;  %v721_v56 = vadd.f32 %v5242_v52, %v6319_v33 }
 0x179   : > { %v712_v57 = vpop.f32.mrf.mxu0  ;;  %v1140_v58 = vld [vmem:[#allocation2 + $0x14] sm:$0xf] }
 0x17a   : > { %1106 = vst [vmem:[#allocation2 + $0x34] sm:$0xf] %v4643_v54  ;;  %v4641_v59 = vpack.c.bf16 %v840_v55, %v840_v55  ;;  %v843_v60 = vmax.f32 %v721_v56, 0.0  ;;  %v713_v61 = vadd.f32 %v6319_v33, %v712_v57  ;;  %v4452_v62 = vcombine.low %v1139_v53, %v1140_v58 }
 0x17b   : > { %v5245_v63 = vpop.f32.mrf.mxu0 }
 0x17c   : > { %1104 = vst [vmem:[#allocation2 + $0x24] sm:$0xf] %v4641_v59  ;;  %v4644_v0 = vpack.c.bf16 %v843_v60, %v843_v60  ;;  %v841_v1 = vmax.f32 %v713_v61, 0.0  ;;  %v734_v2 = vadd.f32 %v5245_v63, %v6319_v33  ;;  %v1353_v3 = vshrl.u32 %v4452_v62, 16  ;;  %v1151_v60 = vld [vmem:[#allocation2 + $0x50] sm:$0x8] }
 0x17d   : > { %v725_v4 = vpop.f32.mrf.mxu0  ;;  %v1141_v5 = vld [vmem:[#allocation2 + $0x18] sm:$0xf]  ;;  %v1356_v6 = vshll.u32 %v4452_v62, 16  ;;  %v5601_v61 = vld [vmem:[#allocation11 + $0x160] sm:$0xff]  }
 0x17e   : > { %1107 = vst [vmem:[#allocation2 + $0x38] sm:$0xf] %v4644_v0  ;;  %v4642_v8 = vpack.c.bf16 %v841_v1, %v841_v1  ;;  %v846_v9 = vmax.f32 %v734_v2, 0.0  ;;  %v726_v10 = vadd.f32 %v6319_v33, %v725_v4  ;;  %v4453_v11 = vcombine.low %v1141_v5, %v1141_v5 }
 0x17f   : > { %v5246_v12 = vpop.f32.mrf.mxu0  ;;  %v6334_v13 = vcombine.low %v1140_v58, %v1141_v5  ;;  %v1355_v15 = vrot.slane %v1353_v3, 3  ;;  %v1358_v26 = vrot.slane %v1356_v6, 4  ;;  %v1148_v3 = vld [vmem:[#allocation2 + $0x40] sm:$0x8] }
 0x180   : > { %1105 = vst [vmem:[#allocation2 + $0x28] sm:$0xf] %v4642_v8  ;;  %v4647_v16 = vpack.c.bf16 %v846_v9, %v846_v9  ;;  %v844_v17 = vmax.f32 %v726_v10, 0.0  ;;  %v737_v19 = vadd.f32 %v5246_v12, %v6319_v33  ;;  %v1361_v20 = vshrl.u32 %v4453_v11, 16 }
 0x181   : > { %v1364_v21 = vshll.u32 %v4453_v11, 16  ;;  %1968 = vmatprep.mubr.bf16.mxu0 %v6334_v13  ;;  %v728_v22 = vpop.f32.mrf.mxu0  ;;  %v1146_v25 = vld [vmem:[#allocation2 + $0x34] sm:$0xf]  ;;  %v1359_v45 = vor.u32 %v1358_v26, %v1355_v15 }
 0x182   : > { %1110 = vst [vmem:[#allocation2 + $0x54] sm:$0xf] %v4647_v16  ;;  %v4645_v27 = vpack.c.bf16 %v844_v17, %v844_v17  ;;  %v847_v28 = vmax.f32 %v737_v19, 0.0  ;;  %v729_v29 = vadd.f32 %v6319_v33, %v728_v22  ;;  %1969 = vmatmul.mubr.bf16.vlgmr.msra.gmra.mxu0 %v4486_v7  ;;  %v6339_v30 = vcombine.low %v1145_v14, %v1146_v25 }
 0x183   : > { %v5249_v31 = vpop.f32.mrf.mxu0  ;;  %v1143_v32 = vld [vmem:[#allocation2 + $0x24] sm:$0xf]  ;;  %5272 = vmatpush3.bf16.msra.mxu0 %v6306_v18  ;;  %v1363_v34 = vrot.slane %v1361_v20, 3  ;;  %v1366_v35 = vrot.slane %v1364_v21, 4 }
 0x184   : > { %1108 = vst [vmem:[#allocation2 + $0x44] sm:$0xf] %v4645_v27  ;;  %v4648_v36 = vpack.c.bf16 %v847_v28, %v847_v28  ;;  %v845_v38 = vmax.f32 %v729_v29, 0.0  ;;  %v750_v39 = vadd.f32 %v5249_v31, %v6319_v33  ;;  %v4454_v40 = vcombine.low %v1142_v23, %v1143_v32  ;;  %5273 = vmatprep.subr.bf16.mxu0 %v5585_v24  ;;  %v5602_v23 = vld [vmem:[#allocation11 + $0x158] sm:$0xff]  }
 0x185   : > { %v741_v42 = vpop.f32.mrf.mxu0  ;;  %v1147_v43 = vld [vmem:[#allocation2 + $0x38] sm:$0xf]  ;;  %v1387_v44 = vshrl.u32 %v6339_v30, 16  ;;  %v1367_v46 = vor.u32 %v1366_v35, %v1363_v34  ;;  %v1390_v49 = vshll.u32 %v6339_v30, 16 }
 0x186   : > { %1111 = vst [vmem:[#allocation2 + $0x58] sm:$0xf] %v4648_v36  ;;  %v4646_v47 = vpack.c.bf16 %v845_v38, %v845_v38  ;;  %v850_v48 = vmax.f32 %v750_v39, 0.0  ;;  %v742_v18 = vadd.f32 %v6319_v33, %v741_v42  ;;  %v1370_v52 = vshrl.u32 %v4454_v40, 16  ;;  %v5625_v30 = vld [vmem:[#allocation11 + $0x18] sm:$0xff]  }
 0x187   : > { %v5250_v50 = vpop.f32.mrf.mxu0  ;;  %v1144_v51 = vld [vmem:[#allocation2 + $0x28] sm:$0xf]  ;;  %v1373_v53 = vshll.u32 %v4454_v40, 16  ;;  %v6346_v54 = vcombine.low %v1147_v43, %v1147_v43  ;;  %5274 = vmatpush3.bf16.msra.mxu0 %v5585_v24  ;;  %v6349_v55 = vsel %vm1334_vm0, %v1359_v45, %v1367_v46  ;;  %v6356_v2 = vcombine.low %v1146_v25, %v1147_v43  ;;  %v1154_v45 = vld [vmem:[#allocation2 + $0x60] sm:$0x8]  ;;  %v5608_v46 = vld [vmem:[#allocation11 + $0x150] sm:$0xff]  }
 0x188   : > { %1109 = vst [vmem:[#allocation2 + $0x48] sm:$0xf] %v4646_v47  ;;  %v4651_v56 = vpack.c.bf16 %v850_v48, %v850_v48  ;;  %v848_v57 = vmax.f32 %v742_v18, 0.0  ;;  %v753_v58 = vadd.f32 %v5250_v50, %v6319_v33  ;;  %v4455_v59 = vcombine.low %v1144_v51, %v1144_v51  ;;  %5275 = vmatprep.subr.bf16.mxu0 %v5593_v41 }
 0x189   : > { %v744_v62 = vpop.f32.mrf.mxu0  ;;  %v6352_v63 = vcombine.low %v1143_v32, %v1144_v51  ;;  %v1395_v0 = vshrl.u32 %v6346_v54, 16  ;;  %v1398_v1 = vshll.u32 %v6346_v54, 16  ;;  %v1152_v4 = vld [vmem:[#allocation2 + $0x54] sm:$0xf]  ;;  %v1372_v14 = vrot.slane %v1370_v52, 3 }
 0x18a   : > { %1114 = vst [vmem:[#allocation2 + $0x74] sm:$0xf] %v4651_v56  ;;  %v4649_v5 = vpack.c.bf16 %v848_v57, %v848_v57  ;;  %v851_v6 = vmax.f32 %v753_v58, 0.0  ;;  %v745_v7 = vadd.f32 %v6319_v33, %v744_v62  ;;  %v1378_v8 = vshrl.u32 %v4455_v59, 16 }
 0x18b   : > { %v1381_v9 = vshll.u32 %v4455_v59, 16  ;;  %1976 = vmatprep.mubr.bf16.mxu0 %v6352_v63  ;;  %v5253_v10 = vpop.f32.mrf.mxu0  ;;  %v1149_v11 = vld [vmem:[#allocation2 + $0x44] sm:$0xf]  ;;  %v6360_v12 = vcombine.low %v1151_v60, %v1152_v4  ;;  %5276 = vmatpush3.bf16.msra.mxu0 %v5593_v41  ;;  %v1375_v15 = vrot.slane %v1373_v53, 4  ;;  %v6369_v27 = vrot.slane %v1387_v44, 3 }
 0x18c   : > { %1112 = vst [vmem:[#allocation2 + $0x64] sm:$0xf] %v4649_v5  ;;  %v4652_v16 = vpack.c.bf16 %v851_v6, %v851_v6  ;;  %v849_v17 = vmax.f32 %v745_v7, 0.0  ;;  %v766_v19 = vadd.f32 %v5253_v10, %v6319_v33  ;;  %1977 = vmatmul.mubr.bf16.gmra.mxu0 %v6334_v13  ;;  %v6364_v20 = vcombine.low %v1148_v3, %v1149_v11  ;;  %v1157_v44 = vld [vmem:[#allocation2 + $0x70] sm:$0x8] }
 0x18d   : > { %5277 = vmatprep.subr.bf16.mxu0 %v5601_v61  ;;  %1984 = vmatprep.mubr.bf16.mxu0 %v6356_v2  ;;  %v757_v24 = vpop.f32.mrf.mxu0  ;;  %v1153_v21 = vld [vmem:[#allocation2 + $0x58] sm:$0xf]  ;;  %v1421_v22 = vshrl.u32 %v6360_v12, 16  ;;  %v1424_v25 = vshll.u32 %v6360_v12, 16  ;;  %v1380_v26 = vrot.slane %v1378_v8, 3  ;;  %v1376_v38 = vor.u32 %v1375_v15, %v1372_v14 }
 0x18e   : > { %1115 = vst [vmem:[#allocation2 + $0x78] sm:$0xf] %v4652_v16  ;;  %v4650_v28 = vpack.c.bf16 %v849_v17, %v849_v17  ;;  %v854_v29 = vmax.f32 %v766_v19, 0.0  ;;  %v758_v13 = vadd.f32 %v6319_v33, %v757_v24  ;;  %v1404_v31 = vshrl.u32 %v6364_v20, 16  ;;  %v1163_v24 = vld [vmem:[#allocation2 + $0x90] sm:$0x8] }
 0x18f   : > { %v5254_v32 = vpop.f32.mrf.mxu0  ;;  %v1150_v34 = vld [vmem:[#allocation2 + $0x48] sm:$0xf]  ;;  %v1407_v35 = vshll.u32 %v6364_v20, 16  ;;  %v6374_v36 = vcombine.low %v1153_v21, %v1153_v21  ;;  %5278 = vmatpush3.bf16.msra.mxu0 %v5601_v61  ;;  %v1383_v39 = vrot.slane %v1381_v9, 4  ;;  %v6382_v50 = vcombine.low %v1152_v4, %v1153_v21  ;;  %v1175_v12 = vld [vmem:[#allocation2 + $0xd0] sm:$0x8] }
 0x190   : > { %1113 = vst [vmem:[#allocation2 + $0x68] sm:$0xf] %v4650_v28  ;;  %v4655_v40 = vpack.c.bf16 %v854_v29, %v854_v29  ;;  %v852_v41 = vmax.f32 %v758_v13, 0.0  ;;  %v769_v42 = vadd.f32 %v5254_v32, %v6319_v33  ;;  %v6377_v43 = vcombine.low %v1150_v34, %v1150_v34  ;;  %5279 = vmatprep.subr.bf16.mxu0 %v5602_v23  ;;  %v5609_v9 = vld [vmem:[#allocation11 + $0x148] sm:$0xff]  }
 0x191   : > { %v760_v47 = vpop.f32.mrf.mxu0  ;;  %v6379_v48 = vcombine.low %v1149_v11, %v1150_v34  ;;  %v1429_v18 = vshrl.u32 %v6374_v36, 16  ;;  %v1158_v51 = vld [vmem:[#allocation2 + $0x74] sm:$0xf]  ;;  %v1384_v52 = vor.u32 %v1383_v39, %v1380_v26  ;;  %v1432_v58 = vshll.u32 %v6374_v36, 16  ;;  %v1160_v26 = vld [vmem:[#allocation2 + $0x80] sm:$0x8] }
 0x192   : > { %1118 = vst [vmem:[#allocation2 + $0x94] sm:$0xf] %v4655_v40  ;;  %v4653_v53 = vpack.c.bf16 %v852_v41, %v852_v41  ;;  %v855_v56 = vmax.f32 %v769_v42, 0.0  ;;  %v761_v57 = vadd.f32 %v6319_v33, %v760_v47  ;;  %v1412_v60 = vshrl.u32 %v6377_v43, 16  ;;  %v5615_v41 = vld [vmem:[#allocation11 + $0x140] sm:$0xff]  }
 0x193   : > { %v5257_v59 = vpop.f32.mrf.mxu0  ;;  %v6387_v61 = vcombine.low %v1157_v44, %v1158_v51  ;;  %v1155_v62 = vld [vmem:[#allocation2 + $0x64] sm:$0xf]  ;;  %5280 = vmatpush3.bf16.msra.mxu0 %v5602_v23  ;;  %v6390_v3 = vsel %vm1334_vm0, %v1376_v38, %v1384_v52  ;;  %v1392_v4 = vrot.slane %v1390_v49, 4  ;;  %v1415_v10 = vshll.u32 %v6377_v43, 16  ;;  %v1181_v44 = vld [vmem:[#allocation2 + $0xf0] sm:$0x8] }
 0x194   : > { %1116 = vst [vmem:[#allocation2 + $0x84] sm:$0xf] %v4653_v53  ;;  %v4656_v5 = vpack.c.bf16 %v855_v56, %v855_v56  ;;  %v853_v6 = vmax.f32 %v761_v57, 0.0  ;;  %v782_v7 = vadd.f32 %v5257_v59, %v6319_v33  ;;  %1985 = vmatmul.mubr.bf16.gmra.mxu0 %v6352_v63  ;;  %v6396_v8 = vcombine.low %v1154_v45, %v1155_v62  ;;  %v5629_v57 = vld [vmem:[#allocation11 + $0x50] sm:$0xff]  }
 0x195   : > { %5281 = vmatprep.subr.bf16.mxu0 %v5608_v46  ;;  %1992 = vmatprep.mubr.bf16.mxu0 %v6379_v48  ;;  %v773_v11 = vpop.f32.mrf.mxu0  ;;  %v1159_v14 = vld [vmem:[#allocation2 + $0x78] sm:$0xf]  ;;  %v1397_v15 = vrot.slane %v1395_v0, 3  ;;  %v1393_v32 = vor.u32 %v1392_v4, %v6369_v27  ;;  %v1400_v0 = vrot.slane %v1398_v1, 4 }
 0x196   : > { %1119 = vst [vmem:[#allocation2 + $0x98] sm:$0xf] %v4656_v5  ;;  %v4654_v16 = vpack.c.bf16 %v853_v6, %v853_v6  ;;  %v858_v17 = vmax.f32 %v782_v7, 0.0  ;;  %v774_v19 = vadd.f32 %v6319_v33, %v773_v11  ;;  %v6405_v23 = vcombine.low %v1159_v14, %v1159_v14 }
 0x197   : > { %v5258_v21 = vpop.f32.mrf.mxu0  ;;  %v6407_v28 = vcombine.low %v1158_v51, %v1159_v14  ;;  %v1156_v29 = vld [vmem:[#allocation2 + $0x68] sm:$0xf]  ;;  %v1438_v13 = vshrl.u32 %v6396_v8, 16  ;;  %5282 = vmatpush3.bf16.msra.mxu0 %v5608_v46  ;;  %v1441_v40 = vshll.u32 %v6396_v8, 16  ;;  %v1401_v47 = vor.u32 %v1400_v0, %v1397_v15  ;;  %v6433_v15 = vld [vmem:[#allocation11 + $0xb8] sm:$0xff]  }
 0x198   : > { %1117 = vst [vmem:[#allocation2 + $0x88] sm:$0xf] %v4654_v16  ;;  %v4659_v34 = vpack.c.bf16 %v858_v17, %v858_v17  ;;  %v856_v38 = vmax.f32 %v774_v19, 0.0  ;;  %v785_v39 = vadd.f32 %v5258_v21, %v6319_v33  ;;  %5283 = vmatprep.subr.bf16.mxu0 %v5609_v9  ;;  %v6417_v46 = vcombine.low %v1156_v29, %v1156_v29 }
 0x199   : > { %v776_v42 = vpop.f32.mrf.mxu0  ;;  %v1164_v27 = vld [vmem:[#allocation2 + $0x94] sm:$0xf]  ;;  %v6424_v4 = vcombine.low %v1155_v62, %v1156_v29  ;;  %v6427_v5 = vsel %vm1334_vm0, %v1393_v32, %v1401_v47  ;;  %v1406_v19 = vrot.slane %v1404_v31, 3  ;;  %v1414_v32 = vrot.slane %v1412_v60, 3 }
 0x19a   : > { %1122 = vst [vmem:[#allocation2 + $0xb4] sm:$0xf] %v4659_v34  ;;  %v4657_v54 = vpack.c.bf16 %v856_v38, %v856_v38  ;;  %v859_v1 = vmax.f32 %v785_v39, 0.0  ;;  %v777_v51 = vadd.f32 %v6319_v33, %v776_v42  ;;  %v6420_v52 = vcombine.low %v1163_v24, %v1164_v27  ;;  %v5594_v38 = vld [vmem:[#allocation11 + $0x38] sm:$0xff]  }
 0x19b   : > { %v1161_v53 = vld [vmem:[#allocation2 + $0x84] sm:$0xf]  ;;  %v5261_v56 = vpop.f32.mrf.mxu0  ;;  %5284 = vmatpush3.bf16.msra.mxu0 %v5609_v9  ;;  %v1409_v24 = vrot.slane %v1407_v35, 4  ;;  %v1434_v34 = vrot.slane %v1432_v58, 4  ;;  %v5624_v58 = vld [vmem:[#allocation11 + $0x58] sm:$0xff]  }
 0x19c   : > { %1120 = vst [vmem:[#allocation2 + $0xa4] sm:$0xf] %v4657_v54  ;;  %v4660_v6 = vpack.c.bf16 %v859_v1, %v859_v1  ;;  %v857_v7 = vmax.f32 %v777_v51, 0.0  ;;  %1993 = vmatmul.mubr.bf16.gmra.mxu0 %v6356_v2  ;;  %v6430_v11 = vcombine.low %v1160_v26, %v1161_v53  ;;  %v798_v14 = vadd.f32 %v5261_v56, %v6319_v33  ;;  %v1166_v1 = vld [vmem:[#allocation2 + $0xa0] sm:$0x8] }
 0x19d   : > { %5285 = vmatprep.subr.bf16.mxu0 %v5615_v41  ;;  %2000 = vmatprep.mubr.bf16.mxu0 %v6382_v50  ;;  %v1165_v62 = vld [vmem:[#allocation2 + $0x98] sm:$0xf]  ;;  %v789_v17 = vpop.f32.mrf.mxu0  ;;  %v1169_v51 = vld [vmem:[#allocation2 + $0xb0] sm:$0x8] }
 0x19e   : > { %1123 = vst [vmem:[#allocation2 + $0xb8] sm:$0xf] %v4660_v6  ;;  %v4658_v21 = vpack.c.bf16 %v857_v7, %v857_v7  ;;  %v862_v29 = vmax.f32 %v798_v14, 0.0  ;;  %v6446_v39 = vcombine.low %v1165_v62, %v1165_v62  ;;  %v6448_v42 = vcombine.low %v1164_v27, %v1165_v62 }
 0x19f   : > { %v1162_v0 = vld [vmem:[#allocation2 + $0x88] sm:$0xf]  ;;  %v790_v31 = vadd.f32 %v6319_v33, %v789_v17  ;;  %v5262_v20 = vpop.f32.mrf.mxu0  ;;  %5286 = vmatpush3.bf16.msra.mxu0 %v5615_v41  ;;  %v1410_v14 = vor.u32 %v1409_v24, %v1406_v19  ;;  %v1417_v41 = vrot.slane %v1415_v10, 4 }
 0x1a0   : > { %1121 = vst [vmem:[#allocation2 + $0xa8] sm:$0xf] %v4658_v21  ;;  %v6451_v35 = vcombine.low %v1162_v0, %v1162_v0  ;;  %v6453_v47 = vcombine.low %v1161_v53, %v1162_v0  ;;  %v4663_v54 = vpack.c.bf16 %v862_v29, %v862_v29  ;;  %v801_v60 = vadd.f32 %v5262_v20, %v6319_v33  ;;  %v5603_v29 = vld [vmem:[#allocation11 + $0x70] sm:$0xff]  }
 0x1a1   : > { %5319 = vmatprep.subr.bf16.mxu0 %v6433_v15  ;;  %v860_v27 = vmax.f32 %v790_v31, 0.0  ;;  %v792_v6 = vpop.f32.mrf.mxu0  ;;  %v1170_v7 = vld [vmem:[#allocation2 + $0xb4] sm:$0xf]  ;;  %v1418_v10 = vor.u32 %v1417_v41, %v1414_v32 }
 0x1a2   : > { %2024 = vmatprep.mubr.bf16.mxu1 %v6453_v47  ;;  %1126 = vst [vmem:[#allocation2 + $0xd4] sm:$0xf] %v4663_v54  ;;  %v863_v17 = vmax.f32 %v801_v60, 0.0  ;;  %v793_v21 = vadd.f32 %v6319_v33, %v792_v6  ;;  %v4472_v43 = vcombine.low %v1169_v51, %v1170_v7  ;;  %v5607_v60 = vld [vmem:[#allocation11 + $0x30] sm:$0xff]   ;;  %v5613_v51 = vld [vmem:[#allocation11 + $0x68] sm:$0xff]  }
 0x1a3   : > { %2025 = vmatmul.mubr.bf16.vlgmr.msra.gmra.mxu1 %v6407_v28  ;;  %v4661_v31 = vpack.c.bf16 %v860_v27, %v860_v27  ;;  %v1167_v19 = vld [vmem:[#allocation2 + $0xa4] sm:$0xf]  ;;  %v5265_v24 = vpop.f32.mrf.mxu0  ;;  %v6473_v41 = vsel %vm1334_vm0, %v1410_v14, %v1418_v10 }
 0x1a4   : > { %2001 = vmatmul.mubr.bf16.gmra.mxu0 %v6379_v48  ;;  %4836 = vmatpush3.bf16.msra.mxu1 %v5594_v38  ;;  %v4664_v20 = vpack.c.bf16 %v863_v17, %v863_v17  ;;  %v861_v54 = vmax.f32 %v793_v21, 0.0  ;;  %v6467_v56 = vcombine.low %v1166_v1, %v1167_v19  ;;  %v814_v6 = vadd.f32 %v5265_v24, %v6319_v33 }
 0x1a5   : > { %2008 = vmatprep.mubr.bf16.mxu0 %v6424_v4  ;;  %2032 = vmatprep.mubr.bf16.mxu1 %v6448_v42  ;;  %1124 = vst [vmem:[#allocation2 + $0xc4] sm:$0xf] %v4661_v31  ;;  %v1171_v27 = vld [vmem:[#allocation2 + $0xb8] sm:$0xf]  ;;  %v1523_v53 = vshrl.u32 %v4472_v43, 16  ;;  %v1526_v16 = vshll.u32 %v4472_v43, 16  ;;  %v805_v32 = vpop.f32.mrf.mxu0 }
 0x1a6   : > { %v6477_v38 = vrot.slane %v1421_v22, 3  ;;  %1127 = vst [vmem:[#allocation2 + $0xd8] sm:$0xf] %v4664_v20  ;;  %v4662_v1 = vpack.c.bf16 %v861_v54, %v861_v54  ;;  %4837 = vmatprep.subr.bf16.mxu1 %v5603_v29  ;;  %v866_v21 = vmax.f32 %v814_v6, 0.0  ;;  %v6482_v31 = vrot.slane %v1424_v25, 4  ;;  %v5614_v6 = vld [vmem:[#allocation11 + $0x28] sm:$0xff]  }
 0x1a7   : > { %v1168_v24 = vld [vmem:[#allocation2 + $0xa8] sm:$0xf]  ;;  %v4473_v9 = vcombine.low %v1171_v27, %v1171_v27  ;;  %v6485_v14 = vrot.slane %v1523_v53, 3  ;;  %v5266_v10 = vpop.f32.mrf.mxu0  ;;  %v806_v54 = vadd.f32 %v6319_v33, %v805_v32  ;;  %v6492_v25 = vrot.slane %v1526_v16, 4 }
 0x1a8   : > { %1125 = vst [vmem:[#allocation2 + $0xc8] sm:$0xf] %v4662_v1  ;;  %v6487_v22 = vcombine.low %v1168_v24, %v1168_v24  ;;  %v6489_v20 = vcombine.low %v1167_v19, %v1168_v24  ;;  %4838 = vmatpush3.bf16.msra.mxu1 %v5607_v60  ;;  %v4667_v29 = vpack.c.bf16 %v866_v21, %v866_v21  ;;  %v1172_v21 = vld [vmem:[#allocation2 + $0xc0] sm:$0x8] }
 0x1a9   : > { %v1531_v17 = vshrl.u32 %v4473_v9, 16  ;;  %v6494_v0 = vcombine.low %v1170_v7, %v1171_v27  ;;  %4839 = vmatprep.subr.bf16.mxu1 %v5613_v51  ;;  %v817_v53 = vadd.f32 %v5266_v10, %v6319_v33  ;;  %v808_v43 = vpop.f32.mrf.mxu0  ;;  %v1176_v1 = vld [vmem:[#allocation2 + $0xd4] sm:$0xf]  ;;  %v1534_v62 = vshll.u32 %v4473_v9, 16  ;;  %v5619_v24 = vld [vmem:[#allocation11 + $0x60] sm:$0xff]  }
 0x1aa   : > { %1130 = vst [vmem:[#allocation2 + $0xf4] sm:$0xf] %v4667_v29  ;;  %v864_v19 = vmax.f32 %v806_v54, 0.0  ;;  %v809_v60 = vadd.f32 %v6319_v33, %v808_v43  ;;  %v1427_v32 = vor.u32 %v6482_v31, %v6477_v38  ;;  %v4476_v10 = vcombine.low %v1175_v12, %v1176_v1 }
 0x1ab   : > { %2033 = vmatmul.mubr.bf16.gmra.mxu1 %v6453_v47  ;;  %v867_v27 = vmax.f32 %v817_v53, 0.0  ;;  %v5269_v51 = vpop.f32.mrf.mxu0  ;;  %v1431_v54 = vrot.slane %v1429_v18, 3  ;;  %v6515_v26 = vrot.slane %v1531_v17, 3 }
 0x1ac   : > { %2009 = vmatmul.mubr.bf16.gmra.mxu0 %v6382_v50  ;;  %2040 = vmatprep.mubr.bf16.mxu1 %v6489_v20  ;;  %v4665_v9 = vpack.c.bf16 %v864_v19, %v864_v19  ;;  %v865_v43 = vmax.f32 %v809_v60, 0.0  ;;  %v6505_v29 = vld [vmem:[#allocation2 + $0xc4] sm:$0xf]  ;;  %v1557_v16 = vshrl.u32 %v4476_v10, 16  ;;  %v1560_v19 = vshll.u32 %v4476_v10, 16 }
 0x1ad   : > { %2016 = vmatprep.mubr.bf16.mxu0 %v6407_v28  ;;  %4840 = vmatpush3.bf16.msra.mxu1 %v5614_v6  ;;  %v4668_v53 = vpack.c.bf16 %v867_v27, %v867_v27  ;;  %v6513_v12 = vcombine.low %v1172_v21, %v6505_v29  ;;  %v5620_v51 = vld [vmem:[#allocation11 + $0x20] sm:$0xff]   ;;  %v1177_v7 = vld [vmem:[#allocation2 + $0xd8] sm:$0xf]  ;;  %v821_v60 = vpop.f32.mrf.mxu0  ;;  %v6518_v6 = vrot.slane %v1534_v62, 4  ;;  %v1435_v49 = vor.u32 %v1434_v34, %v1431_v54 }
 0x1ae   : > { %1128 = vst [vmem:[#allocation2 + $0xe4] sm:$0xf] %v4665_v9  ;;  %v4666_v45 = vpack.c.bf16 %v865_v43, %v865_v43  ;;  %4841 = vmatprep.subr.bf16.mxu1 %v5619_v24  ;;  %v4477_v18 = vcombine.low %v1177_v7, %v1177_v7  ;;  %v822_v36 = vadd.f32 %v6319_v33, %v821_v60  ;;  %v6526_v24 = vrot.slane %v1557_v16, 3 }
 0x1af   : > { %1131 = vst [vmem:[#allocation2 + $0xf8] sm:$0xf] %v4668_v53  ;;  %v1174_v21 = vld [vmem:[#allocation2 + $0xc8] sm:$0xf]  ;;  %v6522_v10 = vcombine.low %v1176_v1, %v1177_v7  ;;  %v5270_v17 = vpop.f32.mrf.mxu0  ;;  %v6528_v62 = vrot.slane %v1560_v19, 4  ;;  %v1440_v1 = vrot.slane %v1438_v13, 3  ;;  %v6547_v13 = vsel %vm1334_vm0, %v1427_v32, %v1435_v49 }
 0x1b0   : > { %1129 = vst [vmem:[#allocation2 + $0xe8] sm:$0xf] %v4666_v45  ;;  %v6524_v9 = vcombine.low %v1174_v21, %v1174_v21  ;;  %v1565_v43 = vshrl.u32 %v4477_v18, 16  ;;  %v1568_v60 = vshll.u32 %v4477_v18, 16  ;;  %v868_v53 = vmax.f32 %v822_v36, 0.0 }
 0x1b1   : > { %4842 = vmatpush3.bf16.msra.mxu1 %v5620_v51  ;;  %v824_v59 = vpop.f32.mrf.mxu0  ;;  %v6530_v27 = vld [vmem:[#allocation2 + $0xf4] sm:$0xf]  ;;  %v1443_v51 = vrot.slane %v1441_v40, 4  ;;  %v1178_v36 = vld [vmem:[#allocation2 + $0xe0] sm:$0x8]  ;;  %v7525_v54 = vshrl.u32 %v6417_v46, 16 }
 0x1b2   : > { %v6536_v7 = vrot.slane %v1565_v43, 3  ;;  %4843 = vmatprep.subr.bf16.mxu1 %v5624_v58  ;;  %v4669_v19 = vpack.c.bf16 %v868_v53, %v868_v53  ;;  %v825_v18 = vadd.f32 %v6319_v33, %v824_v59  ;;  %v4480_v34 = vcombine.low %v1181_v44, %v6530_v27  ;;  %v5630_v40 = vld [vmem:[#allocation11 + $0x10] sm:$0xff]  }
 0x1b3   : > { %2041 = vmatmul.mubr.bf16.gmra.mxu1 %v6448_v42  ;;  %v6551_v8 = vrot.slane %v1568_v60, 4  ;;  %v1448_v58 = vrot.slane %v7525_v54, 3  ;;  %v7526_v33 = vshll.u32 %v6417_v46, 16  ;;  %v7527_v44 = vshrl.u32 %v6387_v61, 16  ;;  %v5634_v46 = vld [vmem:[#allocation11 + $0x48] sm:$0xff]  }
 0x1b4   : > { %2017 = vmatmul.mubr.bf16.gmra.mxu0 %v6424_v4  ;;  %2048 = vmatprep.mubr.bf16.mxu1 %v6494_v0  ;;  %1132 = vst [vmem:[#allocation2 + $0x104] sm:$0xf] %v4669_v19  ;;  %v869_v49 = vmax.f32 %v825_v18, 0.0  ;;  %v1591_v31 = vshrl.u32 %v4480_v34, 16  ;;  %v1594_v32 = vshll.u32 %v4480_v34, 16  ;;  %v7528_v43 = vshll.u32 %v6387_v61, 16 }
 0x1b5   : > { %v1451_v59 = vrot.slane %v7526_v33, 4  ;;  %v1457_v17 = vrot.slane %v7527_v44, 3  ;;  %5287 = vmatprep.mubr.bf16.mxu0 %v6352_v63  ;;  %4844 = vmatpush3.bf16.msra.mxu1 %v5625_v30  ;;  %v1179_v38 = vld [vmem:[#allocation2 + $0xe4] sm:$0xf]  ;;  %v7529_v44 = vshrl.u32 %v6405_v23, 16  ;;  %v7530_v63 = vshll.u32 %v6405_v23, 16 }
 0x1b6   : > { %v1460_v60 = vrot.slane %v7528_v43, 4  ;;  %v6562_v53 = vcombine.low %v1178_v36, %v1179_v38  ;;  %4845 = vmatprep.subr.bf16.mxu1 %v5629_v57  ;;  %v6564_v54 = vld [vmem:[#allocation2 + $0xf8] sm:$0xf]  ;;  %v4670_v19 = vpack.c.bf16 %v869_v49, %v869_v49  ;;  %v6572_v61 = vrot.slane %v1591_v31, 3 }
 0x1b7   : > { %v1452_v33 = vor.u32 %v1451_v59, %v1448_v58  ;;  %v1465_v16 = vrot.slane %v7529_v44, 3  ;;  %v1468_v30 = vrot.slane %v7530_v63, 4  ;;  %v1180_v18 = vld [vmem:[#allocation2 + $0xe8] sm:$0xf]  ;;  %v4481_v34 = vcombine.low %v6564_v54, %v6564_v54 }
 0x1b8   : > { %v1444_v36 = vor.u32 %v1443_v51, %v1440_v1  ;;  %v6575_v57 = vcombine.low %v6505_v29, %v1174_v21  ;;  %v6577_v43 = vcombine.low %v1180_v18, %v1180_v18  ;;  %v6580_v59 = vrot.slane %v1594_v32, 4  ;;  %1133 = vst [vmem:[#allocation2 + $0x108] sm:$0xf] %v4670_v19  ;;  %v5635_v63 = vld [vmem:[#allocation11 + $0x8] sm:$0xff]   ;;  %v1184_v1 = vld [vmem:[#allocation2 + $0x100] sm:$0x8] }
 0x1b9   : > { %v6583_v49 = vcombine.low %v1179_v38, %v1180_v18  ;;  %4846 = vmatpush3.bf16.msra.mxu1 %v5630_v40  ;;  %v1599_v44 = vshrl.u32 %v4481_v34, 16  ;;  %v1602_v21 = vshll.u32 %v4481_v34, 16  ;;  %v5641_v51 = vld [vmem:[#allocation11 + $0x40] sm:$0xff]   ;;  %v1461_v58 = vor.u32 %v1460_v60, %v1457_v17  ;;  %v5640_v40 = vld [vmem:[#allocation11 + $0xb0] sm:$0xff]  }
 0x1ba   : > { %v6586_v31 = vsel %vm1334_vm0, %v1444_v36, %v1452_v33  ;;  %4847 = vmatprep.subr.bf16.mxu1 %v5634_v46  ;;  %v1469_v32 = vor.u32 %v1468_v30, %v1465_v16  ;;  %v7531_v18 = vshrl.u32 %v6430_v11, 16  ;;  %v7532_v33 = vshll.u32 %v6430_v11, 16  ;;  %v5642_v11 = vld [vmem:[#allocation11] sm:$0xff]  }
 0x1bb   : > { %2049 = vmatmul.mubr.bf16.gmra.mxu1 %v6489_v20  ;;  %v6591_v38 = vrot.slane %v1599_v44, 3  ;;  %v6599_v46 = vld [vmem:[#allocation2 + $0x104] sm:$0xf]  ;;  %v7533_v17 = vshrl.u32 %v6451_v35, 16  ;;  %v7534_v30 = vshll.u32 %v6451_v35, 16  ;;  %v7535_v44 = vshrl.u32 %v6420_v52, 16 }
 0x1bc   : > { %v1474_v23 = vrot.slane %v7531_v18, 3  ;;  %v1477_v36 = vrot.slane %v7532_v33, 4  ;;  %5288 = vmatmul.mubr.bf16.vlgmr.msra.gmra.mxu0 %v6356_v2  ;;  %2056 = vmatprep.mubr.bf16.mxu1 %v6575_v57  ;;  %v6602_v16 = vsel %vm1334_vm0, %v1461_v58, %v1469_v32  ;;  %v4482_v2 = vcombine.low %v1184_v1, %v6599_v46  ;;  %v6617_v35 = vld [vmem:[#allocation11 + $0x238] sm:$0xff]  }
 0x1bd   : > { %v1482_v60 = vrot.slane %v7533_v17, 3  ;;  %v1485_v34 = vrot.slane %v7534_v30, 4  ;;  %v1491_v18 = vrot.slane %v7535_v44, 3  ;;  %5291 = vmatprep.mubr.bf16.mxu0 %v6379_v48  ;;  %4848 = vmatpush3.bf16.msra.mxu1 %v5635_v63  ;;  %v7536_v19 = vshll.u32 %v6420_v52, 16  ;;  %v5643_v44 = vld [vmem:[#allocation11 + $0xa8] sm:$0xff]  }
 0x1be   : > { %v1478_v33 = vor.u32 %v1477_v36, %v1474_v23  ;;  %v7537_v32 = vshrl.u32 %v6446_v39, 16  ;;  %5320 = vmatpush3.bf16.msra.mxu0 %v6433_v15  ;;  %4849 = vmatprep.subr.bf16.mxu1 %v5641_v51  ;;  %v7538_v30 = vshll.u32 %v6446_v39, 16  ;;  %v7539_v63 = vshrl.u32 %v6467_v56, 16 }
 0x1bf   : > { %v1494_v58 = vrot.slane %v7536_v19, 4  ;;  %v1486_v17 = vor.u32 %v1485_v34, %v1482_v60  ;;  %v7540_v23 = vshll.u32 %v6467_v56, 16  ;;  %v1604_v52 = vrot.slane %v1602_v21, 4  ;;  %5321 = vmatprep.subr.bf16.mxu0 %v5640_v40  ;;  %v6627_v45 = vld [vmem:[#allocation2 + $0x108] sm:$0xf] }
 0x1c0   : > { %v1499_v29 = vrot.slane %v7537_v32, 3  ;;  %v1502_v48 = vrot.slane %v7538_v30, 4  ;;  %v1508_v1 = vrot.slane %v7539_v63, 3  ;;  %v1608_v19 = vshrl.u32 %v4482_v2, 16 }
 0x1c1   : > { %v1511_v36 = vrot.slane %v7540_v23, 4  ;;  %v1495_v32 = vor.u32 %v1494_v58, %v1491_v18  ;;  %v7541_v15 = vshrl.u32 %v6487_v22, 16  ;;  %v6630_v60 = vsel %vm1334_vm0, %v1478_v33, %v1486_v17  ;;  %4850 = vmatpush3.bf16.msra.mxu1 %v5642_v11 }
 0x1c2   : > { %v1503_v39 = vor.u32 %v1502_v48, %v1499_v29  ;;  %v7542_v30 = vshll.u32 %v6487_v22, 16  ;;  %v4483_v56 = vcombine.low %v6627_v45, %v6627_v45  ;;  %v1611_v21 = vshll.u32 %v4482_v2, 16  ;;  %5322 = vmatpush3.bf16.msra.mxu0 %v5640_v40  ;;  %5367 = vmatprep.subr.bf16.mxu1 %v6617_v35 }
 0x1c3   : > { %v1516_v51 = vrot.slane %v7541_v15, 3  ;;  %v1512_v34 = vor.u32 %v1511_v36, %v1508_v1  ;;  %v1529_v18 = vor.u32 %v6492_v25, %v6485_v14  ;;  %v1537_v58 = vor.u32 %v6518_v6, %v6515_v26  ;;  %2057 = vmatmul.mubr.bf16.gmra.mxu1 %v6494_v0  ;;  %5323 = vmatprep.subr.bf16.mxu0 %v5643_v44  ;;  %v5644_v25 = vld [vmem:[#allocation11 + $0xa0] sm:$0xff]  }
 0x1c4   : > { %v1519_v63 = vrot.slane %v7542_v30, 4  ;;  %v6642_v29 = vsel %vm1334_vm0, %v1495_v32, %v1503_v39  ;;  %v7543_v22 = vshrl.u32 %v6513_v12, 16  ;;  %v7544_v48 = vshll.u32 %v6513_v12, 16  ;;  %5292 = vmatmul.mubr.bf16.gmra.mxu0 %v6382_v50  ;;  %2064 = vmatprep.mubr.bf16.mxu1 %v6522_v10 }
 0x1c5   : > { %v1616_v11 = vshrl.u32 %v4483_v56, 16  ;;  %v1619_v14 = vshll.u32 %v4483_v56, 16  ;;  %v6650_v26 = vsel %vm1334_vm0, %v1529_v18, %v1537_v58  ;;  %v7545_v6 = vshrl.u32 %v6524_v9, 16  ;;  %5295 = vmatprep.mubr.bf16.mxu0 %v6424_v4 }
 0x1c6   : > { %v1520_v33 = vor.u32 %v1519_v63, %v1516_v51  ;;  %v1542_v17 = vrot.slane %v7543_v22, 3  ;;  %v1545_v2 = vrot.slane %v7544_v48, 4  ;;  %v7546_v23 = vshll.u32 %v6524_v9, 16  ;;  %5324 = vmatpush3.bf16.msra.mxu0 %v5643_v44 }
 0x1c7   : > { %v1550_v40 = vrot.slane %v7545_v6, 3  ;;  %v1563_v32 = vor.u32 %v6528_v62, %v6526_v24  ;;  %v1571_v15 = vor.u32 %v6551_v8, %v6536_v7  ;;  %v7547_v51 = vshrl.u32 %v6562_v53, 16  ;;  %5325 = vmatprep.subr.bf16.mxu0 %v5644_v25  ;;  %v5646_v62 = vld [vmem:[#allocation11 + $0x98] sm:$0xff]  }
 0x1c8   : > { %v6657_v1 = vsel %vm1334_vm0, %v1512_v34, %v1520_v33  ;;  %v1546_v12 = vor.u32 %v1545_v2, %v1542_v17  ;;  %v1553_v36 = vrot.slane %v7546_v23, 4  ;;  %v7548_v39 = vshll.u32 %v6562_v53, 16  ;;  %v5652_v2 = vld [vmem:[#allocation11 + $0x80] sm:$0xff]   ;;  %v5665_v6 = vld [vmem:[#allocation11 + $0x1d8] sm:$0xff]   ;;  %v5669_v23 = vld [vmem:[#allocation11 + $0x1c8] sm:$0xff]  }
 0x1c9   : > { %v1576_v50 = vrot.slane %v7547_v51, 3  ;;  %v7549_v34 = vshrl.u32 %v6577_v43, 16  ;;  %v7550_v56 = vshll.u32 %v6577_v43, 16  ;;  %v1597_v4 = vor.u32 %v6580_v59, %v6572_v61 }
 0x1ca   : > { %v1579_v30 = vrot.slane %v7548_v39, 4  ;;  %v1554_v9 = vor.u32 %v1553_v36, %v1550_v40  ;;  %v1605_v24 = vor.u32 %v1604_v52, %v6591_v38  ;;  %v6678_v7 = vsel %vm1334_vm0, %v1563_v32, %v1571_v15  ;;  %5326 = vmatpush3.bf16.msra.mxu0 %v5644_v25  ;;  %v5647_v38 = vld [vmem:[#allocation11 + $0x90] sm:$0xff]   ;;  %v5663_v25 = vld [vmem:[#allocation11 + $0x1a0] sm:$0xff]   ;;  %v5666_v40 = vld [vmem:[#allocation11 + $0x198] sm:$0xff]  }
 0x1cb   : > { %v1584_v63 = vrot.slane %v7549_v34, 3  ;;  %v1587_v18 = vrot.slane %v7550_v56, 4  ;;  %v1610_v53 = vrot.slane %v1608_v19, 3  ;;  %v1613_v58 = vrot.slane %v1611_v21, 4  ;;  %2065 = vmatmul.mubr.bf16.gmra.mxu1 %v6575_v57  ;;  %5327 = vmatprep.subr.bf16.mxu0 %v5646_v62  ;;  %v5651_v21 = vld [vmem:[#allocation11 + $0x88] sm:$0xff]   ;;  %v5673_v32 = vld [vmem:[#allocation11 + $0x1c0] sm:$0xff]  }
 0x1cc   : > { %v1580_v8 = vor.u32 %v1579_v30, %v1576_v50  ;;  %v6681_v33 = vsel %vm1334_vm0, %v1546_v12, %v1554_v9  ;;  %v6684_v43 = vsel %vm1334_vm0, %v1597_v4, %v1605_v24  ;;  %v1618_v22 = vrot.slane %v1616_v11, 3  ;;  %5296 = vmatmul.mubr.bf16.gmra.mxu0 %v6407_v28  ;;  %2072 = vmatprep.mubr.bf16.mxu1 %v6583_v49  ;;  %v5656_v28 = vld [vmem:[#allocation11 + $0x1f8] sm:$0xff]   ;;  %v5661_v11 = vld [vmem:[#allocation11 + $0x1a8] sm:$0xff]   ;;  %v5667_v12 = vld [vmem:[#allocation11 + $0x1d0] sm:$0xff]  }
 0x1cd   : > { %v1588_v44 = vor.u32 %v1587_v18, %v1584_v63  ;;  %v1614_v17 = vor.u32 %v1613_v58, %v1610_v53  ;;  %v1621_v61 = vrot.slane %v1619_v14, 4  ;;  %5299 = vmatprep.mubr.bf16.mxu0 %v6453_v47  ;;  %v4501_v48 = vcombine.low %v6530_v27, %v6564_v54  ;;  %v5654_v27 = vld [vmem:[#allocation11 + $0x228] sm:$0xff]   ;;  %v5657_v54 = vld [vmem:[#allocation11 + $0x1b8] sm:$0xff]   ;;  %v5662_v14 = vld [vmem:[#allocation11 + $0x1e0] sm:$0xff]  }
 0x1ce   : > { %5328 = vmatpush3.bf16.msra.mxu0 %v5646_v62  ;;  %v4502_v47 = vcombine.low %v6599_v46, %v6627_v45  ;;  %v5655_v45 = vld [vmem:[#allocation11 + $0x220] sm:$0xff]   ;;  %v5660_v46 = vld [vmem:[#allocation11 + $0x1e8] sm:$0xff]   ;;  %v1187_v15 = vld [vmem:[#allocation2 + $0x110] sm:$0x8] }
 0x1cf   : > { %v6687_v59 = vsel %vm1334_vm0, %v1580_v8, %v1588_v44  ;;  %v1622_v52 = vor.u32 %v1621_v61, %v1618_v22  ;;  %5329 = vmatprep.subr.bf16.mxu0 %v5647_v38  ;;  %v5670_v36 = vld [vmem:[#allocation11 + $0x188] sm:$0xff]   ;;  %v5671_v50 = vld [vmem:[#allocation2 + $0x14] sm:$0xff]   ;;  %v5672_v63 = vld [vmem:[#allocation2 + $0x1c] ss:$0 sps:$4 sm:$0x11]  }
 0x1d0   : > { %v2938_v9 = vshll.u32 %v5671_v50, 16  ;;  %v5676_v62 = vld [vmem:[#allocation2 + $0x4] sm:$0xff]   ;;  %v5677_v22 = vld [vmem:[#allocation2 + $0xc] ss:$0 sps:$4 sm:$0x11]   ;;  %v2936_v61 = vshrl.u32 %v5671_v50, 16 }
 0x1d1   : > { %v6694_v19 = vsel %vm1334_vm0, %v1614_v17, %v1622_v52  ;;  %v5678_v53 = vld [vmem:[#allocation2 + $0x24] sm:$0xff]   ;;  %v2926_v17 = vshll.u32 %v5676_v62, 16 }
 0x1d2   : > { %5330 = vmatpush3.bf16.msra.mxu0 %v5647_v38  ;;  %v2940_v8 = vrot.slane %v2938_v9, 1 }
 0x1d3   : > { %2073 = vmatmul.mubr.bf16.gmra.mxu1 %v6522_v10  ;;  %5331 = vmatprep.subr.bf16.mxu0 %v5651_v21 }
 0x1d4   : > { %5300 = vmatmul.mubr.bf16.gmra.mxu0 %v6448_v42  ;;  %2080 = vmatprep.mubr.bf16.mxu1 %v4501_v48  ;;  %v5653_v42 = vld [vmem:[#allocation11 + $0x230] sm:$0xff]   ;;  %v2941_v52 = vor.u32 %v2940_v8, %v2936_v61 }
 0x1d5   : > { %5303 = vmatprep.mubr.bf16.mxu0 %v6489_v20  ;;  %v6714_v20 = vld [vmem:[#allocation2 + $0x118] sm:$0xf] }
 0x1d6   : > { %5332 = vmatpush3.bf16.msra.mxu0 %v5651_v21  ;;  %v4485_v51 = vcombine.low %v6714_v20, %v6714_v20  ;;  %v5679_v21 = vld [vmem:[#allocation2 + $0x2c] ss:$0 sps:$4 sm:$0x11]  }
 0x1d7   : > { %5333 = vmatprep.subr.bf16.mxu0 %v5652_v2 }
 0x1d8   : > { %v1633_v30 = vshrl.u32 %v4485_v51, 16  ;;  %v1636_v34 = vshll.u32 %v4485_v51, 16 }
 0x1da   : > { %5334 = vmatpush3.bf16.msra.mxu0 %v5652_v2  ;;  %v1635_v4 = vrot.slane %v1633_v30, 3  ;;  %v1638_v24 = vrot.slane %v1636_v34, 4  ;;  %v2924_v2 = vshrl.u32 %v5676_v62, 16 }
 0x1db   : > { %2081 = vmatmul.mubr.bf16.gmra.mxu1 %v6583_v49  ;;  %4971 = vmatprep.subr.bf16.mxu0 %v5656_v28  ;;  %v2928_v28 = vrot.slane %v2926_v17, 1 }
 0x1dc   : > { %5304 = vmatmul.mubr.bf16.gmra.mxu0 %v6494_v0  ;;  %2088 = vmatprep.mubr.bf16.mxu1 %v4502_v47  ;;  %v6712_v0 = vld [vmem:[#allocation2 + $0x114] sm:$0xf]  ;;  %v1639_v44 = vor.u32 %v1638_v24, %v1635_v4  ;;  %v5688_v4 = vld [vmem:[#allocation2 + $0x64] sm:$0xff]  }
 0x1dd   : > { %5307 = vmatprep.mubr.bf16.mxu0 %v6575_v57  ;;  %v5658_v57 = vld [vmem:[#allocation11 + $0x1f0] sm:$0xff]  }
 0x1e3   : > { %2089 = vmatmul.mubr.bf16.gmra.mxu1 %v4501_v48 }
 0x1e4   : > { %5308 = vmatmul.mubr.bf16.gmra.mxu0 %v6522_v10  ;;  %2434 = vmatprep.mubr.bf16.mxu1 %v6349_v55  ;;  %v4503_v10 = vcombine.low %v6712_v0, %v6714_v20  ;;  %v2955_v20 = vshll.u32 %v5679_v21, 16 }
 0x1e5   : > { %5311 = vmatprep.mubr.bf16.mxu0 %v6583_v49  ;;  %v5675_v49 = vld [vmem:[#allocation11 + $0x210] sm:$0xff]  }
 0x1eb   : > { %2435 = vmatmul.mubr.bf16.vlgmr.msra.gmra.mxu1 %v6322_v37  ;;  %v5664_v37 = vld [vmem:[#allocation11 + $0x218] sm:$0xff]  }
 0x1ec   : > { %5312 = vmatmul.mubr.bf16.gmra.mxu0 %v4501_v48  ;;  %5368 = vmatpush3.bf16.msra.mxu1 %v6617_v35  ;;  %v5682_v35 = vld [vmem:[#allocation11 + $0x208] sm:$0xff]   ;;  %v2950_v48 = vshll.u32 %v5678_v53, 16 }
 0x1ed   : > { %5315 = vmatprep.mubr.bf16.mxu0 %v4502_v47  ;;  %2442 = vmatprep.mubr.bf16.mxu1 %v6390_v3  ;;  %v2931_v47 = vshll.u32 %v5677_v22, 16 }
 0x1ee   : > { %5369 = vmatprep.subr.bf16.mxu1 %v5653_v42 }
 0x1f0   : > { %5370 = vmatpush3.bf16.msra.mxu1 %v5653_v42 }
 0x1f1   : > { %5371 = vmatprep.subr.bf16.mxu1 %v5654_v27 }
 0x1f3   : > { %2443 = vmatmul.mubr.bf16.gmra.mxu1 %v6349_v55  ;;  %v5659_v55 = vld [vmem:[#allocation11 + $0x1b0] sm:$0xff]  }
 0x1f4   : > { %5316 = vmatmul.mubr.bf16.gmra.mxu0 %v4503_v10  ;;  %2450 = vmatprep.mubr.bf16.mxu1 %v6427_v5  ;;  %v2929_v10 = vor.u32 %v2928_v28, %v2924_v2  ;;  %v2996_v2 = vshrl.u32 %v5688_v4, 16 }
 0x1f5   : > { %5335 = vmatprep.mubr.bf16.mxu0 %v6390_v3  ;;  %5372 = vmatpush3.bf16.msra.mxu1 %v5654_v27  ;;  %v5680_v27 = vld [vmem:[#allocation2 + $0x34] sm:$0xff]  }
 0x1f6   : > { %5373 = vmatprep.subr.bf16.mxu1 %v5655_v45 }
 0x1f9   : > { %5374 = vmatpush3.bf16.msra.mxu1 %v5655_v45  ;;  %v2933_v45 = vrot.slane %v2931_v47, 1 }
 0x1fa   : > { %5375 = vmatprep.subr.bf16.mxu1 %v5664_v37 }
 0x1fb   : > { %2451 = vmatmul.mubr.bf16.gmra.mxu1 %v6390_v3  ;;  %v5687_v3 = vld [vmem:[#allocation11 + $0x200] sm:$0xff]  }
 0x1fc   : > { %5336 = vmatmul.mubr.bf16.vlgmr.msra.gmra.mxu0 %v6427_v5  ;;  %2458 = vmatprep.mubr.bf16.mxu1 %v6473_v41 }
 0x1fd   : > { %5339 = vmatprep.mubr.bf16.mxu0 %v6473_v41  ;;  %4972 = vmatpush3.bf16.msra.mxu0 %v5657_v54 }
 0x1fe   : > { %4973 = vmatprep.subr.bf16.mxu0 %v5658_v57  ;;  %5376 = vmatpush3.bf16.msra.mxu1 %v5664_v37  ;;  %v2948_v37 = vshrl.u32 %v5678_v53, 16  ;;  %v2957_v57 = vrot.slane %v2955_v20, 1 }
 0x1ff   : > { %5377 = vmatprep.subr.bf16.mxu1 %v5675_v49 }
 0x201   : > { %4974 = vmatpush3.bf16.msra.mxu0 %v5659_v55  ;;  %v2962_v55 = vshll.u32 %v5680_v27, 16 }
 0x202   : > { %4975 = vmatprep.subr.bf16.mxu0 %v5660_v46  ;;  %5378 = vmatpush3.bf16.msra.mxu1 %v5675_v49  ;;  %v5681_v49 = vld [vmem:[#allocation2 + $0x3c] ss:$0 sps:$4 sm:$0x11]   ;;  %v2934_v46 = vsel %vm2922_vm1, %v2929_v10, %v2933_v45 }
 0x203   : > { %2459 = vmatmul.mubr.bf16.gmra.mxu1 %v6427_v5  ;;  %5379 = vmatprep.subr.bf16.mxu1 %v5682_v35  ;;  %v5668_v5 = vld [vmem:[#allocation11 + $0x190] sm:$0xff]  }
 0x204   : > { %5340 = vmatmul.mubr.bf16.gmra.mxu0 %v6547_v13  ;;  %2466 = vmatprep.mubr.bf16.mxu1 %v6547_v13 }
 0x205   : > { %5343 = vmatprep.mubr.bf16.mxu0 %v6586_v31  ;;  %4976 = vmatpush3.bf16.msra.mxu0 %v5661_v11  ;;  %v2967_v11 = vshll.u32 %v5681_v49, 16  ;;  %v5692_v49 = vld [vmem:[#allocation2 + $0x84] sm:$0xff]  }
 0x206   : > { %4977 = vmatprep.subr.bf16.mxu0 %v5662_v14  ;;  %5380 = vmatpush3.bf16.msra.mxu1 %v5682_v35  ;;  %v2964_v35 = vrot.slane %v2962_v55, 1  ;;  %v5683_v14 = vld [vmem:[#allocation2 + $0x44] sm:$0xff]  }
 0x207   : > { %5381 = vmatprep.subr.bf16.mxu1 %v5687_v3  ;;  %v2972_v51 = vshrl.u32 %v5683_v14, 16 }
 0x209   : > { %4978 = vmatpush3.bf16.msra.mxu0 %v5663_v25 }
 0x20a   : > { %4979 = vmatprep.subr.bf16.mxu0 %v5665_v6  ;;  %5382 = vmatpush3.bf16.msra.mxu1 %v5687_v3  ;;  %v2960_v3 = vshrl.u32 %v5680_v27, 16  ;;  %v2969_v6 = vrot.slane %v2967_v11, 1 }
 0x20b   : > { %2467 = vmatmul.mubr.bf16.gmra.mxu1 %v6473_v41  ;;  %v5674_v41 = vld [vmem:[#allocation11 + $0x180] sm:$0xff]  }
 0x20c   : > { %5344 = vmatmul.mubr.bf16.gmra.mxu0 %v6602_v16  ;;  %2474 = vmatprep.mubr.bf16.mxu1 %v6586_v31  ;;  %v2965_v25 = vor.u32 %v2964_v35, %v2960_v3  ;;  %v5693_v3 = vld [vmem:[#allocation2 + $0x8c] ss:$0 sps:$4 sm:$0x11]  }
 0x20d   : > { %5347 = vmatprep.mubr.bf16.mxu0 %v6630_v60  ;;  %4980 = vmatpush3.bf16.msra.mxu0 %v5666_v40  ;;  %v5684_v40 = vld [vmem:[#allocation2 + $0x4c] ss:$0 sps:$4 sm:$0x11]  }
 0x20e   : > { %4981 = vmatprep.subr.bf16.mxu0 %v5667_v12  ;;  %v2974_v12 = vshll.u32 %v5683_v14, 16 }
 0x211   : > { %4982 = vmatpush3.bf16.msra.mxu0 %v5668_v5 }
 0x212   : > { %4983 = vmatprep.subr.bf16.mxu0 %v5669_v23 }
 0x213   : > { %2475 = vmatmul.mubr.bf16.gmra.mxu1 %v6547_v13  ;;  %v4484_v13 = vcombine.low %v1187_v15, %v6712_v0  ;;  %v2952_v0 = vrot.slane %v2950_v48, 1  ;;  %v5690_v48 = vld [vmem:[#allocation2 + $0x74] sm:$0xff]  }
 0x214   : > { %5348 = vmatmul.mubr.bf16.gmra.mxu0 %v6642_v29  ;;  %2482 = vmatprep.mubr.bf16.mxu1 %v6602_v16  ;;  %v3010_v20 = vshll.u32 %v5690_v48, 16 }
 0x215   : > { %5351 = vmatprep.mubr.bf16.mxu0 %v6657_v1  ;;  %4984 = vmatpush3.bf16.msra.mxu0 %v5670_v36  ;;  %v1628_v39 = vshll.u32 %v4484_v13, 16  ;;  %v2953_v54 = vor.u32 %v2952_v0, %v2948_v37  ;;  %v2976_v36 = vrot.slane %v2974_v12, 1  ;;  %v5691_v0 = vld [vmem:[#allocation2 + $0x7c] ss:$0 sps:$4 sm:$0x11]  }
 0x216   : > { %4985 = vmatprep.subr.bf16.mxu0 %v5673_v32  ;;  %v2979_v32 = vshll.u32 %v5684_v40, 16 }
 0x217   : > { %v1630_v18 = vrot.slane %v1628_v39, 4 }
 0x218   : > { %v2981_v39 = vrot.slane %v2979_v32, 1  ;;  %v5694_v32 = vld [vmem:[#allocation2 + $0x94] sm:$0xff]  }
 0x219   : > { %4986 = vmatpush3.bf16.msra.mxu0 %v5674_v41  ;;  %v5685_v41 = vld [vmem:[#allocation2 + $0x54] sm:$0xff]  }
 0x21a   : > { %v2986_v30 = vshll.u32 %v5685_v41, 16  ;;  %v2984_v62 = vshrl.u32 %v5685_v41, 16 }
 0x21b   : > { %2483 = vmatmul.mubr.bf16.gmra.mxu1 %v6586_v31  ;;  %v1625_v31 = vshrl.u32 %v4484_v13, 16 }
 0x21c   : > { %5352 = vmatmul.mubr.bf16.gmra.mxu0 %v6650_v26  ;;  %2490 = vmatprep.mubr.bf16.mxu1 %v6630_v60 }
 0x21d   : > { %5355 = vmatprep.mubr.bf16.mxu0 %v6681_v33  ;;  %v1627_v56 = vrot.slane %v1625_v31, 3  ;;  %v2977_v31 = vor.u32 %v2976_v36, %v2972_v51  ;;  %v3027_v36 = vshll.u32 %v5693_v3, 16 }
 0x21f   : > { %v1631_v58 = vor.u32 %v1630_v18, %v1627_v56  ;;  %v6777_v9 = vsel %vm2922_vm1, %v2977_v31, %v2981_v39  ;;  %v2988_v56 = vrot.slane %v2986_v30, 1  ;;  %v3029_v30 = vrot.slane %v3027_v36, 1 }
 0x221   : > { %v2989_v53 = vor.u32 %v2988_v56, %v2984_v62  ;;  %v3034_v56 = vshll.u32 %v5694_v32, 16 }
 0x223   : > { %2491 = vmatmul.mubr.bf16.gmra.mxu1 %v6602_v16  ;;  %v2943_v16 = vshll.u32 %v5672_v63, 16 }
 0x224   : > { %5356 = vmatmul.mubr.bf16.gmra.mxu0 %v6678_v7  ;;  %2498 = vmatprep.mubr.bf16.mxu1 %v6642_v29 }
 0x225   : > { %5359 = vmatprep.mubr.bf16.mxu0 %v6687_v59  ;;  %v2945_v38 = vrot.slane %v2943_v16, 1 }
 0x227   : > { %v2946_v42 = vsel %vm2922_vm1, %v2941_v52, %v2945_v38 }
 0x22b   : > { %2499 = vmatmul.mubr.bf16.gmra.mxu1 %v6630_v60  ;;  %v1640_v60 = vsel %vm1334_vm0, %v1631_v58, %v1639_v44  ;;  %v5689_v58 = vld [vmem:[#allocation2 + $0x6c] ss:$0 sps:$4 sm:$0x11]   ;;  %v2998_v44 = vshll.u32 %v5688_v4, 16 }
 0x22c   : > { %5360 = vmatmul.mubr.bf16.gmra.mxu0 %v6684_v43  ;;  %2506 = vmatprep.mubr.bf16.mxu1 %v6657_v1  ;;  %v3003_v21 = vshll.u32 %v5689_v58, 16 }
 0x22d   : > { %5363 = vmatprep.mubr.bf16.mxu0 %v6694_v19  ;;  %v3000_v52 = vrot.slane %v2998_v44, 1  ;;  %v5696_v44 = vld [vmem:[#allocation2 + $0xa4] sm:$0xff]  }
 0x233   : > { %2507 = vmatmul.mubr.bf16.gmra.mxu1 %v6642_v29  ;;  %v6760_v29 = vsel %vm2922_vm1, %v2953_v54, %v2957_v57  ;;  %v3012_v54 = vrot.slane %v3010_v20, 1  ;;  %v3015_v57 = vshll.u32 %v5691_v0, 16 }
 0x234   : > { %5364 = vmatmul.mubr.bf16.gmra.mxu0 %v1640_v60  ;;  %2514 = vmatprep.mubr.bf16.mxu1 %v6650_v26 }
 0x235   : > { %3382 = vmatprep.mubr.bf16.mxu0 %v2946_v42 }
 0x23b   : > { %2515 = vmatmul.mubr.bf16.gmra.mxu1 %v6657_v1  ;;  %v6766_v1 = vsel %vm2922_vm1, %v2965_v25, %v2969_v6  ;;  %v3022_v25 = vshll.u32 %v5692_v49, 16 }
 0x23c   : > { %3383 = vmatmul.mubr.bf16.vlgmr.msra.gmra.mxu0 %v2934_v46  ;;  %2522 = vmatprep.mubr.bf16.mxu1 %v6681_v33  ;;  %v3008_v46 = vshrl.u32 %v5690_v48, 16 }
 0x23d   : > { %3390 = vmatprep.mubr.bf16.mxu0 %v6760_v29 }
 0x23e   : > { %v3013_v14 = vor.u32 %v3012_v54, %v3008_v46 }
 0x242   : > { %v4715_v5 = vpop.f32.mrf.mxu0 }
 0x243   : > { %2523 = vmatmul.mubr.bf16.gmra.mxu1 %v6650_v26  ;;  %v5686_v26 = vld [vmem:[#allocation2 + $0x5c] ss:$0 sps:$4 sm:$0x11]  }
 0x244   : > { %3391 = vmatmul.mubr.bf16.gmra.mxu0 %v2946_v42  ;;  %2530 = vmatprep.mubr.bf16.mxu1 %v6678_v7  ;;  %v4716_v23 = vpop.f32.mrf.mxu0  ;;  %v2991_v18 = vshll.u32 %v5686_v26, 16  ;;  %v3001_v42 = vor.u32 %v3000_v52, %v2996_v2 }
 0x245   : > { %3398 = vmatprep.mubr.bf16.mxu0 %v6766_v1  ;;  %v6769_v15 = vadd.f32 %v4716_v23, %v4715_v5  ;;  %v3024_v23 = vrot.slane %v3022_v25, 1 }
 0x246   : > { %v4718_v13 = vpop.f32.mrf.mxu0 }
 0x248   : > { %v4719_v50 = vpop.f32.mrf.mxu0 }
 0x249   : > { %v6771_v34 = vadd.f32 %v4719_v50, %v4718_v13  ;;  %v3020_v50 = vshrl.u32 %v5692_v49, 16  ;;  %v3044_v49 = vshrl.u32 %v5696_v44, 16 }
 0x24b   : > { %2531 = vmatmul.mubr.bf16.gmra.mxu1 %v6681_v33  ;;  %v2993_v33 = vrot.slane %v2991_v18, 1  ;;  %v3025_v26 = vor.u32 %v3024_v23, %v3020_v50  ;;  %v5699_v23 = vld [vmem:[#allocation2 + $0xbc] ss:$0 sps:$4 sm:$0x11]  }
 0x24c   : > { %v4721_v63 = vpop.f32.mrf.mxu0  ;;  %3399 = vmatmul.mubr.bf16.gmra.mxu0 %v6760_v29  ;;  %2538 = vmatprep.mubr.bf16.mxu1 %v6687_v59 }
 0x24d   : > { %3406 = vmatprep.mubr.bf16.mxu0 %v6777_v9  ;;  %v6788_v38 = vsel %vm2922_vm1, %v2989_v53, %v2993_v33  ;;  %v3030_v53 = vsel %vm2922_vm1, %v3025_v26, %v3029_v30  ;;  %v3036_v33 = vrot.slane %v3034_v56, 1  ;;  %v3063_v56 = vshll.u32 %v5699_v23, 16 }
 0x24e   : > { %v4722_v24 = vpop.f32.mrf.mxu0 }
 0x24f   : > { %v6780_v16 = vadd.f32 %v4722_v24, %v4721_v63  ;;  %v5695_v63 = vld [vmem:[#allocation2 + $0x9c] ss:$0 sps:$4 sm:$0x11]  }
 0x250   : > { %v4724_v8 = vpop.f32.mrf.mxu0  ;;  %v3039_v58 = vshll.u32 %v5695_v63, 16 }
 0x252   : > { %v4725_v22 = vpop.f32.mrf.mxu0 }
 0x253   : > { %v6782_v17 = vadd.f32 %v4725_v22, %v4724_v8  ;;  %2539 = vmatmul.mubr.bf16.gmra.mxu1 %v6678_v7  ;;  %v3005_v7 = vrot.slane %v3003_v21, 1  ;;  %v3032_v21 = vshrl.u32 %v5694_v32, 16 }
 0x254   : > { %v4727_v61 = vpop.f32.mrf.mxu0  ;;  %3407 = vmatmul.mubr.bf16.gmra.mxu0 %v6766_v1  ;;  %2546 = vmatprep.mubr.bf16.mxu1 %v6684_v43 }
 0x255   : > { %3414 = vmatprep.mubr.bf16.mxu0 %v6788_v38  ;;  %v6799_v37 = vsel %vm2922_vm1, %v3001_v42, %v3005_v7  ;;  %v3037_v2 = vor.u32 %v3036_v33, %v3032_v21  ;;  %v5697_v42 = vld [vmem:[#allocation2 + $0xac] ss:$0 sps:$4 sm:$0x11]   ;;  %v3046_v7 = vshll.u32 %v5696_v44, 16 }
 0x256   : > { %v4728_v60 = vpop.f32.mrf.mxu0  ;;  %v3051_v46 = vshll.u32 %v5697_v42, 16  ;;  %v5702_v42 = vld [vmem:[#allocation2 + $0xd4] sm:$0xff]  }
 0x257   : > { %v6791_v28 = vadd.f32 %v4728_v60, %v4727_v61 }
 0x258   : > { %v4730_v47 = vpop.f32.mrf.mxu0 }
 0x25a   : > { %v4731_v27 = vpop.f32.mrf.mxu0 }
 0x25b   : > { %v6793_v10 = vadd.f32 %v4731_v27, %v4730_v47  ;;  %2547 = vmatmul.mubr.bf16.gmra.mxu1 %v6687_v59  ;;  %v3017_v59 = vrot.slane %v3015_v57, 1  ;;  %v3041_v47 = vrot.slane %v3039_v58, 1 }
 0x25c   : > { %v4733_v45 = vpop.f32.mrf.mxu0  ;;  %3415 = vmatmul.mubr.bf16.gmra.mxu0 %v6777_v9  ;;  %2554 = vmatprep.mubr.bf16.mxu1 %v6694_v19 }
 0x25d   : > { %3422 = vmatprep.mubr.bf16.mxu0 %v6799_v37  ;;  %v6809_v5 = vsel %vm2922_vm1, %v3013_v14, %v3017_v59  ;;  %v3042_v57 = vsel %vm2922_vm1, %v3037_v2, %v3041_v47 }
 0x25e   : > { %v4734_v55 = vpop.f32.mrf.mxu0 }
 0x25f   : > { %v6802_v35 = vadd.f32 %v4734_v55, %v4733_v45  ;;  %v3048_v55 = vrot.slane %v3046_v7, 1 }
 0x260   : > { %v4736_v11 = vpop.f32.mrf.mxu0 }
 0x262   : > { %v4737_v6 = vpop.f32.mrf.mxu0 }
 0x263   : > { %v6804_v40 = vadd.f32 %v4737_v6, %v4736_v11  ;;  %v4757_v19 = vpop.f32.mrf.mxu1  ;;  %2555 = vmatmul.mubr.bf16.gmra.mxu1 %v6684_v43  ;;  %v5698_v11 = vld [vmem:[#allocation2 + $0xb4] sm:$0xff]  }
 0x264   : > { %v4739_v12 = vpop.f32.mrf.mxu0  ;;  %3423 = vmatmul.mubr.bf16.gmra.mxu0 %v6788_v38  ;;  %5383 = vmatprep.mubr.bf16.mxu1 %v6760_v29  ;;  %v3058_v36 = vshll.u32 %v5698_v11, 16  ;;  %v3056_v30 = vshrl.u32 %v5698_v11, 16 }
 0x265   : > { %3430 = vmatprep.mubr.bf16.mxu0 %v6809_v5  ;;  %v4758_v41 = vpop.f32.mrf.mxu1 }
 0x266   : > { %v4740_v13 = vpop.f32.mrf.mxu0  ;;  %v6813_v51 = vadd.f32 %v4758_v41, %v4757_v19  ;;  %v3049_v19 = vor.u32 %v3048_v55, %v3044_v49  ;;  %v3060_v63 = vrot.slane %v3058_v36, 1  ;;  %v5705_v36 = vld [vmem:[#allocation2 + $0xec] ss:$0 sps:$4 sm:$0x11]  }
 0x267   : > { %v6815_v31 = vadd.f32 %v4740_v13, %v4739_v12  ;;  %v4760_v43 = vpop.f32.mrf.mxu1  ;;  %v3053_v12 = vrot.slane %v3051_v46, 1  ;;  %v5715_v46 = vld [vmem:[#allocation12 + $0x30] sm:$0xff]  }
 0x268   : > { %v4742_v39 = vpop.f32.mrf.mxu0  ;;  %v3061_v21 = vor.u32 %v3060_v63, %v3056_v30 }
 0x269   : > { %v4761_v18 = vpop.f32.mrf.mxu1  ;;  %v6847_v26 = vsel %vm2922_vm1, %v3049_v19, %v3053_v12 }
 0x26a   : > { %v4743_v29 = vpop.f32.mrf.mxu0  ;;  %v6817_v4 = vadd.f32 %v4761_v18, %v4760_v43  ;;  %v5700_v43 = vld [vmem:[#allocation2 + $0xc4] sm:$0xff]   ;;  %v5712_v18 = vld [vmem:[#allocation12 + $0x78] sm:$0xff]  }
 0x26b   : > { %v6819_v24 = vadd.f32 %v4743_v29, %v4742_v39  ;;  %v4763_v62 = vpop.f32.mrf.mxu1  ;;  %5384 = vmatmul.mubr.bf16.vlgmr.msra.gmra.mxu1 %v6766_v1  ;;  %v5713_v29 = vld [vmem:[#allocation12 + $0x38] sm:$0xff]   ;;  %5107 = vmatprep.subr.bf16.mxu1 %v5712_v18 }
 0x26c   : > { %v4745_v8 = vpop.f32.mrf.mxu0  ;;  %3431 = vmatmul.mubr.bf16.gmra.mxu0 %v6799_v37  ;;  %5387 = vmatprep.mubr.bf16.mxu1 %v6777_v9 }
 0x26d   : > { %3438 = vmatprep.mubr.bf16.mxu0 %v3030_v53  ;;  %v4764_v22 = vpop.f32.mrf.mxu1  ;;  %5108 = vmatpush3.bf16.msra.mxu1 %v5713_v29 }
 0x26e   : > { %v4746_v61 = vpop.f32.mrf.mxu0  ;;  %v6825_v52 = vadd.f32 %v4764_v22, %v4763_v62  ;;  %v3070_v22 = vshll.u32 %v5700_v43, 16 }
 0x26f   : > { %v6827_v48 = vadd.f32 %v4746_v61, %v4745_v8  ;;  %v4766_v60 = vpop.f32.mrf.mxu1 }
 0x270   : > { %v4748_v1 = vpop.f32.mrf.mxu0 }
 0x271   : > { %v4767_v0 = vpop.f32.mrf.mxu1 }
 0x272   : > { %v4749_v20 = vpop.f32.mrf.mxu0  ;;  %v6829_v9 = vadd.f32 %v4767_v0, %v4766_v60  ;;  %v3065_v60 = vrot.slane %v3063_v56, 1  ;;  %v3068_v0 = vshrl.u32 %v5700_v43, 16  ;;  %v3080_v43 = vshrl.u32 %v5702_v42, 16 }
 0x273   : > { %v6831_v27 = vadd.f32 %v4749_v20, %v4748_v1  ;;  %v4769_v45 = vpop.f32.mrf.mxu1  ;;  %5388 = vmatmul.mubr.bf16.gmra.mxu1 %v6788_v38  ;;  %v3072_v20 = vrot.slane %v3070_v22, 1 }
 0x274   : > { %v4751_v54 = vpop.f32.mrf.mxu0  ;;  %3439 = vmatmul.mubr.bf16.gmra.mxu0 %v6809_v5  ;;  %5391 = vmatprep.mubr.bf16.mxu1 %v6799_v37  ;;  %v6867_v55 = vsel %vm2922_vm1, %v3061_v21, %v3065_v60  ;;  %v5707_v21 = vld [vmem:[#allocation2 + $0xfc] ss:$0 sps:$4 sm:$0x11]  }
 0x275   : > { %3446 = vmatprep.mubr.bf16.mxu0 %v3042_v57  ;;  %v4770_v14 = vpop.f32.mrf.mxu1  ;;  %v3073_v12 = vor.u32 %v3072_v20, %v3068_v0  ;;  %v5716_v0 = vld [vmem:[#allocation12 + $0x68] sm:$0xff]  }
 0x276   : > { %v4752_v59 = vpop.f32.mrf.mxu0  ;;  %v6837_v3 = vadd.f32 %v4770_v14, %v4769_v45  ;;  %v5717_v20 = vld [vmem:[#allocation12 + $0x28] sm:$0xff]  }
 0x277   : > { %v6839_v25 = vadd.f32 %v4752_v59, %v4751_v54  ;;  %v4772_v6 = vpop.f32.mrf.mxu1  ;;  %v5704_v54 = vld [vmem:[#allocation2 + $0xe4] sm:$0xff]  }
 0x278   : > { %v4754_v38 = vpop.f32.mrf.mxu0  ;;  %v3092_v18 = vshrl.u32 %v5704_v54, 16 }
 0x279   : > { %v4773_v32 = vpop.f32.mrf.mxu1 }
 0x27a   : > { %v4755_v41 = vpop.f32.mrf.mxu0  ;;  %v6841_v37 = vadd.f32 %v4773_v32, %v4772_v6  ;;  %v5703_v6 = vld [vmem:[#allocation2 + $0xdc] ss:$0 sps:$4 sm:$0x11]   ;;  %v3094_v32 = vshll.u32 %v5704_v54, 16 }
 0x27b   : > { %v6843_v13 = vadd.f32 %v4755_v41, %v4754_v38  ;;  %v4775_v50 = vpop.f32.mrf.mxu1  ;;  %5392 = vmatmul.mubr.bf16.gmra.mxu1 %v6809_v5  ;;  %v3082_v38 = vshll.u32 %v5702_v42, 16  ;;  %v3087_v56 = vshll.u32 %v5703_v6, 16 }
 0x27c   : > { %v5289_v39 = vpop.f32.mrf.mxu0  ;;  %3447 = vmatmul.mubr.bf16.gmra.mxu0 %v3030_v53  ;;  %5395 = vmatprep.mubr.bf16.mxu1 %v3030_v53  ;;  %v5701_v53 = vld [vmem:[#allocation2 + $0xcc] ss:$0 sps:$4 sm:$0x11]  }
 0x27d   : > { %v6850_v62 = vadd.f32 %v5289_v39, %v6780_v16  ;;  %3454 = vmatprep.mubr.bf16.mxu0 %v6847_v26  ;;  %v4776_v8 = vpop.f32.mrf.mxu1  ;;  %v3075_v45 = vshll.u32 %v5701_v53, 16  ;;  %v3084_v63 = vrot.slane %v3082_v38, 1  ;;  %v5708_v53 = vld [vmem:[#allocation2 + $0x104] sm:$0xff]   ;;  %v3089_v42 = vrot.slane %v3087_v56, 1 }
 0x27e   : > { %v6853_v33 = vadd.f32 %v4776_v8, %v4775_v50  ;;  %v2131_v5 = vpop.f32.mrf.mxu0 }
 0x27f   : > { %v6856_v58 = vadd.f32 %v6769_v15, %v2131_v5  ;;  %v4778_v44 = vpop.f32.mrf.mxu1  ;;  %v3077_v23 = vrot.slane %v3075_v45, 1 }
 0x280   : > { %v5290_v61 = vpop.f32.mrf.mxu0 }
 0x281   : > { %v6859_v16 = vadd.f32 %v5290_v61, %v6782_v17  ;;  %v4779_v1 = vpop.f32.mrf.mxu1  ;;  %v5714_v17 = vld [vmem:[#allocation12 + $0x70] sm:$0xff]   ;;  %v6889_v5 = vsel %vm2922_vm1, %v3073_v12, %v3077_v23  ;;  %v3111_v23 = vshll.u32 %v5707_v21, 16 }
 0x282   : > { %v6861_v2 = vadd.f32 %v4779_v1, %v4778_v44  ;;  %v2134_v47 = vpop.f32.mrf.mxu0  ;;  %5109 = vmatprep.subr.bf16.mxu1 %v5714_v17  ;;  %v3099_v44 = vshll.u32 %v5705_v36, 16  ;;  %v3118_v17 = vshll.u32 %v5708_v53, 16  ;;  %v3116_v36 = vshrl.u32 %v5708_v53, 16 }
 0x283   : > { %v6864_v7 = vadd.f32 %v6771_v34, %v2134_v47  ;;  %v4781_v15 = vpop.f32.mrf.mxu1  ;;  %5396 = vmatmul.mubr.bf16.gmra.mxu1 %v3042_v57  ;;  %v3085_v47 = vor.u32 %v3084_v63, %v3080_v43  ;;  %v5711_v63 = vld [vmem:[#allocation2 + $0x11c] ss:$0 sps:$4 sm:$0x11]  }
 0x284   : > { %v5293_v49 = vpop.f32.mrf.mxu0  ;;  %3455 = vmatmul.mubr.bf16.gmra.mxu0 %v3042_v57  ;;  %5399 = vmatprep.mubr.bf16.mxu1 %v6847_v26 }
 0x285   : > { %v6871_v11 = vadd.f32 %v5293_v49, %v6802_v35  ;;  %3462 = vmatprep.mubr.bf16.mxu0 %v6867_v55  ;;  %v4782_v34 = vpop.f32.mrf.mxu1  ;;  %5110 = vmatpush3.bf16.msra.mxu1 %v5715_v46  ;;  %v5709_v49 = vld [vmem:[#allocation2 + $0x10c] ss:$0 sps:$4 sm:$0x11]  }
 0x286   : > { %v6874_v14 = vadd.f32 %v4782_v34, %v4781_v15  ;;  %v2147_v59 = vpop.f32.mrf.mxu0  ;;  %v5710_v34 = vld [vmem:[#allocation2 + $0x114] sm:$0xff]   ;;  %5111 = vmatprep.subr.bf16.mxu1 %v5716_v0  ;;  %v3123_v43 = vshll.u32 %v5709_v49, 16 }
 0x287   : > { %v6877_v57 = vadd.f32 %v6791_v28, %v2147_v59  ;;  %v4784_v19 = vpop.f32.mrf.mxu1  ;;  %v5706_v28 = vld [vmem:[#allocation2 + $0xf4] sm:$0xff]   ;;  %v3130_v56 = vshll.u32 %v5710_v34, 16 }
 0x288   : > { %v5294_v35 = vpop.f32.mrf.mxu0  ;;  %v3106_v15 = vshll.u32 %v5706_v28, 16  ;;  %v3104_v38 = vshrl.u32 %v5706_v28, 16  ;;  %v5719_v28 = vld [vmem:[#allocation12 + $0x20] sm:$0xff]  }
 0x289   : > { %v6880_v41 = vadd.f32 %v5294_v35, %v6804_v40  ;;  %v4785_v50 = vpop.f32.mrf.mxu1  ;;  %v3096_v40 = vrot.slane %v3094_v32, 1  ;;  %5112 = vmatpush3.bf16.msra.mxu1 %v5717_v20 }
 0x28a   : > { %v6882_v39 = vadd.f32 %v4785_v50, %v4784_v19  ;;  %v2150_v30 = vpop.f32.mrf.mxu0  ;;  %v3108_v12 = vrot.slane %v3106_v15, 1  ;;  %v3120_v50 = vrot.slane %v3118_v17, 1  ;;  %v3135_v15 = vshll.u32 %v5711_v63, 16 }
 0x28b   : > { %v6885_v29 = vadd.f32 %v6793_v10, %v2150_v30  ;;  %v4787_v8 = vpop.f32.mrf.mxu1  ;;  %5400 = vmatmul.mubr.bf16.gmra.mxu1 %v6867_v55  ;;  %v3097_v54 = vor.u32 %v3096_v40, %v3092_v18  ;;  %v5718_v18 = vld [vmem:[#allocation12 + $0x60] sm:$0xff]  }
 0x28c   : > { %v5297_v22 = vpop.f32.mrf.mxu0  ;;  %3463 = vmatmul.mubr.bf16.gmra.mxu0 %v6847_v26  ;;  %5403 = vmatprep.mubr.bf16.mxu1 %v6889_v5  ;;  %v3109_v53 = vor.u32 %v3108_v12, %v3104_v38  ;;  %v3121_v21 = vor.u32 %v3120_v50, %v3116_v36  ;;  %v5721_v36 = vld [vmem:[#allocation12 + $0x18] sm:$0xff]  }
 0x28d   : > { %v6894_v61 = vadd.f32 %v5297_v22, %v6827_v48  ;;  %3470 = vmatprep.mubr.bf16.mxu0 %v6889_v5  ;;  %v4788_v10 = vpop.f32.mrf.mxu1  ;;  %v3101_v48 = vrot.slane %v3099_v44, 1  ;;  %v3113_v22 = vrot.slane %v3111_v23, 1  ;;  %5113 = vmatprep.subr.bf16.mxu1 %v5718_v18  ;;  %v5720_v23 = vld [vmem:[#allocation12 + $0x58] sm:$0xff]  }
 0x28e   : > { %v6897_v60 = vadd.f32 %v4788_v10, %v4787_v8  ;;  %v2163_v1 = vpop.f32.mrf.mxu0  ;;  %5114 = vmatpush3.bf16.msra.mxu1 %v5719_v28 }
 0x28f   : > { %v6900_v45 = vadd.f32 %v6815_v31, %v2163_v1  ;;  %v6902_v26 = vpop.f32.mrf.mxu1  ;;  %v6910_v31 = vsel %vm2922_vm1, %v3085_v47, %v3089_v42  ;;  %v3125_v1 = vrot.slane %v3123_v43, 1  ;;  %v3132_v42 = vrot.slane %v3130_v56, 1  ;;  %5115 = vmatprep.subr.bf16.mxu1 %v5720_v23 }
 0x290   : > { %v5298_v46 = vpop.f32.mrf.mxu0 }
 0x291   : > { %v6905_v59 = vadd.f32 %v5298_v46, %v6831_v27  ;;  %v6907_v6 = vpop.f32.mrf.mxu1  ;;  %v6917_v27 = vsel %vm2922_vm1, %v3097_v54, %v3101_v48  ;;  %v6936_v48 = vsel %vm2922_vm1, %v3109_v53, %v3113_v22  ;;  %v3126_v17 = vsel %vm2922_vm1, %v3121_v21, %v3125_v1 }
 0x292   : > { %v2166_v19 = vpop.f32.mrf.mxu0  ;;  %5116 = vmatpush3.bf16.msra.mxu1 %v5721_v36  ;;  %v5724_v36 = vld [vmem:[#allocation12 + $0x48] sm:$0xff]  }
 0x293   : > { %v6913_v32 = vadd.f32 %v6819_v24, %v2166_v19  ;;  %v4793_v35 = vpop.f32.mrf.mxu1  ;;  %5404 = vmatmul.mubr.bf16.gmra.mxu1 %v6910_v31 }
 0x294   : > { %v5301_v30 = vpop.f32.mrf.mxu0  ;;  %3471 = vmatmul.mubr.bf16.gmra.mxu0 %v6867_v55  ;;  %5407 = vmatprep.mubr.bf16.mxu1 %v6917_v27 }
 0x295   : > { %v6922_v24 = vadd.f32 %v5301_v30, %v6813_v51  ;;  %3478 = vmatprep.mubr.bf16.mxu0 %v6910_v31  ;;  %v4794_v8 = vpop.f32.mrf.mxu1  ;;  %v3128_v51 = vshrl.u32 %v5710_v34, 16 }
 0x296   : > { %v6925_v40 = vadd.f32 %v4794_v8, %v4793_v35  ;;  %v2179_v44 = vpop.f32.mrf.mxu0  ;;  %v5723_v8 = vld [vmem:[#allocation12 + $0x10] sm:$0xff]  }
 0x297   : > { %v6928_v55 = vadd.f32 %v6839_v25, %v2179_v44  ;;  %v6930_v10 = vpop.f32.mrf.mxu1  ;;  %v3133_v34 = vor.u32 %v3132_v42, %v3128_v51 }
 0x298   : > { %v5302_v47 = vpop.f32.mrf.mxu0 }
 0x299   : > { %v6933_v0 = vadd.f32 %v5302_v47, %v6817_v4  ;;  %v4797_v20 = vpop.f32.mrf.mxu1  ;;  %v3137_v4 = vrot.slane %v3135_v15, 1 }
 0x29a   : > { %v2182_v54 = vpop.f32.mrf.mxu0 }
 0x29b   : > { %v6939_v25 = vadd.f32 %v6843_v13, %v2182_v54  ;;  %v4799_v49 = vpop.f32.mrf.mxu1  ;;  %5408 = vmatmul.mubr.bf16.gmra.mxu1 %v6936_v48  ;;  %v3138_v43 = vsel %vm2922_vm1, %v3133_v34, %v3137_v4  ;;  %v4798_v34 = vadd.f32 %v4797_v20, %v6930_v10 }
 0x29c   : > { %v5305_v46 = vpop.f32.mrf.mxu0  ;;  %3479 = vmatmul.mubr.bf16.gmra.mxu0 %v6889_v5  ;;  %5411 = vmatprep.mubr.bf16.mxu1 %v3126_v17 }
 0x29d   : > { %v6945_v38 = vadd.f32 %v5305_v46, %v6837_v3  ;;  %3486 = vmatprep.mubr.bf16.mxu0 %v6917_v27  ;;  %v4800_v19 = vpop.f32.mrf.mxu1 }
 0x29e   : > { %v6948_v12 = vadd.f32 %v4800_v19, %v4799_v49  ;;  %v2195_v13 = vpop.f32.mrf.mxu0 }
 0x29f   : > { %v6951_v35 = vadd.f32 %v6825_v52, %v2195_v13  ;;  %v6953_v50 = vpop.f32.mrf.mxu1  ;;  %v5722_v52 = vld [vmem:[#allocation12 + $0x50] sm:$0xff]   ;;  %v4792_v13 = vadd.f32 %v6907_v6, %v6902_v26 }
 0x2a0   : > { %v5306_v5 = vpop.f32.mrf.mxu0  ;;  %5117 = vmatprep.subr.bf16.mxu1 %v5722_v52 }
 0x2a1   : > { %v6957_v3 = vadd.f32 %v5306_v5, %v6841_v37  ;;  %v4803_v30 = vpop.f32.mrf.mxu1  ;;  %5118 = vmatpush3.bf16.msra.mxu1 %v5723_v8  ;;  %v5725_v5 = vld [vmem:[#allocation12 + $0x8] sm:$0xff]  }
 0x2a2   : > { %v2198_v63 = vpop.f32.mrf.mxu0  ;;  %5119 = vmatprep.subr.bf16.mxu1 %v5724_v36 }
 0x2a3   : > { %v6960_v56 = vadd.f32 %v6829_v9, %v2198_v63  ;;  %v4805_v18 = vpop.f32.mrf.mxu1  ;;  %5412 = vmatmul.mubr.bf16.gmra.mxu1 %v3138_v43 }
 0x2a4   : > { %v5309_v28 = vpop.f32.mrf.mxu0  ;;  %3487 = vmatmul.mubr.bf16.gmra.mxu0 %v6910_v31 }
 0x2a5   : > { %v6964_v44 = vadd.f32 %v5309_v28, %v6874_v14  ;;  %3494 = vmatprep.mubr.bf16.mxu0 %v6936_v48  ;;  %v4806_v37 = vpop.f32.mrf.mxu1  ;;  %5120 = vmatpush3.bf16.msra.mxu1 %v5725_v5 }
 0x2a6   : > { %v4807_v53 = vadd.f32 %v4806_v37, %v4805_v18  ;;  %v2211_v22 = vpop.f32.mrf.mxu0 }
 0x2a7   : > { %v6968_v21 = vadd.f32 %v6853_v33, %v2211_v22  ;;  %v4808_v9 = vpop.f32.mrf.mxu1  ;;  %v4804_v22 = vadd.f32 %v4803_v30, %v6953_v50 }
 0x2a8   : > { %v5310_v1 = vpop.f32.mrf.mxu0 }
 0x2a9   : > { %v6971_v47 = vadd.f32 %v5310_v1, %v6882_v39  ;;  %v4809_v31 = vpop.f32.mrf.mxu1 }
 0x2aa   : > { %v2214_v51 = vpop.f32.mrf.mxu0  ;;  %v4810_v18 = vadd.f32 %v4809_v31, %v4808_v9 }
 0x2ab   : > { %v6974_v14 = vadd.f32 %v6861_v2, %v2214_v51  ;;  %v4851_v42 = vpop.f32.mrf.mxu1  ;;  %v5726_v51 = vld [vmem:[#allocation12 + $0x40] sm:$0xff]  }
 0x2ac   : > { %v5313_v15 = vpop.f32.mrf.mxu0  ;;  %3495 = vmatmul.mubr.bf16.gmra.mxu0 %v6917_v27  ;;  %5121 = vmatprep.subr.bf16.mxu1 %v5726_v51 }
 0x2ad   : > { %v6978_v54 = vadd.f32 %v5313_v15, %v6925_v40  ;;  %3502 = vmatprep.mubr.bf16.mxu0 %v3126_v17  ;;  %v4852_v33 = vpop.f32.mrf.mxu1 }
 0x2ae   : > { %v2227_v49 = vpop.f32.mrf.mxu0  ;;  %v4853_v46 = vadd.f32 %v4852_v33, %v4851_v42  ;;  %v5727_v42 = vld [vmem:[#allocation12] sm:$0xff]  }
 0x2af   : > { %v6982_v39 = vadd.f32 %v6897_v60, %v2227_v49  ;;  %v4854_v4 = vpop.f32.mrf.mxu1  ;;  %5122 = vmatpush3.bf16.msra.mxu1 %v5727_v42 }
 0x2b0   : > { %v5314_v19 = vpop.f32.mrf.mxu0  ;;  %v2437_v2 = vadd.f32 %v4853_v46, %v6856_v58 }
 0x2b1   : > { %v6987_v27 = vadd.f32 %v5314_v19, %v4798_v34  ;;  %v4855_v40 = vpop.f32.mrf.mxu1 }
 0x2b2   : > { %v2230_v23 = vpop.f32.mrf.mxu0  ;;  %v4856_v17 = vadd.f32 %v4855_v40, %v4854_v4 }
 0x2b3   : > { %v6989_v43 = vadd.f32 %v4792_v13, %v2230_v23  ;;  %v4857_v10 = vpop.f32.mrf.mxu1 }
 0x2b4   : > { %v5317_v20 = vpop.f32.mrf.mxu0  ;;  %3503 = vmatmul.mubr.bf16.gmra.mxu0 %v6936_v48  ;;  %v2440_v60 = vadd.f32 %v4856_v17, %v6864_v7  ;;  %v3792_v17 = vld [vmem:[%s6250_s19 + $0x8] sm:$0xff] }
 0x2b5   : > { %v6993_v58 = vadd.f32 %v5317_v20, %v4807_v53  ;;  %v4858_v63 = vpop.f32.mrf.mxu1 }
 0x2b6   : > { %v2243_v26 = vpop.f32.mrf.mxu0  ;;  %v4859_v6 = vadd.f32 %v4858_v63, %v4857_v10 }
 0x2b7   : > { %v6996_v28 = vadd.f32 %v6948_v12, %v2243_v26  ;;  %v4860_v52 = vpop.f32.mrf.mxu1 }
 0x2b8   : > { %v5318_v8 = vpop.f32.mrf.mxu0  ;;  %v2445_v37 = vadd.f32 %v4859_v6, %v6850_v62 }
 0x2b9   : > { %v7000_v48 = vadd.f32 %v5318_v8, %v4810_v18  ;;  %v4861_v7 = vpop.f32.mrf.mxu1 }
 0x2ba   : > { %v2246_v1 = vpop.f32.mrf.mxu0  ;;  %v4862_v53 = vadd.f32 %v4861_v7, %v4860_v52 }
 0x2bb   : > { %v7002_v15 = vadd.f32 %v4804_v22, %v2246_v1  ;;  %v4863_v33 = vpop.f32.mrf.mxu1 }
 0x2bc   : > { %v5337_v9 = vpop.f32.mrf.mxu0  ;;  %v2448_v12 = vadd.f32 %v4862_v53, %v6859_v16  ;;  %v3791_v16 = vld [vmem:[%s6250_s19] sm:$0xff] }
 0x2bd   : > { %v7005_v31 = vadd.f32 %v5337_v9, %v2445_v37  ;;  %v4864_v62 = vpop.f32.mrf.mxu1  ;;  %v3823_v10 = vpack.c.bf16 %v3792_v17, %v3791_v16 }
 0x2be   : > { %v4865_v50 = vadd.f32 %v4864_v62, %v4863_v33  ;;  %v2597_v30 = vpop.f32.mrf.mxu0 }
 0x2bf   : > { %v7007_v49 = vadd.f32 %v2597_v30, %v2437_v2  ;;  %v4866_v46 = vpop.f32.mrf.mxu1  ;;  %4006 = vmatprep.mubr.bf16.mxu1 %v3823_v10 }
 0x2c0   : > { %v5338_v34 = vpop.f32.mrf.mxu0  ;;  %v2453_v4 = vadd.f32 %v4865_v50, %v6877_v57 }
 0x2c1   : > { %v7010_v19 = vadd.f32 %v5338_v34, %v2448_v12  ;;  %v4867_v13 = vpop.f32.mrf.mxu1 }
 0x2c2   : > { %v4868_v40 = vadd.f32 %v4867_v13, %v4866_v46  ;;  %v2600_v23 = vpop.f32.mrf.mxu0 }
 0x2c3   : > { %v7014_v36 = vadd.f32 %v2600_v23, %v2440_v60  ;;  %v4869_v5 = vpop.f32.mrf.mxu1 }
 0x2c4   : > { %v5341_v20 = vpop.f32.mrf.mxu0  ;;  %v2456_v63 = vadd.f32 %v4868_v40, %v6885_v29 }
 0x2c5   : > { %v4870_v2 = vpop.f32.mrf.mxu1 }
 0x2c6   : > { %v4871_v26 = vadd.f32 %v4870_v2, %v4869_v5  ;;  %v2613_v6 = vpop.f32.mrf.mxu0 }
 0x2c7   : > { %v7017_v18 = vadd.f32 %v2613_v6, %v2453_v4  ;;  %v4872_v57 = vpop.f32.mrf.mxu1 }
 0x2c8   : > { %v2461_v52 = vadd.f32 %v4871_v26, %v6871_v11  ;;  %v5342_v8 = vpop.f32.mrf.mxu0 }
 0x2c9   : > { %v4873_v37 = vpop.f32.mrf.mxu1 }
 0x2ca   : > { %v4874_v22 = vadd.f32 %v4873_v37, %v4872_v57  ;;  %v2616_v7 = vpop.f32.mrf.mxu0  ;;  %v7020_v60 = vadd.f32 %v5341_v20, %v2461_v52 }
 0x2cb   : > { %v7022_v1 = vadd.f32 %v2616_v7, %v2456_v63  ;;  %v4875_v53 = vpop.f32.mrf.mxu1 }
 0x2cc   : > { %v2464_v29 = vadd.f32 %v4874_v22, %v6880_v41  ;;  %v5345_v51 = vpop.f32.mrf.mxu0 }
 0x2cd   : > { %v4876_v42 = vpop.f32.mrf.mxu1 }
 0x2ce   : > { %v4877_v33 = vadd.f32 %v4876_v42, %v4875_v53  ;;  %v2629_v9 = vpop.f32.mrf.mxu0  ;;  %v7025_v12 = vadd.f32 %v5342_v8, %v2464_v29 }
 0x2cf   : > { %v4878_v62 = vpop.f32.mrf.mxu1 }
 0x2d0   : > { %v2469_v11 = vadd.f32 %v4877_v33, %v6900_v45  ;;  %v5346_v50 = vpop.f32.mrf.mxu0 }
 0x2d1   : > { %v4879_v30 = vpop.f32.mrf.mxu1 }
 0x2d2   : > { %v7028_v46 = vadd.f32 %v2629_v9, %v2469_v11  ;;  %v4880_v34 = vadd.f32 %v4879_v30, %v4878_v62  ;;  %v2632_v4 = vpop.f32.mrf.mxu0 }
 0x2d3   : > { %v4881_v13 = vpop.f32.mrf.mxu1 }
 0x2d4   : > { %v2472_v40 = vadd.f32 %v4880_v34, %v6913_v32  ;;  %v5349_v23 = vpop.f32.mrf.mxu0 }
 0x2d5   : > { %v4882_v41 = vpop.f32.mrf.mxu1 }
 0x2d6   : > { %v7031_v16 = vadd.f32 %v2632_v4, %v2472_v40  ;;  %v4883_v17 = vadd.f32 %v4882_v41, %v4881_v13  ;;  %v2645_v5 = vpop.f32.mrf.mxu0 }
 0x2d7   : > { %v4884_v10 = vpop.f32.mrf.mxu1 }
 0x2d8   : > { %v2477_v20 = vadd.f32 %v4883_v17, %v6894_v61  ;;  %v5350_v63 = vpop.f32.mrf.mxu0 }
 0x2d9   : > { %v4885_v45 = vpop.f32.mrf.mxu1 }
 0x2da   : > { %v4886_v2 = vadd.f32 %v4885_v45, %v4884_v10  ;;  %v2648_v26 = vpop.f32.mrf.mxu0  ;;  %v7034_v6 = vadd.f32 %v5345_v51, %v2477_v20 }
 0x2db   : > { %v4887_v57 = vpop.f32.mrf.mxu1 }
 0x2dc   : > { %v2480_v52 = vadd.f32 %v4886_v2, %v6905_v59  ;;  %v5353_v8 = vpop.f32.mrf.mxu0 }
 0x2dd   : > { %v4888_v32 = vpop.f32.mrf.mxu1 }
 0x2de   : > { %v4889_v37 = vadd.f32 %v4888_v32, %v4887_v57  ;;  %v2661_v22 = vpop.f32.mrf.mxu0  ;;  %v7037_v7 = vadd.f32 %v5346_v50, %v2480_v52 }
 0x2df   : > { %v4890_v53 = vpop.f32.mrf.mxu1 }
 0x2e0   : > { %v2485_v29 = vadd.f32 %v4889_v37, %v6928_v55  ;;  %v5354_v42 = vpop.f32.mrf.mxu0 }
 0x2e1   : > { %v4891_v61 = vpop.f32.mrf.mxu1 }
 0x2e2   : > { %v4892_v33 = vadd.f32 %v4891_v61, %v4890_v53  ;;  %v2664_v9 = vpop.f32.mrf.mxu0  ;;  %v7040_v62 = vadd.f32 %v2645_v5, %v2485_v29 }
 0x2e3   : > { %v4893_v51 = vpop.f32.mrf.mxu1 }
 0x2e4   : > { %v2488_v11 = vadd.f32 %v4892_v33, %v6939_v25  ;;  %v7043_v30 = vpop.f32.mrf.mxu0 }
 0x2e5   : > { %v4894_v59 = vpop.f32.mrf.mxu1 }
 0x2e6   : > { %v4895_v34 = vadd.f32 %v4894_v59, %v4893_v51  ;;  %v2677_v4 = vpop.f32.mrf.mxu0  ;;  %v7045_v13 = vadd.f32 %v2648_v26, %v2488_v11 }
 0x2e7   : > { %v4896_v50 = vpop.f32.mrf.mxu1 }
 0x2e8   : > { %v2493_v40 = vadd.f32 %v4895_v34, %v6922_v24  ;;  %v7048_v55 = vpop.f32.mrf.mxu0 }
 0x2e9   : > { %v4897_v41 = vpop.f32.mrf.mxu1 }
 0x2ea   : > { %v4898_v17 = vadd.f32 %v4897_v41, %v4896_v50  ;;  %v2680_v10 = vpop.f32.mrf.mxu0  ;;  %v7050_v5 = vadd.f32 %v5349_v23, %v2493_v40 }
 0x2eb   : > { %v4899_v20 = vpop.f32.mrf.mxu1 }
 0x2ec   : > { %v2496_v25 = vadd.f32 %v4898_v17, %v6933_v0  ;;  %v7053_v45 = vpop.f32.mrf.mxu0 }
 0x2ed   : > { %v4900_v2 = vpop.f32.mrf.mxu1 }
 0x2ee   : > { %v4901_v57 = vadd.f32 %v4900_v2, %v4899_v20  ;;  %v7055_v52 = vpop.f32.mrf.mxu0  ;;  %v7057_v26 = vadd.f32 %v5350_v63, %v2496_v25 }
 0x2ef   : > { %v4902_v32 = vpop.f32.mrf.mxu1 }
 0x2f0   : > { %v2501_v24 = vadd.f32 %v4901_v57, %v6951_v35  ;;  %v7060_v37 = vpop.f32.mrf.mxu0 }
 0x2f1   : > { %v4903_v53 = vpop.f32.mrf.mxu1 }
 0x2f2   : > { %v4904_v29 = vadd.f32 %v4903_v53, %v4902_v32  ;;  %v7062_v23 = vpop.f32.mrf.mxu0  ;;  %v7064_v61 = vadd.f32 %v2661_v22, %v2501_v24 }
 0x2f3   : > { %v4905_v0 = vpop.f32.mrf.mxu1 }
 0x2f4   : > { %v2504_v33 = vadd.f32 %v4904_v29, %v6960_v56  ;;  %v7067_v51 = vpop.f32.mrf.mxu0 }
 0x2f5   : > { %v4906_v11 = vpop.f32.mrf.mxu1 }
 0x2f6   : > { %v4907_v59 = vadd.f32 %v4906_v11, %v4905_v0  ;;  %v7069_v63 = vpop.f32.mrf.mxu0  ;;  %v7071_v34 = vadd.f32 %v2664_v9, %v2504_v33 }
 0x2f7   : > { %v4908_v35 = vpop.f32.mrf.mxu1 }
 0x2f8   : > { %v2509_v50 = vadd.f32 %v4907_v59, %v6945_v38  ;;  %v7074_v40 = vpop.f32.mrf.mxu0 }
 0x2f9   : > { %v4909_v41 = vpop.f32.mrf.mxu1 }
 0x2fa   : > { %v4910_v17 = vadd.f32 %v4909_v41, %v4908_v35  ;;  %v7076_v22 = vpop.f32.mrf.mxu0  ;;  %v7078_v20 = vadd.f32 %v5353_v8, %v2509_v50 }
 0x2fb   : > { %v4911_v56 = vpop.f32.mrf.mxu1 }
 0x2fc   : > { %v2512_v25 = vadd.f32 %v4910_v17, %v6957_v3  ;;  %v7081_v2 = vpop.f32.mrf.mxu0 }
 0x2fd   : > { %v4912_v57 = vpop.f32.mrf.mxu1 }
 0x2fe   : > { %v4913_v32 = vadd.f32 %v4912_v57, %v4911_v56  ;;  %v7083_v9 = vpop.f32.mrf.mxu0  ;;  %v7085_v24 = vadd.f32 %v5354_v42, %v2512_v25 }
 0x2ff   : > { %v4914_v38 = vpop.f32.mrf.mxu1 }
 0x300   : > { %v2517_v53 = vadd.f32 %v4913_v32, %v6968_v21  ;;  %v7088_v29 = vpop.f32.mrf.mxu0 }
 0x301   : > { %v4915_v0 = vpop.f32.mrf.mxu1 }
 0x302   : > { %v4916_v33 = vadd.f32 %v4915_v0, %v4914_v38  ;;  %v7090_v8 = vpop.f32.mrf.mxu0  ;;  %v7092_v11 = vadd.f32 %v2677_v4, %v2517_v53 }
 0x303   : > { %v4917_v3 = vpop.f32.mrf.mxu1 }
 0x304   : > { %v2520_v59 = vadd.f32 %v4916_v33, %v6974_v14  ;;  %v7095_v35 = vpop.f32.mrf.mxu0 }
 0x305   : > { %v4918_v50 = vpop.f32.mrf.mxu1 }
 0x306   : > { %v4919_v41 = vadd.f32 %v4918_v50, %v4917_v3  ;;  %v4994_v42 = vpop.f32.mrf.mxu0  ;;  %v7097_v17 = vadd.f32 %v2680_v10, %v2520_v59 }
 0x307   : > { %v4920_v56 = vpop.f32.mrf.mxu1 }
 0x308   : > { %7551 = vst [vmem:[#allocation28_spill] sm:$0xff] %v7097_v17  ;;  %v2525_v21 = vadd.f32 %v4919_v41, %v6964_v44  ;;  %v7100_v25 = vpop.f32.mrf.mxu0 }
 0x309   : > { %v4921_v57 = vpop.f32.mrf.mxu1 }
 0x30a   : > { %v7103_v32 = vadd.f32 %v7043_v30, %v2525_v21  ;;  %v4922_v4 = vadd.f32 %v4921_v57, %v4920_v56  ;;  %v7105_v38 = vpop.f32.mrf.mxu0 }
 0x30b   : > { %v4923_v14 = vpop.f32.mrf.mxu1 }
 0x30c   : > { %v2528_v53 = vadd.f32 %v4922_v4, %v6971_v47  ;;  %v7108_v0 = vpop.f32.mrf.mxu0 }
 0x30d   : > { %v4924_v33 = vpop.f32.mrf.mxu1 }
 0x30e   : > { %v7111_v10 = vadd.f32 %v7048_v55, %v2528_v53  ;;  %v4925_v3 = vadd.f32 %v4924_v33, %v4923_v14  ;;  %v7113_v44 = vpop.f32.mrf.mxu0 }
 0x30f   : > { %v4926_v59 = vpop.f32.mrf.mxu1 }
 0x310   : > { %7552 = vst [vmem:[#allocation29_spill] sm:$0xff] %v7111_v10  ;;  %v2533_v50 = vadd.f32 %v4925_v3, %v6982_v39  ;;  %v7116_v30 = vpop.f32.mrf.mxu0 }
 0x311   : > { %v4927_v41 = vpop.f32.mrf.mxu1 }
 0x312   : > { %v4928_v56 = vadd.f32 %v4927_v41, %v4926_v59  ;;  %v7118_v21 = vpop.f32.mrf.mxu0  ;;  %v7121_v47 = vadd.f32 %v7055_v52, %v2533_v50 }
 0x313   : > { %v4929_v57 = vpop.f32.mrf.mxu1 }
 0x314   : > { %v2536_v4 = vadd.f32 %v4928_v56, %v6989_v43  ;;  %v5005_v55 = vpop.f32.mrf.mxu0 }
 0x315   : > { %v4930_v53 = vpop.f32.mrf.mxu1 }
 0x316   : > { %v4931_v14 = vadd.f32 %v4930_v53, %v4929_v57  ;;  %v5006_v33 = vpop.f32.mrf.mxu0  ;;  %v7125_v10 = vadd.f32 %v7062_v23, %v2536_v4 }
 0x317   : > { %v4932_v39 = vpop.f32.mrf.mxu1 }
 0x318   : > { %7553 = vst [vmem:[#allocation30_spill] sm:$0xff] %v7125_v10  ;;  %v2541_v3 = vadd.f32 %v4931_v14, %v6978_v54  ;;  %v7128_v17 = vpop.f32.mrf.mxu0 }
 0x319   : > { %v4933_v59 = vpop.f32.mrf.mxu1 }
 0x31a   : > { %v7131_v41 = vadd.f32 %v7053_v45, %v2541_v3  ;;  %v4934_v52 = vadd.f32 %v4933_v59, %v4932_v39  ;;  %v7133_v50 = vpop.f32.mrf.mxu0 }
 0x31b   : > { %v4935_v43 = vpop.f32.mrf.mxu1 }
 0x31c   : > { %7554 = vst [vmem:[#allocation31_spill] sm:$0xff] %v7131_v41  ;;  %v2544_v56 = vadd.f32 %v4934_v52, %v6987_v27  ;;  %v7136_v57 = vpop.f32.mrf.mxu0 }
 0x31d   : > { %v4936_v53 = vpop.f32.mrf.mxu1 }
 0x31e   : > { %v7139_v23 = vadd.f32 %v7060_v37, %v2544_v56  ;;  %v4937_v4 = vadd.f32 %v4936_v53, %v4935_v43  ;;  %v7141_v54 = vpop.f32.mrf.mxu0 }
 0x31f   : > { %v4938_v14 = vpop.f32.mrf.mxu1 }
 0x320   : > { %7555 = vst [vmem:[#allocation32_spill] sm:$0xff] %v7139_v23  ;;  %v2549_v10 = vadd.f32 %v4937_v4, %v6996_v28  ;;  %v7144_v45 = vpop.f32.mrf.mxu0 }
 0x321   : > { %v4939_v39 = vpop.f32.mrf.mxu1 }
 0x322   : > { %v4940_v3 = vadd.f32 %v4939_v39, %v4938_v14  ;;  %v7146_v59 = vpop.f32.mrf.mxu0  ;;  %v7149_v27 = vadd.f32 %v7069_v63, %v2549_v10  ;;  %v4995_v63 = vadd.f32 %v4994_v42, %v7095_v35 }
 0x323   : > { %v4941_v52 = vpop.f32.mrf.mxu1 }
 0x324   : > { %7556 = vst [vmem:[#allocation33_spill] sm:$0xff] %v7149_v27  ;;  %v2552_v41 = vadd.f32 %v4940_v3, %v7002_v15  ;;  %v7152_v37 = vpop.f32.mrf.mxu0 }
 0x325   : > { %v4942_v43 = vpop.f32.mrf.mxu1 }
 0x326   : > { %v4943_v56 = vadd.f32 %v4942_v43, %v4941_v52  ;;  %v5018_v53 = vpop.f32.mrf.mxu0  ;;  %v7155_v23 = vadd.f32 %v7076_v22, %v2552_v41  ;;  %v4989_v52 = vadd.f32 %v7083_v9, %v7081_v2  ;;  %v7182_v2 = vld [vmem:[%s7470_s6] ss:$0 sm:$0xff]  ;;  %v4992_v9 = vadd.f32 %v7090_v8, %v7088_v29 }
 0x327   : > { %v4944_v28 = vpop.f32.mrf.mxu1 }
 0x328   : > { %v2557_v4 = vadd.f32 %v4943_v56, %v6993_v58  ;;  %v7158_v14 = vpop.f32.mrf.mxu0  ;;  %v4998_v56 = vadd.f32 %v7105_v38, %v7100_v25 }
 0x329   : > { %v4945_v39 = vpop.f32.mrf.mxu1 }
 0x32a   : > { %v7162_v10 = vadd.f32 %v7067_v51, %v2557_v4  ;;  %v4946_v15 = vadd.f32 %v4945_v39, %v4944_v28  ;;  %v7164_v3 = vpop.f32.mrf.mxu0  ;;  %v5007_v4 = vadd.f32 %v5006_v33, %v5005_v55 }
 0x32b   : > { %v5385_v27 = vpop.f32.mrf.mxu1 }
 0x32c   : > { %v2560_v22 = vadd.f32 %v4946_v15, %v7000_v48  ;;  %v7169_v41 = vpop.f32.mrf.mxu0  ;;  %v3554_v58 = vadd.f32 %v5385_v27, %v4995_v63 }
 0x32d   : > { %v3545_v43 = vpop.f32.mrf.mxu1 }
 0x32e   : > { %v7174_v35 = vadd.f32 %v7074_v40, %v2560_v22  ;;  %v3674_v51 = vadd.f32 %v3554_v58, %v7005_v31  ;;  %v7177_v42 = vpop.f32.mrf.mxu0  ;;  %v3546_v28 = vadd.f32 %v4989_v52, %v3545_v43  ;;  %v5001_v52 = vadd.f32 %v7113_v44, %v7108_v0 }
 0x32f   : > { %v5386_v48 = vpop.f32.mrf.mxu1  ;;  %v5004_v0 = vadd.f32 %v7118_v21, %v7116_v30  ;;  %v5010_v44 = vadd.f32 %v7133_v50, %v7128_v17  ;;  %v5013_v50 = vadd.f32 %v7141_v54, %v7136_v57 }
 0x330   : > { %v3672_v27 = vadd.f32 %v3546_v28, %v7007_v49  ;;  %v7187_v25 = vpop.f32.mrf.mxu0  ;;  %v3557_v40 = vadd.f32 %v5386_v48, %v4998_v56  ;;  %v3713_v31 = vadd.f32 %v7182_v2, %v3674_v51  ;;  %v3793_v48 = vld [vmem:[%s6250_s19 + $0x10] sm:$0xff] }
 0x331   : > { %v3548_v38 = vpop.f32.mrf.mxu1 }
 0x332   : > { %v3675_v39 = vadd.f32 %v3557_v40, %v7010_v19  ;;  %v7191_v63 = vpop.f32.mrf.mxu0  ;;  %v3549_v15 = vadd.f32 %v4992_v9, %v3548_v38  ;;  %v3711_v49 = vadd.f32 %v7182_v2, %v3672_v27  ;;  %v3745_v43 = vmax.f32 %v3713_v31, 0.0  ;;  %v3794_v9 = vld [vmem:[%s6250_s19 + $0x18] sm:$0xff] }
 0x333   : > { %v5389_v29 = vpop.f32.mrf.mxu1 }
 0x334   : > { %v3714_v8 = vadd.f32 %v7182_v2, %v3675_v39  ;;  %v3673_v22 = vadd.f32 %v3549_v15, %v7014_v36  ;;  %v5029_v55 = vpop.f32.mrf.mxu0  ;;  %v3570_v33 = vadd.f32 %v5389_v29, %v5007_v4  ;;  %v3743_v40 = vmax.f32 %v3711_v49, 0.0 }
 0x335   : > { %v3561_v58 = vpop.f32.mrf.mxu1 }
 0x336   : > { %v3746_v19 = vmax.f32 %v3714_v8, 0.0  ;;  %v3712_v56 = vadd.f32 %v7182_v2, %v3673_v22  ;;  %v5030_v51 = vpop.f32.mrf.mxu0  ;;  %v3562_v28 = vadd.f32 %v5001_v52, %v3561_v58  ;;  %v3678_v27 = vadd.f32 %v3570_v33, %v7020_v60 }
 0x337   : > { %v5390_v36 = vpop.f32.mrf.mxu1  ;;  %v3824_v52 = vpack.c.bf16 %v3794_v9, %v3793_v48  ;;  %v5019_v8 = vadd.f32 %v5018_v53, %v7152_v37  ;;  %v3796_v48 = vld [vmem:[%s6250_s19 + $0x28] sm:$0xff] }
 0x338   : > { %v3776_v38 = vpack.c.bf16 %v3746_v19, %v3745_v43  ;;  %v3744_v4 = vmax.f32 %v3712_v56, 0.0  ;;  %v3676_v31 = vadd.f32 %v3562_v28, %v7017_v18  ;;  %v5032_v39 = vpop.f32.mrf.mxu0  ;;  %v3573_v15 = vadd.f32 %v5390_v36, %v5010_v44  ;;  %v3795_v28 = vld [vmem:[%s6250_s19 + $0x20] sm:$0xff] }
 0x339   : > { %v3564_v29 = vpop.f32.mrf.mxu1  ;;  %v3717_v21 = vadd.f32 %v7182_v2, %v3678_v27 }
 0x33a   : > { %v3775_v22 = vpack.c.bf16 %v3744_v4, %v3743_v40  ;;  %v5033_v58 = vpop.f32.mrf.mxu0  ;;  %v3565_v30 = vadd.f32 %v5004_v0, %v3564_v29  ;;  %v3679_v17 = vadd.f32 %v3573_v15, %v7025_v12  ;;  %v3715_v18 = vadd.f32 %v7182_v2, %v3676_v31 }
 0x33b   : > { %v5393_v60 = vpop.f32.mrf.mxu1  ;;  %v5022_v12 = vadd.f32 %v7164_v3, %v7158_v14  ;;  %v5016_v4 = vadd.f32 %v7146_v59, %v7144_v45  ;;  %v3825_v31 = vpack.c.bf16 %v3796_v48, %v3795_v28  ;;  %v5031_v15 = vadd.f32 %v5030_v51, %v5029_v55 }
 0x33c   : > { %v3677_v49 = vadd.f32 %v3565_v30, %v7022_v1  ;;  %v7214_v33 = vpop.f32.mrf.mxu0  ;;  %v3586_v37 = vadd.f32 %v5393_v60, %v5019_v8  ;;  %4007 = vmatmul.mubr.bf16.vlgmr.msra.gmra.mxu1 %v3775_v22  ;;  %v3718_v53 = vadd.f32 %v7182_v2, %v3679_v17  ;;  %v3749_v1 = vmax.f32 %v3717_v21, 0.0 }
 0x33d   : > { %v3577_v43 = vpop.f32.mrf.mxu1  ;;  %4014 = vmatprep.mubr.bf16.mxu1 %v3824_v52  ;;  %v3747_v44 = vmax.f32 %v3715_v18, 0.0  ;;  %v5025_v17 = vadd.f32 %v7177_v42, %v7169_v41  ;;  %v5034_v60 = vadd.f32 %v5033_v58, %v5032_v39  ;;  %v3797_v41 = vld [vmem:[%s6250_s19 + $0x30] sm:$0xff]  ;;  %v3798_v42 = vld [vmem:[%s6250_s19 + $0x38] sm:$0xff] }
 0x33e   : > { %v3716_v19 = vadd.f32 %v7182_v2, %v3677_v49  ;;  %v3682_v56 = vadd.f32 %v3586_v37, %v7034_v6  ;;  %v5036_v57 = vpop.f32.mrf.mxu0  ;;  %v3578_v54 = vadd.f32 %v5013_v50, %v3577_v43  ;;  %v3750_v9 = vmax.f32 %v3718_v53, 0.0 }
 0x33f   : > { %v5394_v0 = vpop.f32.mrf.mxu1 }
 0x340   : > { %v3748_v27 = vmax.f32 %v3716_v19, 0.0  ;;  %v7223_v36 = vpop.f32.mrf.mxu0  ;;  %v3589_v40 = vadd.f32 %v5394_v0, %v5022_v12  ;;  %v7227_v14 = vpack.c.bf16 %v3750_v9, %v3749_v1  ;;  %v3680_v3 = vadd.f32 %v3578_v54, %v7028_v46 }
 0x341   : > { %v3580_v6 = vpop.f32.mrf.mxu1  ;;  %v3721_v52 = vadd.f32 %v7182_v2, %v3682_v56 }
 0x342   : > { %v3777_v29 = vpack.c.bf16 %v3748_v27, %v3747_v44  ;;  %v3683_v8 = vadd.f32 %v3589_v40, %v7037_v7  ;;  %v5039_v22 = vpop.f32.mrf.mxu0  ;;  %v3581_v30 = vadd.f32 %v5016_v4, %v3580_v6  ;;  %v3719_v55 = vadd.f32 %v7182_v2, %v3680_v3 }
 0x343   : > { %v5397_v21 = vpop.f32.mrf.mxu1  ;;  %v3753_v7 = vmax.f32 %v3721_v52, 0.0  ;;  %v5037_v27 = vadd.f32 %v5036_v57, %v7214_v33 }
 0x344   : > { %v3722_v45 = vadd.f32 %v7182_v2, %v3683_v8  ;;  %v5041_v59 = vpop.f32.mrf.mxu0  ;;  %v3602_v46 = vadd.f32 %v5397_v21, %v5031_v15  ;;  %4015 = vmatmul.mubr.bf16.gmra.mxu1 %v3776_v38  ;;  %v3681_v51 = vadd.f32 %v3581_v30, %v7031_v16  ;;  %v5028_v38 = vadd.f32 %v7191_v63, %v7187_v25  ;;  %v3799_v8 = vld [vmem:[%s6250_s19 + $0x40] sm:$0xff]  ;;  %v3800_v30 = vld [vmem:[%s6250_s19 + $0x48] sm:$0xff] }
 0x345   : > { %v3593_v50 = vpop.f32.mrf.mxu1  ;;  %4022 = vmatprep.mubr.bf16.mxu1 %v3825_v31  ;;  %v3751_v56 = vmax.f32 %v3719_v55, 0.0  ;;  %v5040_v21 = vadd.f32 %v5039_v22, %v7223_v36 }
 0x346   : > { %v3754_v18 = vmax.f32 %v3722_v45, 0.0  ;;  %v3686_v49 = vadd.f32 %v3602_v46, %v7050_v5  ;;  %v5042_v37 = vpop.f32.mrf.mxu0  ;;  %v3594_v53 = vadd.f32 %v5025_v17, %v3593_v50  ;;  %v3720_v43 = vadd.f32 %v7182_v2, %v3681_v51 }
 0x347   : > { %v5398_v12 = vpop.f32.mrf.mxu1  ;;  %v3826_v5 = vpack.c.bf16 %v3798_v42, %v3797_v41  ;;  %v5043_v1 = vadd.f32 %v5042_v37, %v5041_v59 }
 0x348   : > { %v7243_v39 = vpack.c.bf16 %v3754_v18, %v3753_v7  ;;  %v3684_v16 = vadd.f32 %v3594_v53, %v7040_v62  ;;  %v5044_v58 = vpop.f32.mrf.mxu0  ;;  %v3605_v19 = vadd.f32 %v5398_v12, %v5034_v60  ;;  %v3752_v54 = vmax.f32 %v3720_v43, 0.0 }
 0x349   : > { %v3596_v28 = vpop.f32.mrf.mxu1  ;;  %v3725_v48 = vadd.f32 %v7182_v2, %v3686_v49  ;;  %v3827_v7 = vpack.c.bf16 %v3800_v30, %v3799_v8 }
 0x34a   : > { %v3687_v9 = vadd.f32 %v3605_v19, %v7057_v26  ;;  %v5045_v0 = vpop.f32.mrf.mxu0  ;;  %v3597_v44 = vadd.f32 %v5028_v38, %v3596_v28  ;;  %v7249_v25 = vpack.c.bf16 %v3752_v54, %v3751_v56  ;;  %v3723_v63 = vadd.f32 %v7182_v2, %v3684_v16  ;;  %v3801_v19 = vld [vmem:[%s6250_s19 + $0x50] sm:$0xff]  ;;  %v3802_v56 = vld [vmem:[%s6250_s19 + $0x58] sm:$0xff] }
 0x34b   : > { %v5401_v62 = vpop.f32.mrf.mxu1  ;;  %v3757_v26 = vmax.f32 %v3725_v48, 0.0  ;;  %v5046_v17 = vadd.f32 %v5045_v0, %v5044_v58 }
 0x34c   : > { %v3726_v40 = vadd.f32 %v7182_v2, %v3687_v9  ;;  %v3685_v4 = vadd.f32 %v3597_v44, %v7045_v13  ;;  %v5047_v3 = vpop.f32.mrf.mxu0  ;;  %v3618_v6 = vadd.f32 %v5401_v62, %v5043_v1  ;;  %4023 = vmatmul.mubr.bf16.gmra.mxu1 %v3777_v29  ;;  %v3755_v13 = vmax.f32 %v3723_v63, 0.0 }
 0x34d   : > { %v3609_v31 = vpop.f32.mrf.mxu1  ;;  %4030 = vmatprep.mubr.bf16.mxu1 %v3826_v5  ;;  %v3828_v62 = vpack.c.bf16 %v3802_v56, %v3801_v19  ;;  %v7559_v56 = vld [vmem:[#allocation30_spill] sm:$0xff] }
 0x34e   : > { %v3758_v15 = vmax.f32 %v3726_v40, 0.0  ;;  %v3724_v33 = vadd.f32 %v7182_v2, %v3685_v4  ;;  %v5048_v57 = vpop.f32.mrf.mxu0  ;;  %v3610_v52 = vadd.f32 %v5037_v27, %v3609_v31  ;;  %v3690_v45 = vadd.f32 %v3618_v6, %v7078_v20 }
 0x34f   : > { %v5402_v59 = vpop.f32.mrf.mxu1  ;;  %v5049_v53 = vadd.f32 %v5048_v57, %v5047_v3 }
 0x350   : > { %v7259_v46 = vpack.c.bf16 %v3758_v15, %v3757_v26  ;;  %v3756_v29 = vmax.f32 %v3724_v33, 0.0  ;;  %v3688_v60 = vadd.f32 %v3610_v52, %v7064_v61  ;;  %v5050_v55 = vpop.f32.mrf.mxu0  ;;  %v3621_v51 = vadd.f32 %v5402_v59, %v5046_v17  ;;  %v7557_v15 = vld [vmem:[#allocation28_spill] sm:$0xff]  ;;  %v3804_v17 = vld [vmem:[%s6250_s19 + $0x68] sm:$0xff] }
 0x351   : > { %v3612_v50 = vpop.f32.mrf.mxu1  ;;  %v3729_v36 = vadd.f32 %v7182_v2, %v3690_v45 }
 0x352   : > { %v7262_v18 = vpack.c.bf16 %v3756_v29, %v3755_v13  ;;  %v5051_v49 = vpop.f32.mrf.mxu0  ;;  %v3613_v37 = vadd.f32 %v5040_v21, %v3612_v50  ;;  %v3691_v20 = vadd.f32 %v3621_v51, %v7085_v24  ;;  %v3727_v41 = vadd.f32 %v7182_v2, %v3688_v60  ;;  %v3803_v21 = vld [vmem:[%s6250_s19 + $0x60] sm:$0xff] }
 0x353   : > { %v5405_v22 = vpop.f32.mrf.mxu1  ;;  %v3761_v24 = vmax.f32 %v3729_v36, 0.0  ;;  %v5052_v1 = vadd.f32 %v5051_v49, %v5050_v55 }
 0x354   : > { %v3689_v61 = vadd.f32 %v3613_v37, %v7071_v34  ;;  %v5053_v42 = vpop.f32.mrf.mxu0  ;;  %4031 = vmatmul.mubr.bf16.gmra.mxu1 %v7227_v14  ;;  %v3730_v43 = vadd.f32 %v7182_v2, %v3691_v20  ;;  %v3759_v48 = vmax.f32 %v3727_v41, 0.0 }
 0x355   : > { %v3625_v12 = vpop.f32.mrf.mxu1  ;;  %4038 = vmatprep.mubr.bf16.mxu1 %v3827_v7  ;;  %v3829_v7 = vpack.c.bf16 %v3804_v17, %v3803_v21 }
 0x356   : > { %v3728_v38 = vadd.f32 %v7182_v2, %v3689_v61  ;;  %v5054_v16 = vpop.f32.mrf.mxu0  ;;  %v3626_v58 = vadd.f32 %v5049_v53, %v3625_v12  ;;  %v3762_v54 = vmax.f32 %v3730_v43, 0.0 }
 0x357   : > { %v5055_v28 = vadd.f32 %v5054_v16, %v5053_v42  ;;  %v5406_v5 = vpop.f32.mrf.mxu1  ;;  %v3805_v16 = vld [vmem:[%s6250_s19 + $0x70] sm:$0xff] }
 0x358   : > { %v3760_v34 = vmax.f32 %v3728_v38, 0.0  ;;  %v3692_v9 = vadd.f32 %v3626_v58, %v7092_v11  ;;  %v5056_v14 = vpop.f32.mrf.mxu0  ;;  %v7274_v0 = vpack.c.bf16 %v3762_v54, %v3761_v24  ;;  %v3806_v58 = vld [vmem:[%s6250_s19 + $0x78] sm:$0xff] }
 0x359   : > { %v3634_v44 = vadd.f32 %v5405_v22, %v5055_v28  ;;  %v3628_v27 = vpop.f32.mrf.mxu1 }
 0x35a   : > { %v7276_v63 = vpack.c.bf16 %v3760_v34, %v3759_v48  ;;  %v5057_v40 = vpop.f32.mrf.mxu0  ;;  %v3629_v4 = vadd.f32 %v5052_v1, %v3628_v27  ;;  %v3731_v26 = vadd.f32 %v7182_v2, %v3692_v9 }
 0x35b   : > { %v3694_v3 = vadd.f32 %v3634_v44, %v7103_v32  ;;  %v5058_v6 = vadd.f32 %v5057_v40, %v5056_v14  ;;  %v5409_v31 = vpop.f32.mrf.mxu1  ;;  %v7558_v32 = vld [vmem:[#allocation29_spill] sm:$0xff]  ;;  %v7560_v14 = vld [vmem:[#allocation31_spill] sm:$0xff] }
 0x35c   : > { %v3693_v11 = vadd.f32 %v3629_v4, %v7557_v15  ;;  %v5059_v33 = vpop.f32.mrf.mxu0  ;;  %4039 = vmatmul.mubr.bf16.gmra.mxu1 %v7249_v25  ;;  %v3763_v29 = vmax.f32 %v3731_v26, 0.0  ;;  %v3807_v26 = vld [vmem:[%s6250_s19 + $0x80] sm:$0xff] }
 0x35d   : > { %v3637_v57 = vadd.f32 %v5406_v5, %v5058_v6  ;;  %v3641_v52 = vpop.f32.mrf.mxu1  ;;  %4046 = vmatprep.mubr.bf16.mxu1 %v3828_v62  ;;  %v3733_v45 = vadd.f32 %v7182_v2, %v3694_v3 }
 0x35e   : > { %v3732_v8 = vadd.f32 %v7182_v2, %v3693_v11  ;;  %v5060_v30 = vpop.f32.mrf.mxu0  ;;  %v7561_v11 = vld [vmem:[#allocation32_spill] sm:$0xff] }
 0x35f   : > { %v3695_v59 = vadd.f32 %v3637_v57, %v7558_v32  ;;  %v5061_v13 = vadd.f32 %v5060_v30, %v5059_v33  ;;  %v5410_v51 = vpop.f32.mrf.mxu1  ;;  %v3765_v36 = vmax.f32 %v3733_v45, 0.0 }
 0x360   : > { %v3764_v60 = vmax.f32 %v3732_v8, 0.0  ;;  %v5062_v55 = vpop.f32.mrf.mxu0 }
 0x361   : > { %v3734_v50 = vadd.f32 %v7182_v2, %v3695_v59  ;;  %v3642_v25 = vadd.f32 %v5061_v13, %v3641_v52  ;;  %v3644_v41 = vpop.f32.mrf.mxu1  ;;  %v7562_v59 = vld [vmem:[#allocation33_spill] sm:$0xff] }
 0x362   : > { %v7288_v49 = vpack.c.bf16 %v3764_v60, %v3763_v29  ;;  %v5063_v37 = vpop.f32.mrf.mxu0 }
 0x363   : > { %v3766_v20 = vmax.f32 %v3734_v50, 0.0  ;;  %v3696_v22 = vadd.f32 %v3642_v25, %v7121_v47  ;;  %v5064_v53 = vadd.f32 %v5063_v37, %v5062_v55  ;;  %v5413_v38 = vpop.f32.mrf.mxu1  ;;  %v3809_v25 = vld [vmem:[%s6250_s19 + $0x90] sm:$0xff] }
 0x364   : > { %v5065_v61 = vpop.f32.mrf.mxu0  ;;  %4047 = vmatmul.mubr.bf16.gmra.mxu1 %v7243_v39  ;;  %v3830_v39 = vpack.c.bf16 %v3806_v58, %v3805_v16 }
 0x365   : > { %v3645_v42 = vadd.f32 %v5064_v53, %v3644_v41  ;;  %4054 = vmatprep.mubr.bf16.mxu1 %v3829_v7  ;;  %v7292_v43 = vpack.c.bf16 %v3766_v20, %v3765_v36  ;;  %v3735_v19 = vadd.f32 %v7182_v2, %v3696_v22  ;;  %v3657_v1 = vpop.f32.mrf.mxu1  ;;  %v3810_v7 = vld [vmem:[%s6250_s19 + $0x98] sm:$0xff] }
 0x366   : > { %v5066_v12 = vpop.f32.mrf.mxu0 }
 0x367   : > { %v3697_v24 = vadd.f32 %v3645_v42, %v7559_v56  ;;  %v5067_v54 = vadd.f32 %v5066_v12, %v5065_v61  ;;  %v3767_v34 = vmax.f32 %v3735_v19, 0.0  ;;  %v5414_v6 = vpop.f32.mrf.mxu1  ;;  %v3832_v61 = vpack.c.bf16 %v3810_v7, %v3809_v25 }
 0x368   : > { %v5068_v28 = vpop.f32.mrf.mxu0 }
 0x369   : > { %v3736_v47 = vadd.f32 %v7182_v2, %v3697_v24  ;;  %v3650_v5 = vadd.f32 %v5409_v31, %v5067_v54  ;;  %v3808_v31 = vld [vmem:[%s6250_s19 + $0x88] sm:$0xff]  ;;  %v3660_v17 = vpop.f32.mrf.mxu1 }
 0x36a   : > { %v5069_v48 = vpop.f32.mrf.mxu0  ;;  %v3812_v24 = vld [vmem:[%s6250_s19 + $0xa8] sm:$0xff] }
 0x36b   : > { %v3768_v9 = vmax.f32 %v3736_v47, 0.0  ;;  %v3698_v44 = vadd.f32 %v3650_v5, %v7560_v14  ;;  %v5070_v27 = vadd.f32 %v5069_v48, %v5068_v28  ;;  %v3814_v48 = vld [vmem:[%s6250_s19 + $0xb8] sm:$0xff] }
 0x36c   : > { %v5071_v62 = vpop.f32.mrf.mxu0  ;;  %4055 = vmatmul.mubr.bf16.gmra.mxu1 %v7262_v18  ;;  %v3831_v18 = vpack.c.bf16 %v3808_v31, %v3807_v26 }
 0x36d   : > { %v7301_v40 = vpack.c.bf16 %v3768_v9, %v3767_v34  ;;  %v3653_v4 = vadd.f32 %v5410_v51, %v5070_v27  ;;  %4062 = vmatprep.mubr.bf16.mxu1 %v3830_v39  ;;  %v3737_v15 = vadd.f32 %v7182_v2, %v3698_v44  ;;  %v3813_v39 = vld [vmem:[%s6250_s19 + $0xb0] sm:$0xff]  ;;  %v3819_v44 = vld [vmem:[%s6250_s19 + $0xe0] sm:$0xff]  ;;  %v3820_v27 = vld [vmem:[%s6250_s19 + $0xe8] sm:$0xff] }
 0x36e   : > { %v5072_v3 = vpop.f32.mrf.mxu0  ;;  %v3817_v9 = vld [vmem:[%s6250_s19 + $0xd0] sm:$0xff] }
 0x36f   : > { %v3699_v33 = vadd.f32 %v3653_v4, %v7561_v11  ;;  %v5073_v57 = vadd.f32 %v5072_v3, %v5071_v62  ;;  %v3769_v45 = vmax.f32 %v3737_v15, 0.0  ;;  %v3837_v62 = vpack.c.bf16 %v3820_v27, %v3819_v44  ;;  %v3822_v4 = vld [vmem:[%s6250_s19 + $0xf8] sm:$0xff] }
 0x370   : > { %v5074_v52 = vpop.f32.mrf.mxu0 }
 0x371   : > { %v3738_v8 = vadd.f32 %v7182_v2, %v3699_v33  ;;  %v3658_v30 = vadd.f32 %v5073_v57, %v3657_v1  ;;  %v3834_v1 = vpack.c.bf16 %v3814_v48, %v3813_v39 }
 0x372   : > { %v5075_v21 = vpop.f32.mrf.mxu0 }
 0x373   : > { %v3770_v32 = vmax.f32 %v3738_v8, 0.0  ;;  %v3700_v13 = vadd.f32 %v3658_v30, %v7562_v59  ;;  %v5076_v29 = vadd.f32 %v5075_v21, %v5074_v52 }
 0x374   : > { %v5077_v60 = vpop.f32.mrf.mxu0  ;;  %4063 = vmatmul.mubr.bf16.gmra.mxu1 %v7259_v46 }
 0x375   : > { %v3661_v55 = vadd.f32 %v5076_v29, %v3660_v17  ;;  %4070 = vmatprep.mubr.bf16.mxu1 %v3831_v18  ;;  %v3788_v51 = vpack.c.bf16 %v3770_v32, %v3769_v45  ;;  %v3739_v37 = vadd.f32 %v7182_v2, %v3700_v13 }
 0x376   : > { %v5078_v50 = vpop.f32.mrf.mxu0 }
 0x377   : > { %v3701_v36 = vadd.f32 %v3661_v55, %v7155_v23  ;;  %v5079_v20 = vadd.f32 %v5078_v50, %v5077_v60  ;;  %v3771_v46 = vmax.f32 %v3739_v37, 0.0  ;;  %v3811_v23 = vld [vmem:[%s6250_s19 + $0xa0] sm:$0xff] }
 0x378   : > { %v5080_v22 = vpop.f32.mrf.mxu0  ;;  %v3833_v47 = vpack.c.bf16 %v3812_v24, %v3811_v23 }
 0x379   : > { %v3740_v53 = vadd.f32 %v7182_v2, %v3701_v36  ;;  %v3666_v41 = vadd.f32 %v5413_v38, %v5079_v20 }
 0x37a   : > { %v5081_v42 = vpop.f32.mrf.mxu0 }
 0x37b   : > { %v3772_v12 = vmax.f32 %v3740_v53, 0.0  ;;  %v3702_v16 = vadd.f32 %v3666_v41, %v7162_v10  ;;  %v5082_v58 = vadd.f32 %v5081_v42, %v5080_v22 }
 0x37c   : > { %4071 = vmatmul.mubr.bf16.gmra.mxu1 %v7276_v63 }
 0x37d   : > { %v3789_v19 = vpack.c.bf16 %v3772_v12, %v3771_v46  ;;  %v3669_v56 = vadd.f32 %v5414_v6, %v5082_v58  ;;  %4078 = vmatprep.mubr.bf16.mxu1 %v3832_v61  ;;  %v3741_v38 = vadd.f32 %v7182_v2, %v3702_v16  ;;  %v7339_v6 = vld [vmem:[%s7472_s8] ss:$0 sm:$0xff] }
 0x37f   : > { %v3703_v54 = vadd.f32 %v3669_v56, %v7174_v35  ;;  %v3773_v10 = vmax.f32 %v3741_v38, 0.0  ;;  %v3815_v35 = vld [vmem:[%s6250_s19 + $0xc0] sm:$0xff] }
 0x381   : > { %v3742_v28 = vadd.f32 %v7182_v2, %v3703_v54  ;;  %v3816_v2 = vld [vmem:[%s6250_s19 + $0xc8] sm:$0xff] }
 0x382   : > { %v3835_v34 = vpack.c.bf16 %v3816_v2, %v3815_v35 }
 0x383   : > { %v3774_v5 = vmax.f32 %v3742_v28, 0.0 }
 0x384   : > { %4079 = vmatmul.mubr.bf16.gmra.mxu1 %v7274_v0  ;;  %v3818_v0 = vld [vmem:[%s6250_s19 + $0xd8] sm:$0xff] }
 0x385   : > { %4086 = vmatprep.mubr.bf16.mxu1 %v3833_v47  ;;  %v3790_v63 = vpack.c.bf16 %v3774_v5, %v3773_v10  ;;  %v3836_v14 = vpack.c.bf16 %v3818_v0, %v3817_v9 }
 0x38c   : > { %4087 = vmatmul.mubr.bf16.gmra.mxu1 %v7288_v49  ;;  %v3821_v49 = vld [vmem:[%s6250_s19 + $0xf0] sm:$0xff]  ;;  %s4200_s19 = scalar_lea.sflag [#allocation5], %s6244_s22 }
 0x38d   : > { %4094 = vmatprep.mubr.bf16.mxu1 %v3834_v1  ;;  %v3838_v3 = vpack.c.bf16 %v3822_v4, %v3821_v49 }
 0x394   : > { %4095 = vmatmul.mubr.bf16.gmra.mxu1 %v7292_v43 }
 0x395   : > { %4102 = vmatprep.mubr.bf16.mxu1 %v3835_v34 }
 0x39c   : > { %4103 = vmatmul.mubr.bf16.gmra.mxu1 %v7301_v40 }
 0x39d   : > { %4110 = vmatprep.mubr.bf16.mxu1 %v3836_v14 }
 0x3a4   : > { %4111 = vmatmul.mubr.bf16.gmra.mxu1 %v3788_v51 }
 0x3a5   : > { %4118 = vmatprep.mubr.bf16.mxu1 %v3837_v62 }
 0x3ac   : > { %4119 = vmatmul.mubr.bf16.gmra.mxu1 %v3789_v19 }
 0x3ad   : > { %4126 = vmatprep.mubr.bf16.mxu1 %v3838_v3 }
 0x3b4   : > { %4127 = vmatmul.mubr.bf16.gmra.mxu1 %v3790_v63 }
 0x3fc   : > { %v5123_v43 = vpop.f32.mrf.mxu1 }
 0x3fe   : > { %v5124_v40 = vpop.f32.mrf.mxu1 }
 0x3ff   : > { %v5125_v26 = vadd.f32 %v5124_v40, %v5123_v43 }
 0x400   : > { %v5126_v31 = vpop.f32.mrf.mxu1 }
 0x401   : > { %v4009_v15 = vadd.f32 %v5125_v26, %v7339_v6 }
 0x402   : > { %v5127_v11 = vpop.f32.mrf.mxu1 }
 0x403   : > { %v4135_v33 = vmax.f32 %v4009_v15, 0.0  ;;  %v5128_v57 = vadd.f32 %v5127_v11, %v5126_v31 }
 0x404   : > { %v5129_v52 = vpop.f32.mrf.mxu1 }
 0x405   : > { %4167 = vst [vmem:[%s7344_s25] sm:$0xff] %v4135_v33  ;;  %v4012_v8 = vadd.f32 %v5128_v57, %v7339_v6 }
 0x406   : > { %v5130_v30 = vpop.f32.mrf.mxu1 }
 0x407   : > { %v4136_v18 = vmax.f32 %v4012_v8, 0.0  ;;  %v5131_v21 = vadd.f32 %v5130_v30, %v5129_v52 }
 0x408   : > { %v5132_v17 = vpop.f32.mrf.mxu1 }
 0x409   : > { %4168 = vst [vmem:[%s7344_s25 + $0x8] sm:$0xff] %v4136_v18  ;;  %v4017_v45 = vadd.f32 %v5131_v21, %v7339_v6 }
 0x40a   : > { %v5133_v32 = vpop.f32.mrf.mxu1 }
 0x40b   : > { %v4137_v59 = vmax.f32 %v4017_v45, 0.0  ;;  %v5134_v13 = vadd.f32 %v5133_v32, %v5132_v17 }
 0x40c   : > { %v5135_v29 = vpop.f32.mrf.mxu1 }
 0x40d   : > { %4169 = vst [vmem:[%s7344_s25 + $0x10] sm:$0xff] %v4137_v59  ;;  %v4020_v60 = vadd.f32 %v5134_v13, %v7339_v6 }
 0x40e   : > { %v5136_v55 = vpop.f32.mrf.mxu1 }
 0x40f   : > { %v4138_v51 = vmax.f32 %v4020_v60, 0.0  ;;  %v5137_v50 = vadd.f32 %v5136_v55, %v5135_v29 }
 0x410   : > { %v5138_v25 = vpop.f32.mrf.mxu1 }
 0x411   : > { %4170 = vst [vmem:[%s7344_s25 + $0x18] sm:$0xff] %v4138_v51  ;;  %v4025_v7 = vadd.f32 %v5137_v50, %v7339_v6 }
 0x412   : > { %v5139_v37 = vpop.f32.mrf.mxu1 }
 0x413   : > { %v4139_v36 = vmax.f32 %v4025_v7, 0.0  ;;  %v5140_v20 = vadd.f32 %v5139_v37, %v5138_v25 }
 0x414   : > { %v5141_v22 = vpop.f32.mrf.mxu1 }
 0x415   : > { %4171 = vst [vmem:[%s7344_s25 + $0x20] sm:$0xff] %v4139_v36  ;;  %v4028_v53 = vadd.f32 %v5140_v20, %v7339_v6 }
 0x416   : > { %v5142_v41 = vpop.f32.mrf.mxu1 }
 0x417   : > { %v4140_v61 = vmax.f32 %v4028_v53, 0.0  ;;  %v5143_v42 = vadd.f32 %v5142_v41, %v5141_v22 }
 0x418   : > { %v5144_v46 = vpop.f32.mrf.mxu1 }
 0x419   : > { %4172 = vst [vmem:[%s7344_s25 + $0x28] sm:$0xff] %v4140_v61  ;;  %v4033_v12 = vadd.f32 %v5143_v42, %v7339_v6 }
 0x41a   : > { %v5145_v16 = vpop.f32.mrf.mxu1 }
 0x41b   : > { %v4141_v58 = vmax.f32 %v4033_v12, 0.0  ;;  %v5146_v19 = vadd.f32 %v5145_v16, %v5144_v46 }
 0x41c   : > { %v5147_v56 = vpop.f32.mrf.mxu1 }
 0x41d   : > { %4173 = vst [vmem:[%s7344_s25 + $0x30] sm:$0xff] %v4141_v58  ;;  %v4036_v23 = vadd.f32 %v5146_v19, %v7339_v6 }
 0x41e   : > { %v5148_v24 = vpop.f32.mrf.mxu1 }
 0x41f   : > { %v4142_v38 = vmax.f32 %v4036_v23, 0.0  ;;  %v5149_v54 = vadd.f32 %v5148_v24, %v5147_v56 }
 0x420   : > { %v5150_v28 = vpop.f32.mrf.mxu1 }
 0x421   : > { %4174 = vst [vmem:[%s7344_s25 + $0x38] sm:$0xff] %v4142_v38  ;;  %v4041_v47 = vadd.f32 %v5149_v54, %v7339_v6 }
 0x422   : > { %v5151_v10 = vpop.f32.mrf.mxu1 }
 0x423   : > { %v4143_v5 = vmax.f32 %v4041_v47, 0.0  ;;  %v5152_v63 = vadd.f32 %v5151_v10, %v5150_v28 }
 0x424   : > { %v5153_v39 = vpop.f32.mrf.mxu1 }
 0x425   : > { %4175 = vst [vmem:[%s7344_s25 + $0x40] sm:$0xff] %v4143_v5  ;;  %v4044_v48 = vadd.f32 %v5152_v63, %v7339_v6 }
 0x426   : > { %v5154_v1 = vpop.f32.mrf.mxu1 }
 0x427   : > { %v4144_v35 = vmax.f32 %v4044_v48, 0.0  ;;  %v5155_v2 = vadd.f32 %v5154_v1, %v5153_v39 }
 0x428   : > { %v5156_v34 = vpop.f32.mrf.mxu1 }
 0x429   : > { %4176 = vst [vmem:[%s7344_s25 + $0x48] sm:$0xff] %v4144_v35  ;;  %v4049_v9 = vadd.f32 %v5155_v2, %v7339_v6 }
 0x42a   : > { %v5157_v0 = vpop.f32.mrf.mxu1 }
 0x42b   : > { %v4145_v14 = vmax.f32 %v4049_v9, 0.0  ;;  %v5158_v44 = vadd.f32 %v5157_v0, %v5156_v34 }
 0x42c   : > { %v5159_v27 = vpop.f32.mrf.mxu1 }
 0x42d   : > { %4177 = vst [vmem:[%s7344_s25 + $0x50] sm:$0xff] %v4145_v14  ;;  %v4052_v62 = vadd.f32 %v5158_v44, %v7339_v6 }
 0x42e   : > { %v5160_v49 = vpop.f32.mrf.mxu1 }
 0x42f   : > { %v4146_v4 = vmax.f32 %v4052_v62, 0.0  ;;  %v5161_v3 = vadd.f32 %v5160_v49, %v5159_v27 }
 0x430   : > { %v5162_v43 = vpop.f32.mrf.mxu1 }
 0x431   : > { %4178 = vst [vmem:[%s7344_s25 + $0x58] sm:$0xff] %v4146_v4  ;;  %v4057_v40 = vadd.f32 %v5161_v3, %v7339_v6 }
 0x432   : > { %v5163_v26 = vpop.f32.mrf.mxu1 }
 0x433   : > { %v4147_v31 = vmax.f32 %v4057_v40, 0.0  ;;  %v5164_v15 = vadd.f32 %v5163_v26, %v5162_v43 }
 0x434   : > { %v5165_v11 = vpop.f32.mrf.mxu1 }
 0x435   : > { %4179 = vst [vmem:[%s7344_s25 + $0x60] sm:$0xff] %v4147_v31  ;;  %v4060_v33 = vadd.f32 %v5164_v15, %v7339_v6 }
 0x436   : > { %v5166_v57 = vpop.f32.mrf.mxu1 }
 0x437   : > { %v4148_v52 = vmax.f32 %v4060_v33, 0.0  ;;  %v5167_v8 = vadd.f32 %v5166_v57, %v5165_v11 }
 0x438   : > { %v5168_v30 = vpop.f32.mrf.mxu1 }
 0x439   : > { %4180 = vst [vmem:[%s7344_s25 + $0x68] sm:$0xff] %v4148_v52  ;;  %v4065_v18 = vadd.f32 %v5167_v8, %v7339_v6 }
 0x43a   : > { %v5169_v21 = vpop.f32.mrf.mxu1 }
 0x43b   : > { %v4149_v17 = vmax.f32 %v4065_v18, 0.0  ;;  %v5170_v45 = vadd.f32 %v5169_v21, %v5168_v30 }
 0x43c   : > { %v5171_v32 = vpop.f32.mrf.mxu1 }
 0x43d   : > { %4181 = vst [vmem:[%s7344_s25 + $0x70] sm:$0xff] %v4149_v17  ;;  %v4068_v59 = vadd.f32 %v5170_v45, %v7339_v6 }
 0x43e   : > { %v5172_v13 = vpop.f32.mrf.mxu1 }
 0x43f   : > { %v4150_v29 = vmax.f32 %v4068_v59, 0.0  ;;  %v5173_v60 = vadd.f32 %v5172_v13, %v5171_v32 }
 0x440   : > { %v5174_v55 = vpop.f32.mrf.mxu1 }
 0x441   : > { %4182 = vst [vmem:[%s7344_s25 + $0x78] sm:$0xff] %v4150_v29  ;;  %v4073_v51 = vadd.f32 %v5173_v60, %v7339_v6 }
 0x442   : > { %v5175_v50 = vpop.f32.mrf.mxu1 }
 0x443   : > { %v4151_v25 = vmax.f32 %v4073_v51, 0.0  ;;  %v5176_v7 = vadd.f32 %v5175_v50, %v5174_v55 }
 0x444   : > { %v5177_v37 = vpop.f32.mrf.mxu1 }
 0x445   : > { %4183 = vst [vmem:[%s7344_s25 + $0x80] sm:$0xff] %v4151_v25  ;;  %v4076_v36 = vadd.f32 %v5176_v7, %v7339_v6 }
 0x446   : > { %v5178_v20 = vpop.f32.mrf.mxu1 }
 0x447   : > { %v4152_v22 = vmax.f32 %v4076_v36, 0.0  ;;  %v5179_v53 = vadd.f32 %v5178_v20, %v5177_v37 }
 0x448   : > { %v5180_v41 = vpop.f32.mrf.mxu1 }
 0x449   : > { %4184 = vst [vmem:[%s7344_s25 + $0x88] sm:$0xff] %v4152_v22  ;;  %v4081_v61 = vadd.f32 %v5179_v53, %v7339_v6 }
 0x44a   : > { %v5181_v42 = vpop.f32.mrf.mxu1 }
 0x44b   : > { %v4153_v46 = vmax.f32 %v4081_v61, 0.0  ;;  %v5182_v12 = vadd.f32 %v5181_v42, %v5180_v41 }
 0x44c   : > { %v5183_v16 = vpop.f32.mrf.mxu1 }
 0x44d   : > { %4185 = vst [vmem:[%s7344_s25 + $0x90] sm:$0xff] %v4153_v46  ;;  %v4084_v58 = vadd.f32 %v5182_v12, %v7339_v6 }
 0x44e   : > { %v5184_v19 = vpop.f32.mrf.mxu1 }
 0x44f   : > { %v4154_v56 = vmax.f32 %v4084_v58, 0.0  ;;  %v5185_v23 = vadd.f32 %v5184_v19, %v5183_v16 }
 0x450   : > { %v5186_v24 = vpop.f32.mrf.mxu1 }
 0x451   : > { %4186 = vst [vmem:[%s7344_s25 + $0x98] sm:$0xff] %v4154_v56  ;;  %v4089_v38 = vadd.f32 %v5185_v23, %v7339_v6 }
 0x452   : > { %v5187_v54 = vpop.f32.mrf.mxu1 }
 0x453   : > { %v4155_v28 = vmax.f32 %v4089_v38, 0.0  ;;  %v5188_v47 = vadd.f32 %v5187_v54, %v5186_v24 }
 0x454   : > { %v5189_v10 = vpop.f32.mrf.mxu1 }
 0x455   : > { %4187 = vst [vmem:[%s7344_s25 + $0xa0] sm:$0xff] %v4155_v28  ;;  %v4092_v5 = vadd.f32 %v5188_v47, %v7339_v6 }
 0x456   : > { %v5190_v63 = vpop.f32.mrf.mxu1 }
 0x457   : > { %v4156_v39 = vmax.f32 %v4092_v5, 0.0  ;;  %v5191_v48 = vadd.f32 %v5190_v63, %v5189_v10 }
 0x458   : > { %v5192_v1 = vpop.f32.mrf.mxu1 }
 0x459   : > { %4188 = vst [vmem:[%s7344_s25 + $0xa8] sm:$0xff] %v4156_v39  ;;  %v4097_v35 = vadd.f32 %v5191_v48, %v7339_v6 }
 0x45a   : > { %v5193_v2 = vpop.f32.mrf.mxu1 }
 0x45b   : > { %v4157_v34 = vmax.f32 %v4097_v35, 0.0  ;;  %v5194_v9 = vadd.f32 %v5193_v2, %v5192_v1 }
 0x45c   : > { %v5195_v0 = vpop.f32.mrf.mxu1 }
 0x45d   : > { %4189 = vst [vmem:[%s7344_s25 + $0xb0] sm:$0xff] %v4157_v34  ;;  %v4100_v14 = vadd.f32 %v5194_v9, %v7339_v6 }
 0x45e   : > { %v5196_v44 = vpop.f32.mrf.mxu1 }
 0x45f   : > { %v4158_v27 = vmax.f32 %v4100_v14, 0.0  ;;  %v5197_v62 = vadd.f32 %v5196_v44, %v5195_v0 }
 0x460   : > { %v5198_v49 = vpop.f32.mrf.mxu1 }
 0x461   : > { %4190 = vst [vmem:[%s7344_s25 + $0xb8] sm:$0xff] %v4158_v27  ;;  %v4105_v4 = vadd.f32 %v5197_v62, %v7339_v6 }
 0x462   : > { %v5199_v3 = vpop.f32.mrf.mxu1 }
 0x463   : > { %v4159_v43 = vmax.f32 %v4105_v4, 0.0  ;;  %v5200_v40 = vadd.f32 %v5199_v3, %v5198_v49 }
 0x464   : > { %v5201_v26 = vpop.f32.mrf.mxu1 }
 0x465   : > { %4191 = vst [vmem:[%s7344_s25 + $0xc0] sm:$0xff] %v4159_v43  ;;  %v4108_v31 = vadd.f32 %v5200_v40, %v7339_v6 }
 0x466   : > { %v5202_v15 = vpop.f32.mrf.mxu1 }
 0x467   : > { %v4160_v11 = vmax.f32 %v4108_v31, 0.0  ;;  %v5203_v33 = vadd.f32 %v5202_v15, %v5201_v26 }
 0x468   : > { %v5204_v57 = vpop.f32.mrf.mxu1 }
 0x469   : > { %4192 = vst [vmem:[%s7344_s25 + $0xc8] sm:$0xff] %v4160_v11  ;;  %v4113_v52 = vadd.f32 %v5203_v33, %v7339_v6 }
 0x46a   : > { %v5205_v8 = vpop.f32.mrf.mxu1 }
 0x46b   : > { %v4161_v30 = vmax.f32 %v4113_v52, 0.0  ;;  %v5206_v18 = vadd.f32 %v5205_v8, %v5204_v57 }
 0x46c   : > { %v5207_v21 = vpop.f32.mrf.mxu1 }
 0x46d   : > { %4193 = vst [vmem:[%s7344_s25 + $0xd0] sm:$0xff] %v4161_v30  ;;  %v4116_v17 = vadd.f32 %v5206_v18, %v7339_v6 }
 0x46e   : > { %v5208_v45 = vpop.f32.mrf.mxu1 }
 0x46f   : > { %v4162_v32 = vmax.f32 %v4116_v17, 0.0  ;;  %v5209_v59 = vadd.f32 %v5208_v45, %v5207_v21 }
 0x470   : > { %v5210_v13 = vpop.f32.mrf.mxu1 }
 0x471   : > { %4194 = vst [vmem:[%s7344_s25 + $0xd8] sm:$0xff] %v4162_v32  ;;  %v4121_v29 = vadd.f32 %v5209_v59, %v7339_v6 }
 0x472   : > { %v5211_v60 = vpop.f32.mrf.mxu1 }
 0x473   : > { %v4163_v55 = vmax.f32 %v4121_v29, 0.0  ;;  %v5212_v51 = vadd.f32 %v5211_v60, %v5210_v13 }
 0x474   : > { %v5213_v50 = vpop.f32.mrf.mxu1 }
 0x475   : > { %4195 = vst [vmem:[%s7344_s25 + $0xe0] sm:$0xff] %v4163_v55  ;;  %v4124_v25 = vadd.f32 %v5212_v51, %v7339_v6 }
 0x476   : > { %v5214_v7 = vpop.f32.mrf.mxu1 }
 0x477   : > { %v4164_v37 = vmax.f32 %v4124_v25, 0.0  ;;  %v5215_v36 = vadd.f32 %v5214_v7, %v5213_v50 }
 0x478   : > { %v5216_v20 = vpop.f32.mrf.mxu1 }
 0x479   : > { %4196 = vst [vmem:[%s7344_s25 + $0xe8] sm:$0xff] %v4164_v37  ;;  %v4129_v22 = vadd.f32 %v5215_v36, %v7339_v6 }
 0x47a   : > { %v5217_v53 = vpop.f32.mrf.mxu1 }
 0x47b   : > { %v4165_v41 = vmax.f32 %v4129_v22, 0.0  ;;  %v5218_v61 = vadd.f32 %v5217_v53, %v5216_v20 }
 0x47d   : > { %4197 = vst [vmem:[%s7344_s25 + $0xf0] sm:$0xff] %v4165_v41  ;;  %v4132_v42 = vadd.f32 %v5218_v61, %v7339_v6 }
 0x47f   : > { %v4166_v46 = vmax.f32 %v4132_v42, 0.0 }
 0x481   : > { %4198 = vst [vmem:[%s7344_s25 + $0xf8] sm:$0xff] %v4166_v46 }
 0x482   : > { %5903 = shalt.err (!%p5900_p10)
}
 0x483   : > { %s5904_s27 = scalar_lea.hbm %s7413_s29, 4096  ;;  %s5908_s24 = scalar_lea.hbm %s7566_s26, 8192 }
 0x484   : > { %p5905_p2 = scmp.ne.s32.totalorder %s7413_s29, %s5904_s27  ;;  %p5909_p0 = scmp.lt.s32.totalorder %s7413_s29, %s7566_s26 }
 0x485   : > { %p5910_p11 = scmp.lt.s32.totalorder %s5908_s24, %s5904_s27 }
 0x486   : > { %p5906_p7 = pnand %p5905_p2, %p6100_p8 }
 0x487   : > { %p5911_p9 = por %p5910_p11, %p5909_p0 }
 0x488   : > { %p5907_p12 = pneg %p5906_p7 }
 0x48a   : > { %p5912_p6 = pnand %p5911_p9, %p5907_p12 }
 0x48c   : > { %5915 = shalt.err (!%p5912_p6)
}
 0x48d   : > { %s5997_s12 = smov 128   ;;  %s5998_s25 = smov 8  }
 0x48e   : > { %5449 = dma.vmem_to_hbm [thread:$0]  (%p6100_p8), %s7415_s9, 4096, %s7413_s29, %s4200_s19, %s5997_s12, %s5997_s12, %s5998_s25  }
 0x48f PF: > { %s7567_s16 = sld [smem:[#allocation20_spill]]  ;;  %p7570_p3 = scmp.ge.s32.totalorder %s5982_s14, 2 }
 0x490   : > { %s7568_s5 = sld [smem:[#allocation25_spill]] }
 0x495   : > { %s4231_s20 = sand.u32 1, %s7567_s16  }
 0x496   : > { %p7569_p13 = scmp.ne.s32.totalorder %s7568_s5, 0  ;;  %s4232_s3 = scalar_lea.sflag [#allocation5], %s4231_s20 }
 0x498   : > { %p5472_p5 = pnand %p7570_p3, %p7569_p13 }
 0x49a   : > { %p5473_p4 = pneg %p5472_p5 }
 0x49c   : > { %5957 = dma.done.wait (%p5473_p4), %s4232_s3, 4096  }
 0x49d   : > { %5959 = vsyncadd (%p5473_p4), %s4232_s3, 4294963200  ;;  %s30_s14 = sadd.s32 1, %s5982_s14   ;;  %s7571_s13 = sld [smem:[#allocation21_spill]] }
 0x49e   : > { %p27_p1 = scmp.ge.s32.totalorder %s30_s14, 4   ;;  %s7572_s11 = sld [smem:[#allocation27_spill]] }
 0x49f   : > { %s7573_s12 = sld [smem:[#allocation23_spill]]  ;;  %s7575_s30 = smov %s5966_s10 }
 0x4a0   : > { %s7574_s22 = sld [smem:[#allocation26_spill]] }
 0x4a2   :  { %29 = sbr.rel (!%p27_p1) target bundleno = 15 (0xf), region = 139 }
 0x4a3   : > { %s7576_s10 = smov %s7571_s13 }
 0x4a6   : > { %s7577_s13 = smov %s7574_s22 }
 0x4a7   :  { %4237 = vsyncpa [#allocation4], 1 }
 0x4a8   :  { %4239 = vsyncpa [#allocation4 + $0x1], 1 }
 0x4a9   :  { %4240 = vsyncpa [#allocation7], 1 }
 0x4aa   :  { %4242 = vsyncpa [#allocation7 + $0x1], 1 }
 0x4ab   :  { %4243 = vsyncpa [#allocation10], 1 }
 0x4ac   :  { %4244 = vsyncpa [#allocation13], 1 }
 0x4ad   :  { %4245 = vsyncpa [#allocation5], 1 }
 0x4ae   :  { %4247 = vsyncpa [#allocation5 + $0x1], 1 }

</bundles_post_ra>
